<compile_context>
chip_gen: v5e
topology: v5e:2x2
jax: 0.10.0
libtpu: 0.0.40
codegen_flags: <defaults>
</compile_context>

<pallas_src>
import functools

import numpy as np

import jax
import jax.numpy as jnp
from jax.experimental import pallas as pl
from jax.experimental.pallas import tpu as pltpu


_PAD = 8  # extra scratch rows so the largest row-shift (W+1) never reads OOB


# ---------------------------------------------------------------------------
# Fused per-stage kernel (one batch element per grid step)
# ---------------------------------------------------------------------------
def _stage_kernel(x_ref, e_ref, wup_ref, bup_ref, w1_ref, b1_ref, w2_ref,
                  b2_ref, out_ref, mix_ref, c1_ref, *, H, W):
    """One decoder stage, fully in polyphase layout.

    x_ref   : (H*W, Cin)          bf16   stage input, flat (row = h*W + w)
    e_ref   : (H*W + PAD, 4C)     bf16   cropped encoder feature, polyphase
    wup_ref : (Cin, 4C)           bf16   transposed-conv taps (phase col-groups)
    w1_ref  : (32C, 4C)           bf16   conv1 taps packed over (half, off, phase)
    w2_ref  : (16C, 4C)           bf16   conv2 taps packed over (off, phase)
    b*_ref  : (1, 4C)             f32    biases (tiled over the 4 phases)
    out_ref : (1, M2, 4C)         f32    conv2 result, polyphase, flat
    mix_ref : (H*W + PAD, 4C)     bf16   scratch: upsampled image, polyphase
    c1_ref  : (M1 + PAD, 4C)      bf16   scratch: conv1+ReLU, polyphase
    """
    f32, bf16 = jnp.float32, jnp.bfloat16
    P = H * W                      # pixels per phase
    M1 = (H - 1) * W               # conv1 rows (cols with w == W-1 are junk)
    M2 = (H - 2) * W               # conv2 rows (cols with w == W-1 are junk)
    offs = (0, 1, W, W + 1)        # phase-base shifts generated by the 3x3 taps
    C4 = mix_ref.shape[1]

    # keep the (never-used-by-valid-rows) pad rows finite / deterministic
    zpad = jnp.zeros((_PAD, C4), bf16)
    mix_ref[P:P + _PAD, :] = zpad
    c1_ref[M1:M1 + _PAD, :] = zpad

    # -- 1. ConvTranspose2d(k=2, s=2): ONE matmul, 4 taps = 4 phase groups ----
    mix = jnp.dot(x_ref[...], wup_ref[...], preferred_element_type=f32)
    mix_ref[0:P, :] = (mix + bup_ref[...]).astype(bf16)

    # -- 2. Conv2d(3x3) over concat([up, enc]) + ReLU: ONE K-packed matmul ----
    im1 = jnp.concatenate(
        [mix_ref[o:o + M1, :] for o in offs]
        + [e_ref[o:o + M1, :] for o in offs],
        axis=1)                                                # (M1, 32C)
    h1 = jnp.dot(im1, w1_ref[...], preferred_element_type=f32)
    c1_ref[0:M1, :] = jnp.maximum(h1 + b1_ref[...], 0.0).astype(bf16)

    # -- 3. Conv2d(3x3): ONE K-packed matmul, single bulk lane-dense store ----
    im2 = jnp.concatenate([c1_ref[o:o + M2, :] for o in offs], axis=1)  # (M2, 16C)
    h2 = jnp.dot(im2, w2_ref[...], preferred_element_type=f32)
    out_ref[0, :, :] = h2 + b2_ref[...]


# ---------------------------------------------------------------------------
# Host-side helpers
# ---------------------------------------------------------------------------
@functools.lru_cache(maxsize=None)
def _tap_assembly():
    """ASM[u, i, j, oo, t] = 1 iff output parity class u = (py, px) reads, for
    3x3 tap (i, j), the source at phase-base offset oo = 2*so_i + so_j and
    source phase t = 2*sp_i + sp_j, where (so, sp) = divmod(parity + tap, 2)."""
    asm = np.zeros((4, 3, 3, 4, 4), np.float32)
    for py in range(2):
        for px in range(2):
            u = 2 * py + px
            for i in range(3):
                for j in range(3):
                    so_i, sp_i = divmod(py + i, 2)
                    so_j, sp_j = divmod(px + j, 2)
                    asm[u, i, j, 2 * so_i + so_j, 2 * sp_i + sp_j] = 1.0
    return asm


def _decoder_stage(x_nhwc, enc_nhwc, p):
    """One decoder stage: up-conv -> crop+concat -> conv1+ReLU -> conv2."""
    B, H, W, Cin = x_nhwc.shape
    C = p["b_up"].shape[0]                      # Cout of this stage
    assert Cin == 2 * C, (Cin, C)               # required by the PyTorch module
    Hu, Wu = 2 * H, 2 * W
    Ho, Wo = Hu - 4, Wu - 4
    P = H * W
    M1 = (H - 1) * W
    M2 = (H - 2) * W

    He, We = enc_nhwc.shape[1], enc_nhwc.shape[2]
    top = int(round((He - Hu) / 2.0))           # torchvision CenterCrop rounding
    left = int(round((We - Wu) / 2.0))

    bf16, f32 = jnp.bfloat16, jnp.float32

    # ---- activations: flat / polyphase, bf16 (XLA layout plumbing only) ----
    x2d = x_nhwc.astype(bf16).reshape(B * P, Cin)
    ecrop = enc_nhwc[:, top:top + Hu, left:left + Wu, :]
    e_poly = (ecrop.reshape(B, H, 2, W, 2, C)
              .transpose(0, 1, 3, 2, 4, 5)
              .reshape(B, P, 4 * C))
    e_poly = jnp.pad(e_poly, ((0, 0), (0, _PAD), (0, 0)))
    e2d = e_poly.astype(bf16).reshape(B * (P + _PAD), 4 * C)

    # ---- weights: fold taps & parity classes into lane-dense packed mats ----
    wup = jnp.transpose(p["w_up"], (0, 2, 3, 1)).reshape(Cin, 4 * C).astype(bf16)
    asm = jnp.asarray(_tap_assembly())                       # (4,3,3,4,4) const
    w1r = p["w1"].reshape(3, 3, 2, C, C)                     # (i,j,half,cin,cout)
    w1p = jnp.einsum("uijot,ijhcd->hotcud", asm, w1r).reshape(32 * C, 4 * C)
    w2p = jnp.einsum("uijot,ijcd->otcud", asm, p["w2"]).reshape(16 * C, 4 * C)
    w1p = w1p.astype(bf16)
    w2p = w2p.astype(bf16)
    bup = jnp.tile(p["b_up"], 4).reshape(1, 4 * C).astype(f32)
    b1 = jnp.tile(p["b1"], 4).reshape(1, 4 * C).astype(f32)
    b2 = jnp.tile(p["b2"], 4).reshape(1, 4 * C).astype(f32)

    flops = 2 * B * (P * Cin * 4 * C + M1 * 32 * C * 4 * C + M2 * 16 * C * 4 * C)
    bytes_accessed = 2 * (x2d.size + e2d.size + wup.size + w1p.size + w2p.size) \
        + 4 * (bup.size + b1.size + b2.size + B * M2 * 4 * C)

    kernel = functools.partial(_stage_kernel, H=H, W=W)

    out_poly = pl.pallas_call(
        kernel,
        out_shape=jax.ShapeDtypeStruct((B, M2, 4 * C), f32),
        grid_spec=pltpu.PrefetchScalarGridSpec(
            num_scalar_prefetch=0,
            grid=(B,),
            in_specs=[
                pl.BlockSpec((P, Cin), lambda b: (b, 0)),             # x (flat)
                pl.BlockSpec((P + _PAD, 4 * C), lambda b: (b, 0)),    # enc (polyphase)
                pl.BlockSpec((Cin, 4 * C), lambda b: (0, 0)),         # w_up packed
                pl.BlockSpec((1, 4 * C), lambda b: (0, 0)),           # b_up
                pl.BlockSpec((32 * C, 4 * C), lambda b: (0, 0)),      # conv1 packed
                pl.BlockSpec((1, 4 * C), lambda b: (0, 0)),           # b1
                pl.BlockSpec((16 * C, 4 * C), lambda b: (0, 0)),      # conv2 packed
                pl.BlockSpec((1, 4 * C), lambda b: (0, 0)),           # b2
            ],
            out_specs=pl.BlockSpec((1, M2, 4 * C), lambda b: (b, 0, 0)),
            scratch_shapes=[
                pltpu.VMEM((P + _PAD, 4 * C), bf16),    # upsampled (polyphase)
                pltpu.VMEM((M1 + _PAD, 4 * C), bf16),   # conv1+ReLU (polyphase)
            ],
        ),
        compiler_params=pltpu.CompilerParams(
            dimension_semantics=("parallel",)),
        cost_estimate=pl.CostEstimate(flops=flops, transcendentals=0,
                                      bytes_accessed=bytes_accessed),
    )(x2d, e2d, wup, bup, w1p, b1, w2p, b2)

    # ---- de-interleave polyphase -> dense NHWC + crop junk cols (XLA glue) --
    out = (out_poly.reshape(B, H - 2, W, 2, 2, C)[:, :, :W - 2]
           .transpose(0, 1, 3, 2, 4, 5)
           .reshape(B, Ho, Wo, C))
    return out


def decoder_forward(params, x, encoder_features):
    """Mirrors Decoder.forward: one fused pallas_call per stage."""
    for p, enc in zip(params, encoder_features):
        x = _decoder_stage(x, enc, p)
    return x


# ---------------------------------------------------------------------------
# Pure-JAX f32 reference (for validation) and parameter init
# ---------------------------------------------------------------------------
def decoder_reference(params, x, encoder_features):
    dn = ("NHWC", "HWIO", "NHWC")
    for p, enc in zip(params, encoder_features):
        B, H, W, _ = x.shape
        Cout = p["b_up"].shape[0]
        # ConvTranspose2d(k=2, s=2): out[2h+p, 2w+q] = x[h, w] @ w_up[:, :, p, q]
        t = jnp.einsum("bhwi,iopq->bhpwqo", x, p["w_up"])
        up = t.reshape(B, 2 * H, 2 * W, Cout) + p["b_up"]
        Hu, Wu = 2 * H, 2 * W
        He, We = enc.shape[1], enc.shape[2]
        top = int(round((He - Hu) / 2.0))
        left = int(round((We - Wu) / 2.0))
        cat = jnp.concatenate(
            [up, enc[:, top:top + Hu, left:left + Wu, :]], axis=-1)
        y = jax.lax.conv_general_dilated(cat, p["w1"], (1, 1), "VALID",
                                         dimension_numbers=dn) + p["b1"]
        y = jnp.maximum(y, 0.0)
        x = jax.lax.conv_general_dilated(y, p["w2"], (1, 1), "VALID",
                                         dimension_numbers=dn) + p["b2"]
    return x


def init_params(key, channels=(64, 32, 16)):
    params = []
    for i in range(len(channels) - 1):
        cin, cout = channels[i], channels[i + 1]
        key, k0, k1, k2, k3, k4, k5 = jax.random.split(key, 7)
        s_up = 1.0 / (cin * 4) ** 0.5    # fan_in of 2x2 transpose conv
        s1 = 1.0 / (cin * 9) ** 0.5      # fan_in of 3x3 conv1
        s2 = 1.0 / (cout * 9) ** 0.5     # fan_in of 3x3 conv2
        params.append(dict(
            w_up=jax.random.uniform(k0, (cin, cout, 2, 2), jnp.float32, -s_up, s_up),
            b_up=jax.random.uniform(k1, (cout,), jnp.float32, -s_up, s_up),
            w1=jax.random.uniform(k2, (3, 3, cin, cout), jnp.float32, -s1, s1),
            b1=jax.random.uniform(k3, (cout,), jnp.float32, -s1, s1),
            w2=jax.random.uniform(k4, (3, 3, cout, cout), jnp.float32, -s2, s2),
            b2=jax.random.uniform(k5, (cout,), jnp.float32, -s2, s2),
        ))
    return params


if __name__ == "__main__":
    channels = (64, 32, 16)
    B = 2
    key = jax.random.PRNGKey(0)
    kp, kx, ke0, ke1 = jax.random.split(key, 4)

    params = init_params(kp, channels)

    # PyTorch-equivalent NCHW shapes: x (2,64,8,8), enc[0] (2,32,18,18), enc[1] (2,16,26,26)
    x = jax.random.normal(kx, (B, 8, 8, channels[0]), jnp.float32)
    encoder_features = [
        jax.random.normal(ke0, (B, 18, 18, channels[1]), jnp.float32),
        jax.random.normal(ke1, (B, 26, 26, channels[2]), jnp.float32),
    ]

    fwd = jax.jit(decoder_forward)
    out = jax.block_until_ready(fwd(params, x, encoder_features))

    # stage 0: 8 -> up 16 -> conv 14 -> conv 12 ; stage 1: 12 -> 24 -> 22 -> 20
    assert out.shape == (B, 20, 20, channels[-1]), out.shape
    assert bool(jnp.all(jnp.isfinite(out)))

    # numerical check vs. a pure-JAX f32 reference (bf16 MXU operands).
    # Tolerance tightened vs. v1 (8e-2) now that the extra recasts are gone.
    ref = decoder_reference(params, x, encoder_features)
    rel = float(jnp.linalg.norm(out - ref) / (jnp.linalg.norm(ref) + 1e-12))
    assert rel < 3e-2, rel

    print("KERNEL_OK")
</pallas_src>

<mosaic_0001>
module attributes {stable_mosaic.version = 11 : i64} {
  func.func @_stage_kernel(%arg0: i32, %arg1: memref<64x64xbf16, #tpu.memory_space<vmem>>, %arg2: memref<72x128xbf16, #tpu.memory_space<vmem>>, %arg3: memref<64x128xbf16, #tpu.memory_space<vmem>>, %arg4: memref<1x128xf32, #tpu.memory_space<vmem>>, %arg5: memref<1024x128xbf16, #tpu.memory_space<vmem>>, %arg6: memref<1x128xf32, #tpu.memory_space<vmem>>, %arg7: memref<512x128xbf16, #tpu.memory_space<vmem>>, %arg8: memref<1x128xf32, #tpu.memory_space<vmem>>, %arg9: memref<1x48x128xf32, #tpu.memory_space<vmem>>, %arg10: memref<72x128xbf16, #tpu.memory_space<vmem>>, %arg11: memref<64x128xbf16, #tpu.memory_space<vmem>>) attributes {dimension_semantics = [#tpu.dimension_semantics<parallel>], iteration_bounds = array<i64: 2>, scalar_prefetch = 0 : i64, scratch_operands = 2 : i64, tpu.core_type = #tpu.core_type<tc>, window_params = [{transform_indices = @transform_0, window_bounds = array<i64: 64, 64>}, {transform_indices = @transform_1, window_bounds = array<i64: 72, 128>}, {pipeline_mode = #tpu.pipeline_mode<synchronous>, transform_indices = @transform_2, window_bounds = array<i64: 64, 128>}, {pipeline_mode = #tpu.pipeline_mode<synchronous>, transform_indices = @transform_3, window_bounds = array<i64: 1, 128>}, {pipeline_mode = #tpu.pipeline_mode<synchronous>, transform_indices = @transform_4, window_bounds = array<i64: 1024, 128>}, {pipeline_mode = #tpu.pipeline_mode<synchronous>, transform_indices = @transform_5, window_bounds = array<i64: 1, 128>}, {pipeline_mode = #tpu.pipeline_mode<synchronous>, transform_indices = @transform_6, window_bounds = array<i64: 512, 128>}, {pipeline_mode = #tpu.pipeline_mode<synchronous>, transform_indices = @transform_7, window_bounds = array<i64: 1, 128>}, {transform_indices = @transform_8, window_bounds = array<i64: 1, 48, 128>}]} {
    %cst = arith.constant 0.000000e+00 : bf16
    %0 = vector.broadcast %cst : bf16 to vector<8x128xbf16>
    %c64 = arith.constant 64 : index
    %c0 = arith.constant 0 : index
    %1 = vector.load %arg10[%c64, %c0] : memref<72x128xbf16, #tpu.memory_space<vmem>>, vector<8x128xbf16>
    tpu.vector_store %arg10[%c64, %c0], %0 {strides = array<i32>} : memref<72x128xbf16, #tpu.memory_space<vmem>>, vector<8x128xbf16>,
    %c56 = arith.constant 56 : index
    %c0_0 = arith.constant 0 : index
    %2 = vector.load %arg11[%c56, %c0_0] : memref<64x128xbf16, #tpu.memory_space<vmem>>, vector<8x128xbf16>
    tpu.vector_store %arg11[%c56, %c0_0], %0 {strides = array<i32>} : memref<64x128xbf16, #tpu.memory_space<vmem>>, vector<8x128xbf16>,
    %c0_1 = arith.constant 0 : index
    %c0_2 = arith.constant 0 : index
    %3 = vector.load %arg1[%c0_1, %c0_2] : memref<64x64xbf16, #tpu.memory_space<vmem>>, vector<64x64xbf16>
    %c0_3 = arith.constant 0 : index
    %c0_4 = arith.constant 0 : index
    %4 = vector.load %arg3[%c0_3, %c0_4] : memref<64x128xbf16, #tpu.memory_space<vmem>>, vector<64x128xbf16>
    %cst_5 = arith.constant dense<0.000000e+00> : vector<64x128xf32>
    %5 = tpu.matmul %3, %4, %cst_5 {dimension_numbers = #tpu.dot_dimension_numbers<[1], [0], [0], [1], [0, 0, 1, 1], [], []>} : vector<64x64xbf16>, vector<64x128xbf16>, vector<64x128xf32> -> vector<64x128xf32>
    %c0_6 = arith.constant 0 : index
    %c0_7 = arith.constant 0 : index
    %6 = vector.load %arg4[%c0_6, %c0_7] : memref<1x128xf32, #tpu.memory_space<vmem>>, vector<1x128xf32>
    %7 = vector.broadcast %6 : vector<1x128xf32> to vector<64x128xf32>
    %8 = arith.addf %5, %7 : vector<64x128xf32>
    %9 = arith.truncf %8 : vector<64x128xf32> to vector<64x128xbf16>
    %c0_8 = arith.constant 0 : index
    %c0_9 = arith.constant 0 : index
    %10 = vector.load %arg10[%c0_8, %c0_9] : memref<72x128xbf16, #tpu.memory_space<vmem>>, vector<64x128xbf16>
    tpu.vector_store %arg10[%c0_8, %c0_9], %9 {strides = array<i32>} : memref<72x128xbf16, #tpu.memory_space<vmem>>, vector<64x128xbf16>,
    %c0_10 = arith.constant 0 : index
    %c0_11 = arith.constant 0 : index
    %11 = vector.load %arg10[%c0_10, %c0_11] : memref<72x128xbf16, #tpu.memory_space<vmem>>, vector<56x128xbf16>
    %c1 = arith.constant 1 : index
    %c0_12 = arith.constant 0 : index
    %12 = vector.load %arg10[%c1, %c0_12] : memref<72x128xbf16, #tpu.memory_space<vmem>>, vector<56x128xbf16>
    %c8 = arith.constant 8 : index
    %c0_13 = arith.constant 0 : index
    %13 = vector.load %arg10[%c8, %c0_13] : memref<72x128xbf16, #tpu.memory_space<vmem>>, vector<56x128xbf16>
    %c9 = arith.constant 9 : index
    %c0_14 = arith.constant 0 : index
    %14 = vector.load %arg10[%c9, %c0_14] : memref<72x128xbf16, #tpu.memory_space<vmem>>, vector<56x128xbf16>
    %c0_15 = arith.constant 0 : index
    %c0_16 = arith.constant 0 : index
    %15 = vector.load %arg2[%c0_15, %c0_16] : memref<72x128xbf16, #tpu.memory_space<vmem>>, vector<56x128xbf16>
    %c1_17 = arith.constant 1 : index
    %c0_18 = arith.constant 0 : index
    %16 = vector.load %arg2[%c1_17, %c0_18] : memref<72x128xbf16, #tpu.memory_space<vmem>>, vector<56x128xbf16>
    %c8_19 = arith.constant 8 : index
    %c0_20 = arith.constant 0 : index
    %17 = vector.load %arg2[%c8_19, %c0_20] : memref<72x128xbf16, #tpu.memory_space<vmem>>, vector<56x128xbf16>
    %c9_21 = arith.constant 9 : index
    %c0_22 = arith.constant 0 : index
    %18 = vector.load %arg2[%c9_21, %c0_22] : memref<72x128xbf16, #tpu.memory_space<vmem>>, vector<56x128xbf16>
    %19 = tpu.concatenate %11, %12, %13, %14, %15, %16, %17, %18 in 1 : vector<56x128xbf16>, vector<56x128xbf16>, vector<56x128xbf16>, vector<56x128xbf16>, vector<56x128xbf16>, vector<56x128xbf16>, vector<56x128xbf16>, vector<56x128xbf16> -> vector<56x1024xbf16>
    %c0_23 = arith.constant 0 : index
    %c0_24 = arith.constant 0 : index
    %20 = vector.load %arg5[%c0_23, %c0_24] : memref<1024x128xbf16, #tpu.memory_space<vmem>>, vector<1024x128xbf16>
    %cst_25 = arith.constant dense<0.000000e+00> : vector<56x128xf32>
    %21 = tpu.matmul %19, %20, %cst_25 {dimension_numbers = #tpu.dot_dimension_numbers<[1], [0], [0], [1], [0, 0, 1, 1], [], []>} : vector<56x1024xbf16>, vector<1024x128xbf16>, vector<56x128xf32> -> vector<56x128xf32>
    %c0_26 = arith.constant 0 : index
    %c0_27 = arith.constant 0 : index
    %22 = vector.load %arg6[%c0_26, %c0_27] : memref<1x128xf32, #tpu.memory_space<vmem>>, vector<1x128xf32>
    %23 = vector.broadcast %22 : vector<1x128xf32> to vector<56x128xf32>
    %24 = arith.addf %21, %23 : vector<56x128xf32>
    %cst_28 = arith.constant 0.000000e+00 : f32
    %25 = vector.broadcast %cst_28 : f32 to vector<56x128xf32>
    %26 = arith.maximumf %24, %25 : vector<56x128xf32>
    %27 = arith.truncf %26 : vector<56x128xf32> to vector<56x128xbf16>
    %c0_29 = arith.constant 0 : index
    %c0_30 = arith.constant 0 : index
    %28 = vector.load %arg11[%c0_29, %c0_30] : memref<64x128xbf16, #tpu.memory_space<vmem>>, vector<56x128xbf16>
    tpu.vector_store %arg11[%c0_29, %c0_30], %27 {strides = array<i32>} : memref<64x128xbf16, #tpu.memory_space<vmem>>, vector<56x128xbf16>,
    %c0_31 = arith.constant 0 : index
    %c0_32 = arith.constant 0 : index
    %29 = vector.load %arg11[%c0_31, %c0_32] : memref<64x128xbf16, #tpu.memory_space<vmem>>, vector<48x128xbf16>
    %c1_33 = arith.constant 1 : index
    %c0_34 = arith.constant 0 : index
    %30 = vector.load %arg11[%c1_33, %c0_34] : memref<64x128xbf16, #tpu.memory_space<vmem>>, vector<48x128xbf16>
    %c8_35 = arith.constant 8 : index
    %c0_36 = arith.constant 0 : index
    %31 = vector.load %arg11[%c8_35, %c0_36] : memref<64x128xbf16, #tpu.memory_space<vmem>>, vector<48x128xbf16>
    %c9_37 = arith.constant 9 : index
    %c0_38 = arith.constant 0 : index
    %32 = vector.load %arg11[%c9_37, %c0_38] : memref<64x128xbf16, #tpu.memory_space<vmem>>, vector<48x128xbf16>
    %33 = tpu.concatenate %29, %30, %31, %32 in 1 : vector<48x128xbf16>, vector<48x128xbf16>, vector<48x128xbf16>, vector<48x128xbf16> -> vector<48x512xbf16>
    %c0_39 = arith.constant 0 : index
    %c0_40 = arith.constant 0 : index
    %34 = vector.load %arg7[%c0_39, %c0_40] : memref<512x128xbf16, #tpu.memory_space<vmem>>, vector<512x128xbf16>
    %cst_41 = arith.constant dense<0.000000e+00> : vector<48x128xf32>
    %35 = tpu.matmul %33, %34, %cst_41 {dimension_numbers = #tpu.dot_dimension_numbers<[1], [0], [0], [1], [0, 0, 1, 1], [], []>} : vector<48x512xbf16>, vector<512x128xbf16>, vector<48x128xf32> -> vector<48x128xf32>
    %c0_42 = arith.constant 0 : index
    %c0_43 = arith.constant 0 : index
    %36 = vector.load %arg8[%c0_42, %c0_43] : memref<1x128xf32, #tpu.memory_space<vmem>>, vector<1x128xf32>
    %37 = vector.broadcast %36 : vector<1x128xf32> to vector<48x128xf32>
    %38 = arith.addf %35, %37 : vector<48x128xf32>
    %c0_44 = arith.constant 0 : index
    %c0_45 = arith.constant 0 : index
    %c0_46 = arith.constant 0 : index
    %39 = vector.load %arg9[%c0_44, %c0_45, %c0_46] : memref<1x48x128xf32, #tpu.memory_space<vmem>>, vector<1x48x128xf32>
    %40 = vector.shape_cast %39 : vector<1x48x128xf32> to vector<48x128xf32>
    %41 = vector.shape_cast %38 : vector<48x128xf32> to vector<1x48x128xf32>
    tpu.vector_store %arg9[%c0_44, %c0_45, %c0_46], %41 {strides = array<i32>} : memref<1x48x128xf32, #tpu.memory_space<vmem>>, vector<1x48x128xf32>,
    return
  }
  func.func @transform_0(%arg0: i32) -> (i32, i32) {
    %c0_i32 = arith.constant 0 : i32
    %c0_i32_0 = arith.constant 0 : i32
    return %arg0, %c0_i32 : i32, i32
  }
  func.func @transform_1(%arg0: i32) -> (i32, i32) {
    %c0_i32 = arith.constant 0 : i32
    %c0_i32_0 = arith.constant 0 : i32
    return %arg0, %c0_i32 : i32, i32
  }
  func.func @transform_2(%arg0: i32) -> (i32, i32) {
    %c0_i32 = arith.constant 0 : i32
    %c0_i32_0 = arith.constant 0 : i32
    %c0_i32_1 = arith.constant 0 : i32
    return %c0_i32, %c0_i32_0 : i32, i32
  }
  func.func @transform_3(%arg0: i32) -> (i32, i32) {
    %c0_i32 = arith.constant 0 : i32
    %c0_i32_0 = arith.constant 0 : i32
    %c0_i32_1 = arith.constant 0 : i32
    return %c0_i32, %c0_i32_0 : i32, i32
  }
  func.func @transform_4(%arg0: i32) -> (i32, i32) {
    %c0_i32 = arith.constant 0 : i32
    %c0_i32_0 = arith.constant 0 : i32
    %c0_i32_1 = arith.constant 0 : i32
    return %c0_i32, %c0_i32_0 : i32, i32
  }
  func.func @transform_5(%arg0: i32) -> (i32, i32) {
    %c0_i32 = arith.constant 0 : i32
    %c0_i32_0 = arith.constant 0 : i32
    %c0_i32_1 = arith.constant 0 : i32
    return %c0_i32, %c0_i32_0 : i32, i32
  }
  func.func @transform_6(%arg0: i32) -> (i32, i32) {
    %c0_i32 = arith.constant 0 : i32
    %c0_i32_0 = arith.constant 0 : i32
    %c0_i32_1 = arith.constant 0 : i32
    return %c0_i32, %c0_i32_0 : i32, i32
  }
  func.func @transform_7(%arg0: i32) -> (i32, i32) {
    %c0_i32 = arith.constant 0 : i32
    %c0_i32_0 = arith.constant 0 : i32
    %c0_i32_1 = arith.constant 0 : i32
    return %c0_i32, %c0_i32_0 : i32, i32
  }
  func.func @transform_8(%arg0: i32) -> (i32, i32, i32) {
    %c0_i32 = arith.constant 0 : i32
    %c0_i32_0 = arith.constant 0 : i32
    %c0_i32_1 = arith.constant 0 : i32
    return %arg0, %c0_i32, %c0_i32_0 : i32, i32, i32
  }
}

module attributes {stable_mosaic.version = 11 : i64} {
  func.func @_stage_kernel(%arg0: i32, %arg1: memref<144x32xbf16, #tpu.memory_space<vmem>>, %arg2: memref<152x64xbf16, #tpu.memory_space<vmem>>, %arg3: memref<32x64xbf16, #tpu.memory_space<vmem>>, %arg4: memref<1x64xf32, #tpu.memory_space<vmem>>, %arg5: memref<512x64xbf16, #tpu.memory_space<vmem>>, %arg6: memref<1x64xf32, #tpu.memory_space<vmem>>, %arg7: memref<256x64xbf16, #tpu.memory_space<vmem>>, %arg8: memref<1x64xf32, #tpu.memory_space<vmem>>, %arg9: memref<1x120x64xf32, #tpu.memory_space<vmem>>, %arg10: memref<152x64xbf16, #tpu.memory_space<vmem>>, %arg11: memref<140x64xbf16, #tpu.memory_space<vmem>>) attributes {dimension_semantics = [#tpu.dimension_semantics<parallel>], iteration_bounds = array<i64: 2>, scalar_prefetch = 0 : i64, scratch_operands = 2 : i64, tpu.core_type = #tpu.core_type<tc>, window_params = [{transform_indices = @transform_0, window_bounds = array<i64: 144, 32>}, {transform_indices = @transform_1, window_bounds = array<i64: 152, 64>}, {pipeline_mode = #tpu.pipeline_mode<synchronous>, transform_indices = @transform_2, window_bounds = array<i64: 32, 64>}, {pipeline_mode = #tpu.pipeline_mode<synchronous>, transform_indices = @transform_3, window_bounds = array<i64: 1, 64>}, {pipeline_mode = #tpu.pipeline_mode<synchronous>, transform_indices = @transform_4, window_bounds = array<i64: 512, 64>}, {pipeline_mode = #tpu.pipeline_mode<synchronous>, transform_indices = @transform_5, window_bounds = array<i64: 1, 64>}, {pipeline_mode = #tpu.pipeline_mode<synchronous>, transform_indices = @transform_6, window_bounds = array<i64: 256, 64>}, {pipeline_mode = #tpu.pipeline_mode<synchronous>, transform_indices = @transform_7, window_bounds = array<i64: 1, 64>}, {transform_indices = @transform_8, window_bounds = array<i64: 1, 120, 64>}]} {
    %cst = arith.constant 0.000000e+00 : bf16
    %0 = vector.broadcast %cst : bf16 to vector<8x64xbf16>
    %c144 = arith.constant 144 : index
    %c0 = arith.constant 0 : index
    %1 = vector.load %arg10[%c144, %c0] : memref<152x64xbf16, #tpu.memory_space<vmem>>, vector<8x64xbf16>
    tpu.vector_store %arg10[%c144, %c0], %0 {strides = array<i32>} : memref<152x64xbf16, #tpu.memory_space<vmem>>, vector<8x64xbf16>,
    %c132 = arith.constant 132 : index
    %c0_0 = arith.constant 0 : index
    %2 = vector.load %arg11[%c132, %c0_0] : memref<140x64xbf16, #tpu.memory_space<vmem>>, vector<8x64xbf16>
    tpu.vector_store %arg11[%c132, %c0_0], %0 {strides = array<i32>} : memref<140x64xbf16, #tpu.memory_space<vmem>>, vector<8x64xbf16>,
    %c0_1 = arith.constant 0 : index
    %c0_2 = arith.constant 0 : index
    %3 = vector.load %arg1[%c0_1, %c0_2] : memref<144x32xbf16, #tpu.memory_space<vmem>>, vector<144x32xbf16>
    %c0_3 = arith.constant 0 : index
    %c0_4 = arith.constant 0 : index
    %4 = vector.load %arg3[%c0_3, %c0_4] : memref<32x64xbf16, #tpu.memory_space<vmem>>, vector<32x64xbf16>
    %cst_5 = arith.constant dense<0.000000e+00> : vector<144x64xf32>
    %5 = tpu.matmul %3, %4, %cst_5 {dimension_numbers = #tpu.dot_dimension_numbers<[1], [0], [0], [1], [0, 0, 1, 1], [], []>} : vector<144x32xbf16>, vector<32x64xbf16>, vector<144x64xf32> -> vector<144x64xf32>
    %c0_6 = arith.constant 0 : index
    %c0_7 = arith.constant 0 : index
    %6 = vector.load %arg4[%c0_6, %c0_7] : memref<1x64xf32, #tpu.memory_space<vmem>>, vector<1x64xf32>
    %7 = vector.broadcast %6 : vector<1x64xf32> to vector<144x64xf32>
    %8 = arith.addf %5, %7 : vector<144x64xf32>
    %9 = arith.truncf %8 : vector<144x64xf32> to vector<144x64xbf16>
    %c0_8 = arith.constant 0 : index
    %c0_9 = arith.constant 0 : index
    %10 = vector.load %arg10[%c0_8, %c0_9] : memref<152x64xbf16, #tpu.memory_space<vmem>>, vector<144x64xbf16>
    tpu.vector_store %arg10[%c0_8, %c0_9], %9 {strides = array<i32>} : memref<152x64xbf16, #tpu.memory_space<vmem>>, vector<144x64xbf16>,
    %c0_10 = arith.constant 0 : index
    %c0_11 = arith.constant 0 : index
    %11 = vector.load %arg10[%c0_10, %c0_11] : memref<152x64xbf16, #tpu.memory_space<vmem>>, vector<132x64xbf16>
    %c1 = arith.constant 1 : index
    %c0_12 = arith.constant 0 : index
    %12 = vector.load %arg10[%c1, %c0_12] : memref<152x64xbf16, #tpu.memory_space<vmem>>, vector<132x64xbf16>
    %c12 = arith.constant 12 : index
    %c0_13 = arith.constant 0 : index
    %13 = vector.load %arg10[%c12, %c0_13] : memref<152x64xbf16, #tpu.memory_space<vmem>>, vector<132x64xbf16>
    %c13 = arith.constant 13 : index
    %c0_14 = arith.constant 0 : index
    %14 = vector.load %arg10[%c13, %c0_14] : memref<152x64xbf16, #tpu.memory_space<vmem>>, vector<132x64xbf16>
    %c0_15 = arith.constant 0 : index
    %c0_16 = arith.constant 0 : index
    %15 = vector.load %arg2[%c0_15, %c0_16] : memref<152x64xbf16, #tpu.memory_space<vmem>>, vector<132x64xbf16>
    %c1_17 = arith.constant 1 : index
    %c0_18 = arith.constant 0 : index
    %16 = vector.load %arg2[%c1_17, %c0_18] : memref<152x64xbf16, #tpu.memory_space<vmem>>, vector<132x64xbf16>
    %c12_19 = arith.constant 12 : index
    %c0_20 = arith.constant 0 : index
    %17 = vector.load %arg2[%c12_19, %c0_20] : memref<152x64xbf16, #tpu.memory_space<vmem>>, vector<132x64xbf16>
    %c13_21 = arith.constant 13 : index
    %c0_22 = arith.constant 0 : index
    %18 = vector.load %arg2[%c13_21, %c0_22] : memref<152x64xbf16, #tpu.memory_space<vmem>>, vector<132x64xbf16>
    %19 = tpu.concatenate %11, %12, %13, %14, %15, %16, %17, %18 in 1 : vector<132x64xbf16>, vector<132x64xbf16>, vector<132x64xbf16>, vector<132x64xbf16>, vector<132x64xbf16>, vector<132x64xbf16>, vector<132x64xbf16>, vector<132x64xbf16> -> vector<132x512xbf16>
    %c0_23 = arith.constant 0 : index
    %c0_24 = arith.constant 0 : index
    %20 = vector.load %arg5[%c0_23, %c0_24] : memref<512x64xbf16, #tpu.memory_space<vmem>>, vector<512x64xbf16>
    %cst_25 = arith.constant dense<0.000000e+00> : vector<132x64xf32>
    %21 = tpu.matmul %19, %20, %cst_25 {dimension_numbers = #tpu.dot_dimension_numbers<[1], [0], [0], [1], [0, 0, 1, 1], [], []>} : vector<132x512xbf16>, vector<512x64xbf16>, vector<132x64xf32> -> vector<132x64xf32>
    %c0_26 = arith.constant 0 : index
    %c0_27 = arith.constant 0 : index
    %22 = vector.load %arg6[%c0_26, %c0_27] : memref<1x64xf32, #tpu.memory_space<vmem>>, vector<1x64xf32>
    %23 = vector.broadcast %22 : vector<1x64xf32> to vector<132x64xf32>
    %24 = arith.addf %21, %23 : vector<132x64xf32>
    %cst_28 = arith.constant 0.000000e+00 : f32
    %25 = vector.broadcast %cst_28 : f32 to vector<132x64xf32>
    %26 = arith.maximumf %24, %25 : vector<132x64xf32>
    %27 = arith.truncf %26 : vector<132x64xf32> to vector<132x64xbf16>
    %c0_29 = arith.constant 0 : index
    %c0_30 = arith.constant 0 : index
    %28 = vector.load %arg11[%c0_29, %c0_30] : memref<140x64xbf16, #tpu.memory_space<vmem>>, vector<132x64xbf16>
    tpu.vector_store %arg11[%c0_29, %c0_30], %27 {strides = array<i32>} : memref<140x64xbf16, #tpu.memory_space<vmem>>, vector<132x64xbf16>,
    %c0_31 = arith.constant 0 : index
    %c0_32 = arith.constant 0 : index
    %29 = vector.load %arg11[%c0_31, %c0_32] : memref<140x64xbf16, #tpu.memory_space<vmem>>, vector<120x64xbf16>
    %c1_33 = arith.constant 1 : index
    %c0_34 = arith.constant 0 : index
    %30 = vector.load %arg11[%c1_33, %c0_34] : memref<140x64xbf16, #tpu.memory_space<vmem>>, vector<120x64xbf16>
    %c12_35 = arith.constant 12 : index
    %c0_36 = arith.constant 0 : index
    %31 = vector.load %arg11[%c12_35, %c0_36] : memref<140x64xbf16, #tpu.memory_space<vmem>>, vector<120x64xbf16>
    %c13_37 = arith.constant 13 : index
    %c0_38 = arith.constant 0 : index
    %32 = vector.load %arg11[%c13_37, %c0_38] : memref<140x64xbf16, #tpu.memory_space<vmem>>, vector<120x64xbf16>
    %33 = tpu.concatenate %29, %30, %31, %32 in 1 : vector<120x64xbf16>, vector<120x64xbf16>, vector<120x64xbf16>, vector<120x64xbf16> -> vector<120x256xbf16>
    %c0_39 = arith.constant 0 : index
    %c0_40 = arith.constant 0 : index
    %34 = vector.load %arg7[%c0_39, %c0_40] : memref<256x64xbf16, #tpu.memory_space<vmem>>, vector<256x64xbf16>
    %cst_41 = arith.constant dense<0.000000e+00> : vector<120x64xf32>
    %35 = tpu.matmul %33, %34, %cst_41 {dimension_numbers = #tpu.dot_dimension_numbers<[1], [0], [0], [1], [0, 0, 1, 1], [], []>} : vector<120x256xbf16>, vector<256x64xbf16>, vector<120x64xf32> -> vector<120x64xf32>
    %c0_42 = arith.constant 0 : index
    %c0_43 = arith.constant 0 : index
    %36 = vector.load %arg8[%c0_42, %c0_43] : memref<1x64xf32, #tpu.memory_space<vmem>>, vector<1x64xf32>
    %37 = vector.broadcast %36 : vector<1x64xf32> to vector<120x64xf32>
    %38 = arith.addf %35, %37 : vector<120x64xf32>
    %c0_44 = arith.constant 0 : index
    %c0_45 = arith.constant 0 : index
    %c0_46 = arith.constant 0 : index
    %39 = vector.load %arg9[%c0_44, %c0_45, %c0_46] : memref<1x120x64xf32, #tpu.memory_space<vmem>>, vector<1x120x64xf32>
    %40 = vector.shape_cast %39 : vector<1x120x64xf32> to vector<120x64xf32>
    %41 = vector.shape_cast %38 : vector<120x64xf32> to vector<1x120x64xf32>
    tpu.vector_store %arg9[%c0_44, %c0_45, %c0_46], %41 {strides = array<i32>} : memref<1x120x64xf32, #tpu.memory_space<vmem>>, vector<1x120x64xf32>,
    return
  }
  func.func @transform_0(%arg0: i32) -> (i32, i32) {
    %c0_i32 = arith.constant 0 : i32
    %c0_i32_0 = arith.constant 0 : i32
    return %arg0, %c0_i32 : i32, i32
  }
  func.func @transform_1(%arg0: i32) -> (i32, i32) {
    %c0_i32 = arith.constant 0 : i32
    %c0_i32_0 = arith.constant 0 : i32
    return %arg0, %c0_i32 : i32, i32
  }
  func.func @transform_2(%arg0: i32) -> (i32, i32) {
    %c0_i32 = arith.constant 0 : i32
    %c0_i32_0 = arith.constant 0 : i32
    %c0_i32_1 = arith.constant 0 : i32
    return %c0_i32, %c0_i32_0 : i32, i32
  }
  func.func @transform_3(%arg0: i32) -> (i32, i32) {
    %c0_i32 = arith.constant 0 : i32
    %c0_i32_0 = arith.constant 0 : i32
    %c0_i32_1 = arith.constant 0 : i32
    return %c0_i32, %c0_i32_0 : i32, i32
  }
  func.func @transform_4(%arg0: i32) -> (i32, i32) {
    %c0_i32 = arith.constant 0 : i32
    %c0_i32_0 = arith.constant 0 : i32
    %c0_i32_1 = arith.constant 0 : i32
    return %c0_i32, %c0_i32_0 : i32, i32
  }
  func.func @transform_5(%arg0: i32) -> (i32, i32) {
    %c0_i32 = arith.constant 0 : i32
    %c0_i32_0 = arith.constant 0 : i32
    %c0_i32_1 = arith.constant 0 : i32
    return %c0_i32, %c0_i32_0 : i32, i32
  }
  func.func @transform_6(%arg0: i32) -> (i32, i32) {
    %c0_i32 = arith.constant 0 : i32
    %c0_i32_0 = arith.constant 0 : i32
    %c0_i32_1 = arith.constant 0 : i32
    return %c0_i32, %c0_i32_0 : i32, i32
  }
  func.func @transform_7(%arg0: i32) -> (i32, i32) {
    %c0_i32 = arith.constant 0 : i32
    %c0_i32_0 = arith.constant 0 : i32
    %c0_i32_1 = arith.constant 0 : i32
    return %c0_i32, %c0_i32_0 : i32, i32
  }
  func.func @transform_8(%arg0: i32) -> (i32, i32, i32) {
    %c0_i32 = arith.constant 0 : i32
    %c0_i32_0 = arith.constant 0 : i32
    %c0_i32_1 = arith.constant 0 : i32
    return %arg0, %c0_i32, %c0_i32_0 : i32, i32, i32
  }
}

</mosaic_0001>

<bundles_post_ra>
// kernel: tile.33
= control target key start
LH: loop header
LB: loop body
LE: loop exit
PB: predicated region body
PF: predicated region fallthrough
CT: control target
= control target key end

     0   :  { %s22_s0 = inlined_call_operand.vmem [shape: f32[32], index: 0, kind: input, shape index: {}]   ;;  %s23_s1 = inlined_call_operand.vmem [shape: f32[4,32], index: 1, kind: output, shape index: {}]  }
   0x1   :  { %v4_v0 = vld [vmem:[%s22_s0] ss:$0 sm:$0xff] }
   0x2   :  { %5 = vst [vmem:[%s23_s1] sm:$0xf] %v4_v0 }

// kernel: tile.34
= control target key start
LH: loop header
LB: loop body
LE: loop exit
PB: predicated region body
PF: predicated region fallthrough
CT: control target
= control target key end

     0   :  { %s37_s8 = smov 32   ;;  %s38_s9 = smov 64   ;;  %vm7_vm0 = vcmask 261120   ;;  %vm13_vm1 = vcmask 1048320   ;;  %vm19_vm2 = vcmask 785920   ;;  %vm25_vm3 = vcmask 523520   ;;  %s55_s0 = inlined_call_operand.vmem [shape: f32[4,32], index: 0, kind: input, shape index: {}]   ;;  %s56_s1 = inlined_call_operand.vmem [shape: f32[1,128], index: 1, kind: output, shape index: {}]  }
   0x1   :  { %v4_v0 = vld [vmem:[%s55_s0] sm:$0xf]  ;;  %s36_s0 = smov 96  }
   0x2   :  { %5 = vst [vmem:[#allocation1] sm:$0xf] %v4_v0 }
   0x9   :  { %v10_v1 = vld [vmem:[#allocation1 + $0x3] sm:$0x1]   ;;  %v22_v2 = vld [vmem:[#allocation1 + $0x1] sm:$0x1]   ;;  %v16_v3 = vld [vmem:[#allocation1 + $0x2] sm:$0x1]  }
   0xa   :  { %11 = vrot.lane.b32.xlu0 %v10_v1, %s36_s0  ;;  %23 = vrot.lane.b32.xlu1 %v22_v2, %s37_s8  ;;  %v6_v4 = vld [vmem:[#allocation1] sm:$0x1]  }
   0xb   :  { %8 = vst.msk [vmem:[#allocation0] sm:$0x1] %vm7_vm0, %v6_v4  }
  0x12   :  { %17 = vrot.lane.b32.xlu0 %v16_v3, %s38_s9 }
  0x7c   :  { %v12_v5 = vpop.permute.xlu0 %11   ;;  %v24_v6 = vpop.permute.xlu1 %23  }
  0x7d   :  { %14 = vst.msk [vmem:[#allocation0] sm:$0x1] %vm13_vm1, %v12_v5  }
  0x84   :  { %v18_v7 = vpop.permute.xlu0 %17  }
  0x85   :  { %20 = vst.msk [vmem:[#allocation0] sm:$0x1] %vm19_vm2, %v18_v7  }
  0x86   :  { %26 = vst.msk [vmem:[#allocation0] sm:$0x1] %vm25_vm3, %v24_v6  }
  0x8d   :  { %v29_v8 = vld [vmem:[#allocation0] sm:$0x1] }
  0x8e   :  { %32 = vst [vmem:[%s56_s1] sm:$0x1] %v29_v8 }

// kernel: decoder_forward.2
= control target key start
LH: loop header
LB: loop body
LE: loop exit
PB: predicated region body
PF: predicated region fallthrough
CT: control target
= control target key end

     0   :  { %s2856_s27 = smov 0   ;;  %s3315_s0 = inlined_call_operand.vmem [shape: bf16[128,64], index: 0, kind: input, shape index: {}]   ;;  %s3316_s1 = inlined_call_operand.vmem [shape: bf16[144,128], index: 1, kind: input, shape index: {}]   ;;  %s3317_s2 = inlined_call_operand.vmem [shape: bf16[64,128], index: 2, kind: input, shape index: {}]   ;;  %s3318_s3 = inlined_call_operand.vmem [shape: f32[1,128], index: 3, kind: input, shape index: {}]   ;;  %s3319_s4 = inlined_call_operand.vmem [shape: bf16[1024,128], index: 4, kind: input, shape index: {}]   ;;  %s3320_s5 = inlined_call_operand.vmem [shape: f32[1,128], index: 5, kind: input, shape index: {}]   ;;  %s3321_s6 = inlined_call_operand.vmem [shape: bf16[512,128], index: 6, kind: input, shape index: {}]   ;;  %s3322_s7 = inlined_call_operand.vmem [shape: f32[1,128], index: 7, kind: input, shape index: {}]   ;;  %s3323_s8 = inlined_call_operand.vmem [shape: f32[2,48,128], index: 8, kind: output, shape index: {}]  }
   0x1 LB: > { %s2862_s28 = sadd.s32 4294967295, %s2808_s27   ;;  %p2058_p0 = scmp.ge.s32.totalorder %s2808_s27, 1  ;;  %s2808_s27 = sphi %s2856_s27, %s18_s27  }
   0x2   : > { %p274_p1 = scmp.lt.s32.totalorder %s2808_s27, 3 }
   0x4   : > { %p275_p2 = pnand %p2058_p0, %p274_p1 }
   0x5   : > { %s2059_s9 = sshll.u32 (!%p275_p2), %s2862_s28, 3  ;;  %s319_s22 = smul.u32 (!%p275_p2), 9, %s2862_s28 }
   0x6   : > { %278 = sbr.rel (%p275_p2) target bundleno = 616 (0x268), region = 52  ;;  %p314_p3 = scmp.lt.s32.totalorder (!%p275_p2), %s2059_s9, 15 }
   0x7   : > { %p320_p4 = scmp.lt.s32.totalorder (!%p275_p2), %s319_s22, 17  ;;  %p325_p5 = scmp.lt.s32.totalorder (!%p275_p2), %s2862_s28, 1 }
   0xb   : > { %v2536_v0 = vld [vmem:[%s3317_s2 + $0x18] sm:$0xff]  ;;  %v2535_v1 = vld [vmem:[%s3317_s2 + $0x10] sm:$0xff]  ;;  %s3325_s9 = smov (!%p314_p3, %s2059_s9), 15  ;;  %v2534_v2 = vld [vmem:[%s3317_s2 + $0x8] sm:$0xff]  ;;  %vm397_vm0 = vcmask 523264   ;;  %v2810_v40 = vmov 0  }
   0xc   : > { %414 = vmatpush.bf16.msra.mxu0 %v2536_v0  ;;  %2785 = vmatpush.bf16.msra.mxu1 %v2536_v0  ;;  %s2060_s14 = sshll.u32 %s3325_s9, 2  ;;  %v2533_v3 = vld [vmem:[%s3317_s2] sm:$0xff]  ;;  %v2552_v4 = vld [vmem:[%s3319_s4 + $0x38] sm:$0xff]  ;;  %v2551_v7 = vld [vmem:[%s3319_s4 + $0x30] sm:$0xff]  ;;  %331 = vst [vmem:[#allocation2 + $0x20] sm:$0xf] %v2810_v40 }
   0xd   : > { %s317_s19 = scalar_lea.vmem %s3315_s0, %s2060_s14  ;;  %v2550_v8 = vld [vmem:[%s3319_s4 + $0x28] sm:$0xff]  ;;  %v2549_v11 = vld [vmem:[%s3319_s4 + $0x20] sm:$0xff]  ;;  %v2548_v12 = vld [vmem:[%s3319_s4 + $0x18] sm:$0xff]  ;;  %332 = vst [vmem:[#allocation3 + $0x1c] sm:$0xf] %v2810_v40  ;;  %s3327_s22 = smov (!%p320_p4, %s319_s22), 17 }
   0xe   : > { %v2529_v5 = vld [vmem:[%s317_s19] sm:$0xff]  ;;  %v2531_v6 = vld [vmem:[%s317_s19 + $0x10] sm:$0xff]  ;;  %v2530_v9 = vld [vmem:[%s317_s19 + $0x8] sm:$0xff]  ;;  %vm514_vm1 = vsmask.f32 7424  ;;  %s2061_s9 = sshll.u32 %s3327_s22, 2 }
   0xf   : > { %v2532_v10 = vld [vmem:[%s317_s19 + $0x18] sm:$0xff]  ;;  %v2547_v13 = vld [vmem:[%s3319_s4 + $0x10] sm:$0xff]  ;;  %v2546_v15 = vld [vmem:[%s3319_s4 + $0x8] sm:$0xff]  ;;  %s3097_s14 = scalar_lea.vmem %s3316_s1, %s2061_s9  ;;  %s3329_s28 = smov (!%p325_p5, %s2862_s28), 1 }
  0x10   : > { %415 = vmatpush.bf16.msra.mxu0 %v2535_v1  ;;  %2786 = vmatpush.bf16.msra.mxu1 %v2535_v1  ;;  %v2560_v14 = vld [vmem:[%s3319_s4 + $0x78] sm:$0xff]  ;;  %v2559_v17 = vld [vmem:[%s3319_s4 + $0x70] sm:$0xff]  ;;  %v2545_v18 = vld [vmem:[%s3319_s4] sm:$0xff]  ;;  %s2789_s23 = smul.u32 48, %s3329_s28 }
  0x11   : > { %1284 = vmatpush.bf16.msra.mxu2 %v2560_v14  ;;  %v2568_v16 = vld [vmem:[%s3319_s4 + $0xb8] sm:$0xff]  ;;  %v2567_v19 = vld [vmem:[%s3319_s4 + $0xb0] sm:$0xff]  ;;  %v2558_v20 = vld [vmem:[%s3319_s4 + $0x68] sm:$0xff] }
  0x12   : > { %1312 = vmatpush.bf16.msra.mxu3 %v2568_v16  ;;  %v2576_v21 = vld [vmem:[%s3319_s4 + $0xf8] sm:$0xff]  ;;  %v2566_v22 = vld [vmem:[%s3319_s4 + $0xa8] sm:$0xff]  ;;  %v2557_v23 = vld [vmem:[%s3319_s4 + $0x60] sm:$0xff]  ;;  %s3304_s26 = scalar_lea.vmem %s3323_s8, %s2789_s23 }
  0x13   : > { %v2575_v24 = vld [vmem:[%s3319_s4 + $0xf0] sm:$0xff]  ;;  %v2565_v25 = vld [vmem:[%s3319_s4 + $0xa0] sm:$0xff]  ;;  %v2574_v26 = vld [vmem:[%s3319_s4 + $0xe8] sm:$0xff] }
  0x14   : > { %416 = vmatpush.bf16.msra.mxu0 %v2534_v2  ;;  %2787 = vmatpush.bf16.msra.mxu1 %v2534_v2  ;;  %v2556_v27 = vld [vmem:[%s3319_s4 + $0x58] sm:$0xff]  ;;  %v2555_v29 = vld [vmem:[%s3319_s4 + $0x50] sm:$0xff]  ;;  %v2573_v30 = vld [vmem:[%s3319_s4 + $0xe0] sm:$0xff] }
  0x15   : > { %1285 = vmatpush.bf16.msra.mxu2 %v2559_v17  ;;  %v2564_v28 = vld [vmem:[%s3319_s4 + $0x98] sm:$0xff]  ;;  %v2563_v31 = vld [vmem:[%s3319_s4 + $0x90] sm:$0xff]  ;;  %v2554_v32 = vld [vmem:[%s3319_s4 + $0x48] sm:$0xff] }
  0x16   : > { %1313 = vmatpush.bf16.msra.mxu3 %v2567_v19  ;;  %v2572_v33 = vld [vmem:[%s3319_s4 + $0xd8] sm:$0xff]  ;;  %v2562_v34 = vld [vmem:[%s3319_s4 + $0x88] sm:$0xff]  ;;  %v2571_v35 = vld [vmem:[%s3319_s4 + $0xd0] sm:$0xff] }
  0x17   : > { %v2553_v36 = vld [vmem:[%s3319_s4 + $0x40] sm:$0xff]  ;;  %v2570_v42 = vld [vmem:[%s3319_s4 + $0xc8] sm:$0xff]  ;;  %v2592_v43 = vld [vmem:[%s3319_s4 + $0x178] sm:$0xff] }
  0x18   : > { %417 = vmatpush.bf16.msra.mxu0 %v2533_v3  ;;  %2788 = vmatpush.bf16.msra.mxu1 %v2533_v3  ;;  %v2561_v39 = vld [vmem:[%s3319_s4 + $0x80] sm:$0xff]  ;;  %v2600_v44 = vld [vmem:[%s3319_s4 + $0x1b8] sm:$0xff]  ;;  %v2591_v55 = vld [vmem:[%s3319_s4 + $0x170] sm:$0xff] }
  0x19   : > { %1286 = vmatpush.bf16.msra.mxu2 %v2558_v20  ;;  %v2799_v41 = vld [vmem:[%s3318_s3] ss:$0 sm:$0xff]  ;;  %v2584_v54 = vld [vmem:[%s3319_s4 + $0x138] sm:$0xff]  ;;  %v2599_v56 = vld [vmem:[%s3319_s4 + $0x1b0] sm:$0xff] }
  0x1a   : > { %1314 = vmatpush.bf16.msra.mxu3 %v2566_v22  ;;  %v2569_v45 = vld [vmem:[%s3319_s4 + $0xc0] sm:$0xff]  ;;  %v2608_v57 = vld [vmem:[%s3319_s4 + $0x1f8] sm:$0xff]  ;;  %v2583_v58 = vld [vmem:[%s3319_s4 + $0x130] sm:$0xff] }
  0x1b   : > { %2095 = vmatmul.msk.bf16.vlgmr.msra.gmra.mxu0 %vm397_vm0, %v2529_v5  ;;  %2097 = vmatmul.msk.bf16.vlgmr.msra.gmra.mxu1 %vm397_vm0, %v2531_v6  ;;  %v2582_v61 = vld [vmem:[%s3319_s4 + $0x128] sm:$0xff]  ;;  %v2607_v0 = vld [vmem:[%s3319_s4 + $0x1f0] sm:$0xff]  ;;  %v2589_v14 = vld [vmem:[%s3319_s4 + $0x160] sm:$0xff] }
  0x1c   : > { %1256 = vmatpush.bf16.msrb.mxu1 %v2552_v4  ;;  %1340 = vmatpush.bf16.msrb.mxu0 %v2576_v21  ;;  %v2590_v62 = vld [vmem:[%s3319_s4 + $0x168] sm:$0xff]  ;;  %v2580_v17 = vld [vmem:[%s3319_s4 + $0x118] sm:$0xff]  ;;  %v2579_v21 = vld [vmem:[%s3319_s4 + $0x110] sm:$0xff] }
  0x1d   : > { %1287 = vmatpush.bf16.msra.mxu2 %v2557_v23  ;;  %v2598_v63 = vld [vmem:[%s3319_s4 + $0x1a8] sm:$0xff]  ;;  %v2587_v40 = vld [vmem:[%s3319_s4 + $0x150] sm:$0xff] }
  0x1e   : > { %1315 = vmatpush.bf16.msra.mxu3 %v2565_v25  ;;  %v2606_v16 = vld [vmem:[%s3319_s4 + $0x1e8] sm:$0xff] }
  0x20   : > { %1257 = vmatpush.bf16.msrb.mxu1 %v2551_v7  ;;  %1341 = vmatpush.bf16.msrb.mxu0 %v2575_v24 }
  0x21   : > { %1288 = vmatpush.bf16.msra.mxu2 %v2556_v27  ;;  %v2588_v27 = vld [vmem:[%s3319_s4 + $0x158] sm:$0xff] }
  0x22   : > { %1316 = vmatpush.bf16.msra.mxu3 %v2564_v28  ;;  %v2596_v28 = vld [vmem:[%s3319_s4 + $0x198] sm:$0xff] }
  0x24   : > { %1258 = vmatpush.bf16.msrb.mxu1 %v2550_v8  ;;  %1342 = vmatpush.bf16.msrb.mxu0 %v2574_v26  ;;  %v2581_v8 = vld [vmem:[%s3319_s4 + $0x120] sm:$0xff] }
  0x25   : > { %1289 = vmatpush.bf16.msra.mxu2 %v2555_v29  ;;  %v2605_v29 = vld [vmem:[%s3319_s4 + $0x1e0] sm:$0xff] }
  0x26   : > { %1317 = vmatpush.bf16.msra.mxu3 %v2563_v31 }
  0x28   : > { %1259 = vmatpush.bf16.msrb.mxu1 %v2549_v11  ;;  %1343 = vmatpush.bf16.msrb.mxu0 %v2573_v30  ;;  %v2578_v30 = vld [vmem:[%s3319_s4 + $0x108] sm:$0xff] }
  0x29   : > { %1290 = vmatpush.bf16.msra.mxu2 %v2554_v32 }
  0x2a   : > { %1318 = vmatpush.bf16.msra.mxu3 %v2562_v34 }
  0x2b   : > { %2096 = vmatmul.msk.bf16.gmra.mxu0 %vm397_vm0, %v2530_v9  ;;  %2098 = vmatmul.msk.bf16.gmra.mxu1 %vm397_vm0, %v2532_v10 }
  0x2c   : > { %1260 = vmatpush.bf16.msrb.mxu1 %v2548_v12  ;;  %1344 = vmatpush.bf16.msrb.mxu0 %v2572_v33 }
  0x2d   : > { %1291 = vmatpush.bf16.msra.mxu2 %v2553_v36 }
  0x2e   : > { %1319 = vmatpush.bf16.msra.mxu3 %v2561_v39 }
  0x30   : > { %1261 = vmatpush.bf16.msrb.mxu1 %v2547_v13  ;;  %1345 = vmatpush.bf16.msrb.mxu0 %v2571_v35  ;;  %v2577_v35 = vld [vmem:[%s3319_s4 + $0x100] sm:$0xff] }
  0x31   : > { %1396 = vmatpush.bf16.msrb.mxu2 %v2592_v43 }
  0x32   : > { %1424 = vmatpush.bf16.msrb.mxu3 %v2600_v44 }
  0x34   : > { %1262 = vmatpush.bf16.msrb.mxu1 %v2546_v15  ;;  %1346 = vmatpush.bf16.msrb.mxu0 %v2570_v42  ;;  %v2597_v15 = vld [vmem:[%s3319_s4 + $0x1a0] sm:$0xff]  ;;  %v2604_v42 = vld [vmem:[%s3319_s4 + $0x1d8] sm:$0xff] }
  0x35   : > { %1397 = vmatpush.bf16.msrb.mxu2 %v2591_v55  ;;  %v2594_v55 = vld [vmem:[%s3319_s4 + $0x188] sm:$0xff] }
  0x36   : > { %1425 = vmatpush.bf16.msrb.mxu3 %v2599_v56  ;;  %v2603_v56 = vld [vmem:[%s3319_s4 + $0x1d0] sm:$0xff] }
  0x38   : > { %1263 = vmatpush.bf16.msrb.mxu1 %v2545_v18  ;;  %1347 = vmatpush.bf16.msrb.mxu0 %v2569_v45 }
  0x39   : > { %1398 = vmatpush.bf16.msrb.mxu2 %v2590_v62 }
  0x3a   : > { %1426 = vmatpush.bf16.msrb.mxu3 %v2598_v63 }
  0x3c   : > { %1368 = vmatpush.bf16.msra.mxu1 %v2584_v54  ;;  %1452 = vmatpush.bf16.msra.mxu0 %v2608_v57  ;;  %v2586_v54 = vld [vmem:[%s3319_s4 + $0x148] sm:$0xff] }
  0x3d   : > { %1399 = vmatpush.bf16.msrb.mxu2 %v2589_v14 }
  0x3e   : > { %1427 = vmatpush.bf16.msrb.mxu3 %v2597_v15 }
  0x40   : > { %1369 = vmatpush.bf16.msra.mxu1 %v2583_v58  ;;  %1453 = vmatpush.bf16.msra.mxu0 %v2607_v0  ;;  %v2540_v0 = vld [vmem:[#allocation2 + $0x1c] sm:$0x10] }
  0x41   : > { %1400 = vmatpush.bf16.msrb.mxu2 %v2588_v27  ;;  %v2541_v27 = vld [vmem:[%s3097_s14 + $0x4] sm:$0xff] }
  0x42   : > { %1428 = vmatpush.bf16.msrb.mxu3 %v2596_v28 }
  0x44   : > { %1370 = vmatpush.bf16.msra.mxu1 %v2582_v61  ;;  %1454 = vmatpush.bf16.msra.mxu0 %v2606_v16 }
  0x45   : > { %1401 = vmatpush.bf16.msrb.mxu2 %v2587_v40 }
  0x48   : > { %1371 = vmatpush.bf16.msra.mxu1 %v2581_v8  ;;  %1455 = vmatpush.bf16.msra.mxu0 %v2605_v29 }
  0x49   : > { %1402 = vmatpush.bf16.msrb.mxu2 %v2586_v54 }
  0x4c   : > { %1372 = vmatpush.bf16.msra.mxu1 %v2580_v17  ;;  %1456 = vmatpush.bf16.msra.mxu0 %v2604_v42 }
  0x50   : > { %1373 = vmatpush.bf16.msra.mxu1 %v2579_v21  ;;  %1457 = vmatpush.bf16.msra.mxu0 %v2603_v56 }
  0x54   : > { %1374 = vmatpush.bf16.msra.mxu1 %v2578_v30 }
  0x58   : > { %1375 = vmatpush.bf16.msra.mxu1 %v2577_v35 }
  0x98   : > { %v419_v37 = vpop.f32.mrf.mxu0  ;;  %v429_v38 = vpop.f32.mrf.mxu1 }
  0x99   : > { %v430_v46 = vadd.f32 %v2799_v41, %v429_v38  ;;  %v420_v49 = vadd.f32 %v2799_v41, %v419_v37 }
  0xa0   : > { %v421_v47 = vpop.f32.mrf.mxu0  ;;  %v431_v48 = vpop.f32.mrf.mxu1 }
  0xa1   : > { %v422_v50 = vadd.f32 %v2799_v41, %v421_v47  ;;  %v432_v51 = vadd.f32 %v2799_v41, %v431_v48 }
  0xa3   : > { %v2647_v52 = vpack.c.bf16 %v422_v50, %v420_v49  ;;  %v2987_v53 = vpack.c.bf16 %v432_v51, %v430_v46 }
  0xa5   : > { %2648 = vst [vmem:[#allocation2] sm:$0xff] %v2647_v52   ;;  %1264 = vmatmul.bf16.vlgmr.msrb.gmra.mxu1 %v2647_v52  ;;  %v518_v2 = vshll.u32 %v2647_v52, 16  ;;  %v516_v12 = vshrl.u32 %v2647_v52, 16  ;;  %v531_v37 = vshll.u32 %v2987_v53, 16  ;;  %v535_v61 = vshrl.u32 %v2987_v53, 16 }
  0xa6   : > { %2724 = vst [vmem:[#allocation2 + $0x10] sm:$0xff] %v2987_v53   ;;  %v2675_v8 = vunpack.c.h.b16 %v2987_v53 }
  0xa7   : > { %v520_v9 = vrot.slane %v518_v2, 1  ;;  %v533_v44 = vrot.slane %v531_v37, 1  ;;  %v2585_v2 = vld [vmem:[%s3319_s4 + $0x140] sm:$0xff]  ;;  %v2730_v37 = vld [vmem:[%s3097_s14 + $0x10] sm:$0xff]  }
  0xa8   : > { %v424_v59 = vpop.f32.mrf.mxu0  ;;  %v434_v60 = vpop.f32.mrf.mxu1  ;;  %1403 = vmatpush.bf16.msrb.mxu2 %v2585_v2  ;;  %v2691_v2 = vunpack.c.h.b16 %v2730_v37 }
  0xa9   : > { %v435_v1 = vadd.f32 %v2799_v41, %v434_v60  ;;  %v425_v5 = vadd.f32 %v2799_v41, %v424_v59  ;;  %v521_v19 = vor.u32 %v520_v9, %v516_v12 }
  0xb0   : > { %v426_v3 = vpop.f32.mrf.mxu0  ;;  %v436_v4 = vpop.f32.mrf.mxu1 }
  0xb1   : > { %v427_v6 = vadd.f32 %v2799_v41, %v426_v3  ;;  %v437_v7 = vadd.f32 %v2799_v41, %v436_v4  ;;  %v2595_v41 = vld [vmem:[%s3319_s4 + $0x190] sm:$0xff]  ;;  %v2593_v3 = vld [vmem:[%s3319_s4 + $0x180] sm:$0xff]  ;;  %v2602_v4 = vld [vmem:[%s3319_s4 + $0x1c8] sm:$0xff] }
  0xb2   : > { %1429 = vmatpush.bf16.msrb.mxu3 %v2595_v41  ;;  %1458 = vmatpush.bf16.msra.mxu0 %v2602_v4  ;;  %v656_v41 = vshll.u32 %v2730_v37, 16 }
  0xb3   : > { %v2652_v10 = vpack.c.bf16 %v427_v6, %v425_v5  ;;  %v3020_v11 = vpack.c.bf16 %v437_v7, %v435_v1  ;;  %v537_v5 = vor.u32 %v535_v61, %v533_v44 }
  0xb5   : > { %2723 = vst [vmem:[#allocation2 + $0x8] sm:$0xff] %v2652_v10   ;;  %v523_v13 = vshll.u32 %v2652_v10, 16  ;;  %1269 = vmatmul.bf16.gmra.mxu1 %v2652_v10  ;;  %v527_v36 = vshrl.u32 %v2652_v10, 16  ;;  %v2678_v48 = vunpack.c.l.b16 %v3020_v11 }
  0xb6   : > { %2725 = vst [vmem:[#allocation2 + $0x18] sm:$0xff] %v3020_v11   ;;  %1430 = vmatpush.bf16.msrb.mxu3 %v2594_v55 }
  0xb7   : > { %v525_v18 = vrot.slane %v523_v13, 1  ;;  %v506_v60 = vpack.c.b16 %v2678_v48, %v2678_v48  ;;  %v554_v9 = vpack.c.b16 %v2678_v48, %v2675_v8  ;;  %v2601_v13 = vld [vmem:[%s3319_s4 + $0x1c0] sm:$0xff] }
  0xb8   : > { %1459 = vmatpush.bf16.msra.mxu0 %v2601_v13 }
  0xb9   : > { %v526_v20 = vsel %vm514_vm1, %v521_v19, %v525_v18  ;;  %v529_v39 = vor.u32 %v527_v36, %v525_v18  ;;  %v2679_v18 = vunpack.c.h.b16 %v3020_v11  ;;  %v2542_v11 = vld [vmem:[%s3097_s14 + $0xc] sm:$0xff] }
  0xba   : > { %1292 = vmatmul.bf16.vlgmr.msra.gmra.mxu2 %v526_v20  ;;  %1431 = vmatpush.bf16.msrb.mxu3 %v2593_v3  ;;  %v713_v36 = vshll.u32 %v2542_v11, 16 }
  0xbb   : > { %v534_v45 = vsel %vm514_vm1, %v529_v39, %v533_v44  ;;  %v555_v21 = vpack.c.b16 %v2679_v18, %v2679_v18  ;;  %v658_v44 = vrot.slane %v656_v41, 1 }
  0xbc   : > { %v2773_v22 = vld [vmem:[#allocation2 + $0x4] sm:$0xff]   ;;  %v2538_v24 = vld [vmem:[#allocation2 + $0xc] sm:$0xff]  ;;  %v715_v39 = vrot.slane %v713_v36, 1 }
  0xbd   : > { %v2537_v23 = vld [vmem:[#allocation2 + $0x4] sm:$0xff]  ;;  %1320 = vmatmul.bf16.vlgmr.msra.gmra.mxu3 %v2773_v22  ;;  %v588_v26 = vshll.u32 %v2538_v24, 16  ;;  %v462_v43 = vld [vmem:[#allocation2 + $0x1c] sm:$0x1]  ;;  %v2539_v47 = vld [vmem:[#allocation2 + $0x14] sm:$0xff]  ;;  %v592_v51 = vshrl.u32 %v2538_v24, 16 }
  0xbe   : > { %v583_v25 = vshll.u32 %v2537_v23, 16  ;;  %v581_v31 = vshrl.u32 %v2537_v23, 16  ;;  %v512_v46 = vunpack.c.l.b16 %v462_v43  ;;  %v2774_v49 = vld [vmem:[#allocation2 + $0xc] sm:$0xff]   ;;  %v596_v52 = vshll.u32 %v2539_v47, 16  ;;  %v2113_v63 = vld [vmem:[#allocation2 + $0x1c] sm:$0xf] }
  0xbf   : > { %v590_v34 = vrot.slane %v588_v26, 1  ;;  %v2114_v6 = vor.u32 %v2540_v0, %v2113_v63  ;;  %v600_v12 = vshrl.u32 %v2539_v47, 16  ;;  %v2729_v22 = vld [vmem:[%s3097_s14 + $0x8] sm:$0xff]   ;;  %v2543_v47 = vld [vmem:[%s3097_s14 + $0x14] sm:$0xff]  ;;  %v2129_v0 = vld [vmem:[%s3097_s14 + $0x1c] sm:$0xf] }
  0xc0   : > { %v585_v32 = vrot.slane %v583_v25, 1  ;;  %v513_v50 = vpack.c.b16 %v512_v46, %v2678_v48  ;;  %v598_v59 = vrot.slane %v596_v52, 1  ;;  %v648_v26 = vshll.u32 %v2729_v22, 16  ;;  %v479_v46 = vld [vmem:[%s3097_s14 + $0x1c] sm:$0x1] }
  0xc1   : > { %v594_v57 = vor.u32 %v592_v51, %v590_v34  ;;  %v604_v10 = vshll.u32 %v2114_v6, 16  ;;  %v608_v25 = vshrl.u32 %v2114_v6, 16  ;;  %v652_v40 = vshrl.u32 %v2729_v22, 16  ;;  %v2778_v51 = vld [vmem:[%s3097_s14 + $0xc] sm:$0xff]  }
  0xc2   : > { %v586_v33 = vor.u32 %v585_v32, %v581_v31  ;;  %v539_v58 = vshll.u32 %v513_v50, 16  ;;  %v602_v14 = vor.u32 %v600_v12, %v598_v59  ;;  %v543_v17 = vshrl.u32 %v513_v50, 16 }
  0xc3   : > { %v599_v62 = vsel %vm514_vm1, %v594_v57, %v598_v59  ;;  %v606_v15 = vrot.slane %v604_v10, 1  ;;  %v650_v29 = vrot.slane %v648_v26, 1  ;;  %v708_v31 = vshll.u32 %v2541_v27, 16 }
  0xc4   : > { %v591_v38 = vsel %vm514_vm1, %v586_v33, %v590_v34  ;;  %v541_v1 = vrot.slane %v539_v58, 1  ;;  %v2777_v33 = vld [vmem:[%s3097_s14 + $0x4] sm:$0xff]   ;;  %v706_v34 = vshrl.u32 %v2541_v27, 16  ;;  %v638_v50 = vunpack.c.l.b16 %v479_v46 }
  0xc5   : > { %1348 = vmatmul.bf16.vlgmr.msrb.gmra.mxu0 %v591_v38  ;;  %1274 = vmatmul.bf16.gmra.mxu1 %v2987_v53  ;;  %v2681_v53 = vld [vmem:[%s3097_s14] sm:$0xff]   ;;  %v607_v16 = vsel %vm514_vm1, %v602_v14, %v606_v15  ;;  %v610_v28 = vor.u32 %v608_v25, %v606_v15  ;;  %v710_v35 = vrot.slane %v708_v31, 1  ;;  %v654_v43 = vor.u32 %v652_v40, %v650_v29  ;;  %v2619_v40 = vld [vmem:[%s3321_s6 + $0x38] sm:$0xff] }
  0xc6   : > { %v542_v7 = vsel %vm514_vm1, %v537_v5, %v541_v1  ;;  %v545_v19 = vor.u32 %v543_v17, %v541_v1  ;;  %v643_v20 = vshll.u32 %v2681_v53, 16  ;;  %v641_v23 = vshrl.u32 %v2681_v53, 16  ;;  %v2544_v1 = vld [vmem:[%s3097_s14 + $0x1c] sm:$0x10]  ;;  %1885 = vmatpush.bf16.msrb.mxu1 %v2619_v40 }
  0xc7   : > { %v711_v38 = vor.u32 %v710_v35, %v706_v34  ;;  %v659_v48 = vsel %vm514_vm1, %v654_v43, %v658_v44  ;;  %v717_v52 = vshrl.u32 %v2542_v11, 16  ;;  %v721_v54 = vshll.u32 %v2543_v47, 16  ;;  %v2618_v43 = vld [vmem:[%s3321_s6 + $0x30] sm:$0xff] }
  0xc8   : > { %v645_v24 = vrot.slane %v643_v20, 1  ;;  %v660_v58 = vshrl.u32 %v2730_v37, 16  ;;  %v2130_v3 = vor.u32 %v2544_v1, %v2129_v0  ;;  %v725_v6 = vshrl.u32 %v2543_v47, 16  ;;  %v3124_v20 = vld [vmem:[%s3320_s5] ss:$0 sm:$0xff]  ;;  %v2627_v47 = vld [vmem:[%s3321_s6 + $0x78] sm:$0xff] }
  0xc9   : > { %v716_v42 = vsel %vm514_vm1, %v711_v38, %v715_v39  ;;  %v719_v56 = vor.u32 %v717_v52, %v715_v39  ;;  %v723_v57 = vrot.slane %v721_v54, 1  ;;  %1909 = vmatpush.bf16.msra.mxu2 %v2627_v47  ;;  %v2616_v54 = vld [vmem:[%s3321_s6 + $0x20] sm:$0xff]  ;;  %v2643_v0 = vld [vmem:[%s3321_s6 + $0xf8] sm:$0xff]  ;;  %v2614_v1 = vld [vmem:[%s3321_s6 + $0x10] sm:$0xff] }
  0xca   : > { %1297 = vmatmul.bf16.gmra.mxu2 %v534_v45  ;;  %v646_v30 = vor.u32 %v645_v24, %v641_v23  ;;  %v2731_v45 = vld [vmem:[%s3097_s14 + $0x18] sm:$0xff]   ;;  %v733_v17 = vshrl.u32 %v2130_v3, 16  ;;  %1886 = vmatpush.bf16.msrb.mxu1 %v2618_v43 }
  0xcb   : > { %v724_v61 = vsel %vm514_vm1, %v719_v56, %v723_v57  ;;  %v727_v8 = vor.u32 %v725_v6, %v723_v57  ;;  %v2695_v15 = vunpack.c.h.b16 %v2731_v45  ;;  %1957 = vmatpush.bf16.msrb.mxu0 %v2643_v0 }
  0xcc   : > { %v651_v32 = vsel %vm514_vm1, %v646_v30, %v650_v29 }
  0xcd   : > { %1325 = vmatmul.bf16.gmra.mxu3 %v2774_v49  ;;  %v2694_v49 = vunpack.c.l.b16 %v2731_v45 }
  0xcf   : > { %v639_v55 = vpack.c.b16 %v638_v50, %v2694_v49  ;;  %v679_v5 = vpack.c.b16 %v2694_v49, %v2691_v2 }
  0xd1   : > { %v664_v59 = vshll.u32 %v639_v55, 16  ;;  %v668_v13 = vshrl.u32 %v639_v55, 16 }
  0xd3   : > { %v666_v63 = vrot.slane %v664_v59, 1  ;;  %v2615_v59 = vld [vmem:[%s3321_s6 + $0x18] sm:$0xff] }
  0xd5   : > { %1353 = vmatmul.bf16.gmra.mxu0 %v599_v62  ;;  %1279 = vmatmul.bf16.gmra.mxu1 %v506_v60  ;;  %v632_v60 = vpack.c.b16 %v2694_v49, %v2694_v49  ;;  %v662_v62 = vor.u32 %v660_v58, %v658_v44  ;;  %v670_v14 = vor.u32 %v668_v13, %v666_v63  ;;  %v2617_v49 = vld [vmem:[%s3321_s6 + $0x28] sm:$0xff] }
  0xd6   : > { %1887 = vmatpush.bf16.msrb.mxu1 %v2617_v49  ;;  %v2633_v13 = vld [vmem:[%s3321_s6 + $0xa8] sm:$0xff] }
  0xd7   : > { %v667_v4 = vsel %vm514_vm1, %v662_v62, %v666_v63  ;;  %v2626_v62 = vld [vmem:[%s3321_s6 + $0x70] sm:$0xff] }
  0xd8   : > { %v2634_v63 = vld [vmem:[%s3321_s6 + $0xb0] sm:$0xff]  ;;  %1910 = vmatpush.bf16.msra.mxu2 %v2626_v62 }
  0xda   : > { %1302 = vmatmul.bf16.gmra.mxu2 %v542_v7  ;;  %v729_v7 = vshll.u32 %v2130_v3, 16  ;;  %1888 = vmatpush.bf16.msrb.mxu1 %v2616_v54 }
  0xdd   : > { %1330 = vmatmul.bf16.gmra.mxu3 %v554_v9  ;;  %v731_v9 = vrot.slane %v729_v7, 1  ;;  %v2612_v7 = vld [vmem:[%s3321_s6] sm:$0xff] }
  0xde   : > { %1889 = vmatpush.bf16.msrb.mxu1 %v2615_v59 }
  0xdf   : > { %v732_v10 = vsel %vm514_vm1, %v727_v8, %v731_v9  ;;  %v735_v18 = vor.u32 %v733_v17, %v731_v9  ;;  %v2625_v8 = vld [vmem:[%s3321_s6 + $0x68] sm:$0xff]  ;;  %v2632_v17 = vld [vmem:[%s3321_s6 + $0xa0] sm:$0xff] }
  0xe0   : > { %1911 = vmatpush.bf16.msra.mxu2 %v2625_v8 }
  0xe2   : > { %1890 = vmatpush.bf16.msrb.mxu1 %v2614_v1 }
  0xe5   : > { %1358 = vmatmul.bf16.gmra.mxu0 %v607_v16  ;;  %1376 = vmatmul.bf16.vlgmr.msra.gmra.mxu1 %v2681_v53  ;;  %v680_v16 = vpack.c.b16 %v2695_v15, %v2695_v15  ;;  %v2624_v15 = vld [vmem:[%s3321_s6 + $0x60] sm:$0xff] }
  0xe6   : > { %1912 = vmatpush.bf16.msra.mxu2 %v2624_v15 }
  0xea   : > { %1307 = vmatmul.bf16.gmra.mxu2 %v545_v19 }
  0xed   : > { %1335 = vmatmul.bf16.gmra.mxu3 %v555_v21 }
  0xf5   : > { %1363 = vmatmul.bf16.gmra.mxu0 %v610_v28  ;;  %1381 = vmatmul.bf16.gmra.mxu1 %v2729_v22 }
  0xfa   : > { %1404 = vmatmul.bf16.vlgmr.msrb.gmra.mxu2 %v651_v32 }
  0xfd   : > { %1432 = vmatmul.bf16.vlgmr.msrb.gmra.mxu3 %v2777_v33 }
 0x105   : > { %1460 = vmatmul.bf16.vlgmr.msra.gmra.mxu0 %v716_v42  ;;  %1386 = vmatmul.bf16.gmra.mxu1 %v2730_v37 }
 0x10a   : > { %1409 = vmatmul.bf16.gmra.mxu2 %v659_v48  ;;  %v2635_v48 = vld [vmem:[%s3321_s6 + $0xb8] sm:$0xff] }
 0x10b   : > { %1933 = vmatpush.bf16.msra.mxu3 %v2635_v48 }
 0x10d   : > { %1437 = vmatmul.bf16.gmra.mxu3 %v2778_v51 }
 0x10f   : > { %1934 = vmatpush.bf16.msra.mxu3 %v2634_v63 }
 0x113   : > { %1935 = vmatpush.bf16.msra.mxu3 %v2633_v13 }
 0x115   : > { %1465 = vmatmul.bf16.gmra.mxu0 %v724_v61  ;;  %1391 = vmatmul.bf16.gmra.mxu1 %v632_v60 }
 0x117   : > { %1936 = vmatpush.bf16.msra.mxu3 %v2632_v17 }
 0x11a   : > { %1414 = vmatmul.bf16.gmra.mxu2 %v667_v4 }
 0x11d   : > { %1442 = vmatmul.bf16.gmra.mxu3 %v679_v5  ;;  %v2613_v5 = vld [vmem:[%s3321_s6 + $0x8] sm:$0xff] }
 0x11e   : > { %1891 = vmatpush.bf16.msrb.mxu1 %v2613_v5 }
 0x122   : > { %v1265_v12 = vpop.f32.mrf.mxu1  ;;  %1892 = vmatpush.bf16.msrb.mxu1 %v2612_v7 }
 0x123   : > { %v1266_v22 = vadd.f32 %v3124_v20, %v1265_v12 }
 0x125   : > { %1470 = vmatmul.bf16.gmra.mxu0 %v732_v10 }
 0x12a   : > { %v3119_v53 = vpop.f32.mrf.mxu1  ;;  %1419 = vmatmul.bf16.gmra.mxu2 %v670_v14  ;;  %v2642_v14 = vld [vmem:[%s3321_s6 + $0xf0] sm:$0xff] }
 0x12b   : > { %1958 = vmatpush.bf16.msrb.mxu0 %v2642_v14 }
 0x12d   : > { %1447 = vmatmul.bf16.gmra.mxu3 %v680_v16 }
 0x132   : > { %v1270_v19 = vpop.f32.mrf.mxu1 }
 0x133   : > { %v1271_v33 = vadd.f32 %v3124_v20, %v1270_v19  ;;  %v2623_v19 = vld [vmem:[%s3321_s6 + $0x58] sm:$0xff] }
 0x134   : > { %1913 = vmatpush.bf16.msra.mxu2 %v2623_v19 }
 0x135   : > { %1475 = vmatmul.bf16.gmra.mxu0 %v735_v18  ;;  %v2641_v18 = vld [vmem:[%s3321_s6 + $0xe8] sm:$0xff] }
 0x136   : > { %1959 = vmatpush.bf16.msrb.mxu0 %v2641_v18 }
 0x13a   : > { %v3126_v21 = vpop.f32.mrf.mxu1 }
 0x13d   : > { %v1293_v23 = vpop.f32.mrf.mxu2 }
 0x13e   : > { %v1294_v24 = vadd.f32 %v1293_v23, %v1266_v22 }
 0x140   : > { %v1321_v25 = vpop.f32.mrf.mxu3 }
 0x141   : > { %v1322_v27 = vadd.f32 %v1321_v25, %v1294_v24  ;;  %v1268_v25 = vadd.f32 %v3124_v20, %v3119_v53  ;;  %v2621_v53 = vld [vmem:[%s3321_s6 + $0x48] sm:$0xff] }
 0x142   : > { %v1349_v26 = vpop.f32.mrf.mxu0  ;;  %v1275_v28 = vpop.f32.mrf.mxu1 }
 0x143   : > { %v3129_v29 = vadd.f32 %v1349_v26, %v1322_v27  ;;  %v1276_v50 = vadd.f32 %v3124_v20, %v1275_v28  ;;  %v2631_v26 = vld [vmem:[%s3321_s6 + $0x98] sm:$0xff]  ;;  %v2622_v27 = vld [vmem:[%s3321_s6 + $0x50] sm:$0xff] }
 0x144   : > { %1937 = vmatpush.bf16.msra.mxu3 %v2631_v26  ;;  %1914 = vmatpush.bf16.msra.mxu2 %v2622_v27 }
 0x145   : > { %v3131_v30 = vpop.f32.mrf.mxu2 }
 0x148   : > { %v3133_v11 = vpop.f32.mrf.mxu3  ;;  %1915 = vmatpush.bf16.msra.mxu2 %v2621_v53 }
 0x14a   : > { %v3135_v31 = vpop.f32.mrf.mxu0  ;;  %v3137_v32 = vpop.f32.mrf.mxu1 }
 0x14b   : > { %v1278_v26 = vadd.f32 %v3124_v20, %v3137_v32 }
 0x14d   : > { %v1298_v34 = vpop.f32.mrf.mxu2 }
 0x14e   : > { %v1299_v35 = vadd.f32 %v1298_v34, %v1271_v33  ;;  %v1296_v33 = vadd.f32 %v3131_v30, %v1268_v25  ;;  %v2640_v30 = vld [vmem:[%s3321_s6 + $0xe0] sm:$0xff] }
 0x14f   : > { %1960 = vmatpush.bf16.msrb.mxu0 %v2640_v30 }
 0x150   : > { %v1326_v36 = vpop.f32.mrf.mxu3  ;;  %v1324_v34 = vadd.f32 %v3133_v11, %v1296_v33 }
 0x151   : > { %v1327_v38 = vadd.f32 %v1326_v36, %v1299_v35  ;;  %v2630_v35 = vld [vmem:[%s3321_s6 + $0x90] sm:$0xff] }
 0x152   : > { %v1354_v37 = vpop.f32.mrf.mxu0  ;;  %v3140_v39 = vpop.f32.mrf.mxu1  ;;  %1938 = vmatpush.bf16.msra.mxu3 %v2630_v35  ;;  %v1352_v11 = vadd.f32 %v3135_v31, %v1324_v34 }
 0x153   : > { %v3145_v41 = vadd.f32 %v1354_v37, %v1327_v38 }
 0x155   : > { %v3147_v42 = vpop.f32.mrf.mxu2 }
 0x158   : > { %v3152_v44 = vpop.f32.mrf.mxu3 }
 0x15a   : > { %v3154_v45 = vpop.f32.mrf.mxu0  ;;  %v1282_v46 = vpop.f32.mrf.mxu1 }
 0x15b   : > { %v2629_v46 = vld [vmem:[%s3321_s6 + $0x88] sm:$0xff] }
 0x15c   : > { %1939 = vmatpush.bf16.msra.mxu3 %v2629_v46  ;;  %v1281_v46 = vadd.f32 %v3124_v20, %v3140_v39 }
 0x15d   : > { %v1303_v51 = vpop.f32.mrf.mxu2 }
 0x15e   : > { %v1304_v52 = vadd.f32 %v1303_v51, %v1276_v50  ;;  %v2639_v50 = vld [vmem:[%s3321_s6 + $0xd8] sm:$0xff]  ;;  %v2628_v51 = vld [vmem:[%s3321_s6 + $0x80] sm:$0xff] }
 0x15f   : > { %1961 = vmatpush.bf16.msrb.mxu0 %v2639_v50 }
 0x160   : > { %v1331_v55 = vpop.f32.mrf.mxu3  ;;  %1940 = vmatpush.bf16.msra.mxu3 %v2628_v51 }
 0x161   : > { %v1332_v57 = vadd.f32 %v1331_v55, %v1304_v52 }
 0x162   : > { %v1359_v56 = vpop.f32.mrf.mxu0  ;;  %v1377_v58 = vpop.f32.mrf.mxu1 }
 0x163   : > { %v3172_v60 = vadd.f32 %v1359_v56, %v1332_v57  ;;  %v1378_v37 = vadd.f32 %v1377_v58, %v3129_v29  ;;  %v2620_v29 = vld [vmem:[%s3321_s6 + $0x40] sm:$0xff]  ;;  %v1273_v58 = vadd.f32 %v3124_v20, %v3126_v21  ;;  %v2638_v21 = vld [vmem:[%s3321_s6 + $0xd0] sm:$0xff] }
 0x164   : > { %1916 = vmatpush.bf16.msra.mxu2 %v2620_v29  ;;  %1962 = vmatpush.bf16.msrb.mxu0 %v2638_v21 }
 0x165   : > { %v3174_v61 = vpop.f32.mrf.mxu2  ;;  %v1301_v63 = vadd.f32 %v3147_v42, %v1273_v58 }
 0x168   : > { %v3188_v2 = vpop.f32.mrf.mxu3 }
 0x16a   : > { %v3190_v3 = vpop.f32.mrf.mxu0  ;;  %v1379_v4 = vpop.f32.mrf.mxu1 }
 0x16b   : > { %v1380_v48 = vadd.f32 %v1379_v4, %v1352_v11  ;;  %v1329_v4 = vadd.f32 %v3152_v44, %v1301_v63  ;;  %v2637_v44 = vld [vmem:[%s3321_s6 + $0xc8] sm:$0xff] }
 0x16c   : > { %1963 = vmatpush.bf16.msrb.mxu0 %v2637_v44 }
 0x16d   : > { %v3195_v6 = vpop.f32.mrf.mxu2  ;;  %v1357_v15 = vadd.f32 %v3154_v45, %v1329_v4  ;;  %v2636_v45 = vld [vmem:[%s3321_s6 + $0xc0] sm:$0xff] }
 0x170   : > { %v3203_v9 = vpop.f32.mrf.mxu3  ;;  %1964 = vmatpush.bf16.msrb.mxu0 %v2636_v45 }
 0x172   : > { %v3205_v10 = vpop.f32.mrf.mxu0  ;;  %v3207_v12 = vpop.f32.mrf.mxu1 }
 0x173   : > { %v1383_v8 = vadd.f32 %v3207_v12, %v3145_v41 }
 0x175   : > { %v1310_v16 = vpop.f32.mrf.mxu2 }
 0x178   : > { %v1338_v22 = vpop.f32.mrf.mxu3 }
 0x17a   : > { %v1366_v23 = vpop.f32.mrf.mxu0  ;;  %v1384_v24 = vpop.f32.mrf.mxu1 }
 0x17b   : > { %v1385_v17 = vadd.f32 %v1384_v24, %v1357_v15  ;;  %v1306_v24 = vadd.f32 %v3174_v61, %v1278_v26 }
 0x17d   : > { %v1405_v28 = vpop.f32.mrf.mxu2  ;;  %v1334_v53 = vadd.f32 %v3188_v2, %v1306_v24 }
 0x17e   : > { %v1406_v43 = vadd.f32 %v1405_v28, %v1378_v37 }
 0x17f   : > { %v1362_v61 = vadd.f32 %v3190_v3, %v1334_v53 }
 0x180   : > { %v1433_v36 = vpop.f32.mrf.mxu3 }
 0x181   : > { %v1434_v49 = vadd.f32 %v1433_v36, %v1406_v43 }
 0x182   : > { %v1461_v38 = vpop.f32.mrf.mxu0  ;;  %v3244_v40 = vpop.f32.mrf.mxu1 }
 0x183   : > { %v1462_v54 = vadd.f32 %v1461_v38, %v1434_v49  ;;  %v1388_v30 = vadd.f32 %v3244_v40, %v3172_v60  ;;  %v1309_v49 = vadd.f32 %v3195_v6, %v1281_v46 }
 0x185   : > { %v1407_v47 = vpop.f32.mrf.mxu2  ;;  %v1480_v0 = vmax.f32 %v1462_v54, 0.0  ;;  %v1337_v40 = vadd.f32 %v3203_v9, %v1309_v49 }
 0x186   : > { %v1408_v31 = vadd.f32 %v1407_v47, %v1380_v48 }
 0x187   : > { %v1365_v3 = vadd.f32 %v3205_v10, %v1337_v40 }
 0x188   : > { %v1435_v52 = vpop.f32.mrf.mxu3 }
 0x189   : > { %v1436_v56 = vadd.f32 %v1435_v52, %v1408_v31 }
 0x18a   : > { %v1463_v55 = vpop.f32.mrf.mxu0  ;;  %v1389_v57 = vpop.f32.mrf.mxu1 }
 0x18b   : > { %v1464_v59 = vadd.f32 %v1463_v55, %v1436_v56  ;;  %v1390_v50 = vadd.f32 %v1389_v57, %v1362_v61 }
 0x18d   : > { %v1410_v62 = vpop.f32.mrf.mxu2  ;;  %v1481_v1 = vmax.f32 %v1464_v59, 0.0 }
 0x18e   : > { %v1411_v42 = vadd.f32 %v1410_v62, %v1383_v8 }
 0x18f   : > { %v2699_v5 = vpack.c.bf16 %v1481_v1, %v1480_v0 }
 0x190   : > { %v1438_v7 = vpop.f32.mrf.mxu3 }
 0x191   : > { %2700 = vst [vmem:[#allocation3] sm:$0xff] %v2699_v5   ;;  %1893 = vmatmul.bf16.vlgmr.msrb.gmra.mxu1 %v2699_v5  ;;  %v1439_v18 = vadd.f32 %v1438_v7, %v1411_v42  ;;  %v1540_v28 = vshll.u32 %v2699_v5, 16  ;;  %v1538_v11 = vshrl.u32 %v2699_v5, 16 }
 0x192   : > { %v1466_v13 = vpop.f32.mrf.mxu0  ;;  %v1392_v14 = vpop.f32.mrf.mxu1 }
 0x193   : > { %v1467_v19 = vadd.f32 %v1466_v13, %v1439_v18  ;;  %v1542_v37 = vrot.slane %v1540_v28, 1  ;;  %v1393_v59 = vadd.f32 %v1392_v14, %v1365_v3 }
 0x195   : > { %v1412_v16 = vpop.f32.mrf.mxu2  ;;  %v1482_v34 = vmax.f32 %v1467_v19, 0.0  ;;  %v1543_v29 = vor.u32 %v1542_v37, %v1538_v11 }
 0x196   : > { %v1413_v41 = vadd.f32 %v1412_v16, %v1385_v17 }
 0x198   : > { %v1440_v12 = vpop.f32.mrf.mxu3 }
 0x199   : > { %v1441_v23 = vadd.f32 %v1440_v12, %v1413_v41 }
 0x19a   : > { %v1468_v22 = vpop.f32.mrf.mxu0  ;;  %v1394_v25 = vpop.f32.mrf.mxu1 }
 0x19b   : > { %v1469_v27 = vadd.f32 %v1468_v22, %v1441_v23 }
 0x19d   : > { %v1415_v33 = vpop.f32.mrf.mxu2  ;;  %v1483_v35 = vmax.f32 %v1469_v27, 0.0 }
 0x19e   : > { %v1416_v47 = vadd.f32 %v1415_v33, %v1388_v30 }
 0x19f   : > { %v2704_v36 = vpack.c.bf16 %v1483_v35, %v1482_v34 }
 0x1a0   : > { %v1443_v38 = vpop.f32.mrf.mxu3 }
 0x1a1   : > { %2752 = vst [vmem:[#allocation3 + $0x8] sm:$0xff] %v2704_v36   ;;  %v1545_v32 = vshll.u32 %v2704_v36, 16  ;;  %1898 = vmatmul.bf16.gmra.mxu1 %v2704_v36  ;;  %v1444_v31 = vadd.f32 %v1443_v38, %v1416_v47  ;;  %v1549_v9 = vshrl.u32 %v2704_v36, 16 }
 0x1a2   : > { %v1471_v43 = vpop.f32.mrf.mxu0 }
 0x1a3   : > { %v1547_v48 = vrot.slane %v1545_v32, 1  ;;  %v1472_v55 = vadd.f32 %v1471_v43, %v1444_v31  ;;  %v1515_v43 = vld [vmem:[#allocation3 + $0x1c] sm:$0x1] }
 0x1a4   : > { %v1589_v61 = vunpack.c.l.b16 %v1515_v43 }
 0x1a5   : > { %v1417_v2 = vpop.f32.mrf.mxu2  ;;  %v1548_v60 = vsel %vm514_vm1, %v1543_v29, %v1547_v48  ;;  %v1484_v6 = vmax.f32 %v1472_v55, 0.0  ;;  %v1551_v21 = vor.u32 %v1549_v9, %v1547_v48 }
 0x1a6   : > { %1917 = vmatmul.bf16.vlgmr.msra.gmra.mxu2 %v1548_v60  ;;  %v1418_v51 = vadd.f32 %v1417_v2, %v1390_v50  ;;  %v1593_v29 = vpack.c.b16 %v1589_v61, %v1589_v61 }
 0x1a8   : > { %v1445_v52 = vpop.f32.mrf.mxu3  ;;  %v2781_v54 = vld [vmem:[#allocation3 + $0x4] sm:$0xff]   ;;  %v1618_v47 = vshll.u32 %v1593_v29, 16 }
 0x1a9   : > { %v1446_v39 = vadd.f32 %v1445_v52, %v1418_v51  ;;  %1941 = vmatmul.bf16.vlgmr.msra.gmra.mxu3 %v2781_v54  ;;  %v2609_v1 = vld [vmem:[#allocation3 + $0x4] sm:$0xff]  ;;  %v2801_v52 = vld [vmem:[%s3322_s7] ss:$0 sm:$0xff] }
 0x1aa   : > { %v1473_v20 = vpop.f32.mrf.mxu0  ;;  %v1597_v10 = vshll.u32 %v2609_v1, 16  ;;  %v1595_v19 = vshrl.u32 %v2609_v1, 16  ;;  %v1620_v49 = vrot.slane %v1618_v47, 1 }
 0x1ab   : > { %v1474_v56 = vadd.f32 %v1473_v20, %v1446_v39 }
 0x1ac   : > { %v1599_v41 = vrot.slane %v1597_v10, 1 }
 0x1ad   : > { %v1420_v58 = vpop.f32.mrf.mxu2  ;;  %v1485_v57 = vmax.f32 %v1474_v56, 0.0 }
 0x1ae   : > { %v1421_v63 = vadd.f32 %v1420_v58, %v1393_v59  ;;  %v1600_v23 = vor.u32 %v1599_v41, %v1595_v19 }
 0x1af   : > { %v2709_v62 = vpack.c.bf16 %v1485_v57, %v1484_v6 }
 0x1b0   : > { %v1448_v0 = vpop.f32.mrf.mxu3 }
 0x1b1   : > { %2753 = vst [vmem:[#allocation3 + $0x10] sm:$0xff] %v2709_v62   ;;  %v1449_v4 = vadd.f32 %v1448_v0, %v1421_v63  ;;  %v1553_v7 = vshll.u32 %v2709_v62, 16  ;;  %1903 = vmatmul.bf16.gmra.mxu1 %v2709_v62  ;;  %v1557_v24 = vshrl.u32 %v2709_v62, 16 }
 0x1b2   : > { %v1476_v5 = vpop.f32.mrf.mxu0 }
 0x1b3   : > { %v1477_v8 = vadd.f32 %v1476_v5, %v1449_v4  ;;  %v1555_v13 = vrot.slane %v1553_v7, 1 }
 0x1b5   : > { %v1422_v15 = vpop.f32.mrf.mxu2  ;;  %v1486_v42 = vmax.f32 %v1477_v8, 0.0  ;;  %v1556_v14 = vsel %vm514_vm1, %v1551_v21, %v1555_v13  ;;  %v1559_v53 = vor.u32 %v1557_v24, %v1555_v13 }
 0x1b6   : > { %1922 = vmatmul.bf16.gmra.mxu2 %v1556_v14 }
 0x1b7   : > { %v1493_v44 = vpack.c.bf16 %v1486_v42, %v1486_v42 }
 0x1b8   : > { %v1450_v16 = vpop.f32.mrf.mxu3  ;;  %v2783_v17 = vld [vmem:[#allocation3 + $0xc] sm:$0xff]  }
 0x1b9   : > { %v2610_v18 = vld [vmem:[#allocation3 + $0xc] sm:$0xff]  ;;  %1500 = vst [vmem:[#allocation3 + $0x18] sm:$0xf] %v1493_v44  ;;  %1946 = vmatmul.bf16.gmra.mxu3 %v2783_v17 }
 0x1ba   : > { %v1478_v12 = vpop.f32.mrf.mxu0  ;;  %v1602_v22 = vshll.u32 %v2610_v18, 16  ;;  %v1606_v30 = vshrl.u32 %v2610_v18, 16 }
 0x1bc   : > { %v1604_v25 = vrot.slane %v1602_v22, 1 }
 0x1be   : > { %v1605_v45 = vsel %vm514_vm1, %v1600_v23, %v1604_v25  ;;  %v1608_v32 = vor.u32 %v1606_v30, %v1604_v25 }
 0x1bf   : > { %1965 = vmatmul.bf16.vlgmr.msrb.gmra.mxu0 %v1605_v45 }
 0x1c0   : > { %v1507_v26 = vld [vmem:[#allocation3 + $0x18] sm:$0x1] }
 0x1c1   : > { %v1535_v27 = vunpack.c.l.b16 %v1507_v26  ;;  %v2611_v28 = vld [vmem:[#allocation3 + $0x14] sm:$0xff] }
 0x1c2   : > { %v1610_v35 = vshll.u32 %v2611_v28, 16  ;;  %v2784_v37 = vld [vmem:[#allocation3 + $0x14] sm:$0xff]  ;;  %v1614_v48 = vshrl.u32 %v2611_v28, 16 }
 0x1c3   : > { %v1536_v33 = vpack.c.b16 %v1535_v27, %v1535_v27 }
 0x1c4   : > { %v1612_v11 = vrot.slane %v1610_v35, 1 }
 0x1c5   : > { %v1561_v34 = vshll.u32 %v1536_v33, 16 }
 0x1c6   : > { %v1613_v46 = vsel %vm514_vm1, %v1608_v32, %v1612_v11  ;;  %v1616_v2 = vor.u32 %v1614_v48, %v1612_v11 }
 0x1c7   : > { %v1563_v36 = vrot.slane %v1561_v34, 1 }
 0x1c8   : > { %v1621_v50 = vsel %vm514_vm1, %v1616_v2, %v1620_v49 }
 0x1c9   : > { %v1564_v38 = vsel %vm514_vm1, %v1559_v53, %v1563_v36  ;;  %1951 = vmatmul.bf16.gmra.mxu3 %v2784_v37 }
 0x1ca   : > { %1927 = vmatmul.bf16.gmra.mxu2 %v1564_v38 }
 0x1cf   : > { %1970 = vmatmul.bf16.gmra.mxu0 %v1613_v46 }
 0x1df   : > { %1975 = vmatmul.bf16.gmra.mxu0 %v1621_v50 }
 0x20e   : > { %v1894_v31 = vpop.f32.mrf.mxu1 }
 0x20f   : > { %v1895_v55 = vadd.f32 %v2801_v52, %v1894_v31 }
 0x216   : > { %v1896_v51 = vpop.f32.mrf.mxu1 }
 0x217   : > { %v1897_v6 = vadd.f32 %v2801_v52, %v1896_v51 }
 0x21e   : > { %v1899_v56 = vpop.f32.mrf.mxu1 }
 0x21f   : > { %v1900_v5 = vadd.f32 %v2801_v52, %v1899_v56 }
 0x226   : > { %v1901_v4 = vpop.f32.mrf.mxu1 }
 0x227   : > { %v1902_v42 = vadd.f32 %v2801_v52, %v1901_v4 }
 0x229   : > { %v1918_v60 = vpop.f32.mrf.mxu2 }
 0x22a   : > { %v1919_v20 = vadd.f32 %v1918_v60, %v1895_v55 }
 0x22c   : > { %v1942_v40 = vpop.f32.mrf.mxu3 }
 0x22d   : > { %v1943_v3 = vadd.f32 %v1942_v40, %v1919_v20 }
 0x22e   : > { %v1904_v14 = vpop.f32.mrf.mxu1 }
 0x22f   : > { %v1905_v41 = vadd.f32 %v2801_v52, %v1904_v14 }
 0x231   : > { %v1920_v54 = vpop.f32.mrf.mxu2 }
 0x232   : > { %v1921_v62 = vadd.f32 %v1920_v54, %v1897_v6 }
 0x234   : > { %v1944_v39 = vpop.f32.mrf.mxu3 }
 0x235   : > { %v1945_v63 = vadd.f32 %v1944_v39, %v1921_v62 }
 0x236   : > { %v1906_v23 = vpop.f32.mrf.mxu1 }
 0x237   : > { %v1907_v27 = vadd.f32 %v2801_v52, %v1906_v23 }
 0x239   : > { %v1923_v57 = vpop.f32.mrf.mxu2 }
 0x23a   : > { %v1924_v7 = vadd.f32 %v1923_v57, %v1900_v5 }
 0x23c   : > { %v1966_v58 = vpop.f32.mrf.mxu0  ;;  %v1947_v0 = vpop.f32.mrf.mxu3 }
 0x23d   : > { %v1967_v59 = vadd.f32 %v1966_v58, %v1943_v3  ;;  %v1948_v13 = vadd.f32 %v1947_v0, %v1924_v7 }
 0x23f   : > { %1981 = vst [vmem:[%s3304_s26] sm:$0xff] %v1967_v59 }
 0x241   : > { %v1925_v8 = vpop.f32.mrf.mxu2 }
 0x242   : > { %v1926_v44 = vadd.f32 %v1925_v8, %v1902_v42 }
 0x244   : > { %v1968_v1 = vpop.f32.mrf.mxu0  ;;  %v1949_v10 = vpop.f32.mrf.mxu3 }
 0x245   : > { %v1969_v9 = vadd.f32 %v1968_v1, %v1945_v63  ;;  %v1950_v17 = vadd.f32 %v1949_v10, %v1926_v44 }
 0x247   : > { %1982 = vst [vmem:[%s3304_s26 + $0x8] sm:$0xff] %v1969_v9 }
 0x24c   : > { %v1971_v21 = vpop.f32.mrf.mxu0  ;;  %v1952_v22 = vpop.f32.mrf.mxu3 }
 0x24d   : > { %v1972_v15 = vadd.f32 %v1971_v21, %v1948_v13  ;;  %v1928_v16 = vpop.f32.mrf.mxu2 }
 0x24e   : > { %v1929_v19 = vadd.f32 %v1928_v16, %v1905_v41 }
 0x24f   : > { %1983 = vst [vmem:[%s3304_s26 + $0x10] sm:$0xff] %v1972_v15 }
 0x250   : > { %v1953_v25 = vadd.f32 %v1952_v22, %v1929_v19 }
 0x254   : > { %v1973_v18 = vpop.f32.mrf.mxu0  ;;  %v1954_v24 = vpop.f32.mrf.mxu3 }
 0x255   : > { %v1974_v12 = vadd.f32 %v1973_v18, %v1950_v17  ;;  %v1930_v45 = vpop.f32.mrf.mxu2 }
 0x256   : > { %v1931_v33 = vadd.f32 %v1930_v45, %v1907_v27 }
 0x257   : > { %1984 = vst [vmem:[%s3304_s26 + $0x18] sm:$0xff] %v1974_v12 }
 0x258   : > { %v1955_v34 = vadd.f32 %v1954_v24, %v1931_v33 }
 0x25c   : > { %v1976_v26 = vpop.f32.mrf.mxu0 }
 0x25d   : > { %v1977_v28 = vadd.f32 %v1976_v26, %v1953_v25 }
 0x25f   : > { %1985 = vst [vmem:[%s3304_s26 + $0x20] sm:$0xff] %v1977_v28 }
 0x264   : > { %v1978_v35 = vpop.f32.mrf.mxu0 }
 0x265   : > { %v1979_v53 = vadd.f32 %v1978_v35, %v1955_v34 }
 0x267   : > { %1986 = vst [vmem:[%s3304_s26 + $0x28] sm:$0xff] %v1979_v53 }
 0x268 PF: > { %s18_s27 = sadd.s32 1, %s2808_s27  }
 0x269   : > { %p15_p6 = scmp.ge.s32.totalorder %s18_s27, 4  }
 0x26b   :  { %17 = sbr.rel (!%p15_p6) target bundleno = 1 (0x1), region = 85 }

// kernel: tile.48
= control target key start
LH: loop header
LB: loop body
LE: loop exit
PB: predicated region body
PF: predicated region fallthrough
CT: control target
= control target key end

     0   :  { %s22_s0 = inlined_call_operand.vmem [shape: f32[16], index: 0, kind: input, shape index: {}]   ;;  %s23_s1 = inlined_call_operand.vmem [shape: f32[4,16], index: 1, kind: output, shape index: {}]  }
   0x1   :  { %v4_v0 = vld [vmem:[%s22_s0] ss:$0 sm:$0xff] }
   0x2   :  { %5 = vst [vmem:[%s23_s1] sm:$0xf] %v4_v0 }

// kernel: tile.49
= control target key start
LH: loop header
LB: loop body
LE: loop exit
PB: predicated region body
PF: predicated region fallthrough
CT: control target
= control target key end

     0   :  { %s37_s8 = smov 16   ;;  %s38_s9 = smov 32   ;;  %vm7_vm0 = vcmask 130048   ;;  %vm13_vm1 = vcmask 523648   ;;  %vm19_vm2 = vcmask 392448   ;;  %vm25_vm3 = vcmask 261248   ;;  %s55_s0 = inlined_call_operand.vmem [shape: f32[4,16], index: 0, kind: input, shape index: {}]   ;;  %s56_s1 = inlined_call_operand.vmem [shape: f32[1,64], index: 1, kind: output, shape index: {}]  }
   0x1   :  { %v4_v0 = vld [vmem:[%s55_s0] sm:$0xf]  ;;  %s36_s0 = smov 48  }
   0x2   :  { %5 = vst [vmem:[#allocation1] sm:$0xf] %v4_v0 }
   0x9   :  { %v10_v1 = vld [vmem:[#allocation1 + $0x3] sm:$0x1]   ;;  %v22_v2 = vld [vmem:[#allocation1 + $0x1] sm:$0x1]   ;;  %v16_v3 = vld [vmem:[#allocation1 + $0x2] sm:$0x1]  }
   0xa   :  { %11 = vrot.lane.b32.xlu0 %v10_v1, %s36_s0  ;;  %23 = vrot.lane.b32.xlu1 %v22_v2, %s37_s8  ;;  %v6_v4 = vld [vmem:[#allocation1] sm:$0x1]  }
   0xb   :  { %8 = vst.msk [vmem:[#allocation0] sm:$0x1] %vm7_vm0, %v6_v4  }
  0x12   :  { %17 = vrot.lane.b32.xlu0 %v16_v3, %s38_s9 }
  0x7c   :  { %v12_v5 = vpop.permute.xlu0 %11   ;;  %v24_v6 = vpop.permute.xlu1 %23  }
  0x7d   :  { %14 = vst.msk [vmem:[#allocation0] sm:$0x1] %vm13_vm1, %v12_v5  }
  0x84   :  { %v18_v7 = vpop.permute.xlu0 %17  }
  0x85   :  { %20 = vst.msk [vmem:[#allocation0] sm:$0x1] %vm19_vm2, %v18_v7  }
  0x86   :  { %26 = vst.msk [vmem:[#allocation0] sm:$0x1] %vm25_vm3, %v24_v6  }
  0x8d   :  { %v29_v8 = vld [vmem:[#allocation0] sm:$0x1] }
  0x8e   :  { %32 = vst [vmem:[%s56_s1] sm:$0x1] %v29_v8 }

// kernel: decoder_forward.3
= control target key start
LH: loop header
LB: loop body
LE: loop exit
PB: predicated region body
PF: predicated region fallthrough
CT: control target
= control target key end

     0   :  { %s3079_s27 = smov 0   ;;  %s3986_s0 = inlined_call_operand.vmem [shape: bf16[288,32], index: 0, kind: input, shape index: {}]   ;;  %s3987_s1 = inlined_call_operand.vmem [shape: bf16[304,64], index: 1, kind: input, shape index: {}]   ;;  %s3988_s2 = inlined_call_operand.vmem [shape: bf16[32,64], index: 2, kind: input, shape index: {}]   ;;  %s3989_s3 = inlined_call_operand.vmem [shape: f32[1,64], index: 3, kind: input, shape index: {}]   ;;  %s3990_s4 = inlined_call_operand.vmem [shape: bf16[512,64], index: 4, kind: input, shape index: {}]   ;;  %s3991_s5 = inlined_call_operand.vmem [shape: f32[1,64], index: 5, kind: input, shape index: {}]   ;;  %s3992_s6 = inlined_call_operand.vmem [shape: bf16[256,64], index: 6, kind: input, shape index: {}]   ;;  %s3993_s7 = inlined_call_operand.vmem [shape: f32[1,64], index: 7, kind: input, shape index: {}]   ;;  %s3994_s8 = inlined_call_operand.vmem [shape: f32[2,120,64], index: 8, kind: output, shape index: {}]  }
   0x1 LB: > { %s3085_s28 = sadd.s32 4294967295, %s3030_s27   ;;  %p2403_p0 = scmp.ge.s32.totalorder %s3030_s27, 1  ;;  %s3030_s27 = sphi %s3079_s27, %s18_s27  }
   0x2   : > { %p274_p1 = scmp.lt.s32.totalorder %s3030_s27, 3 }
   0x4   : > { %p275_p2 = pnand %p2403_p0, %p274_p1 }
   0x5   : > { %s313_s9 = smul.u32 (!%p275_p2), 18, %s3085_s28  ;;  %s3033_s23 = smov (!%p275_p2), 64  }
   0x6   : > { %278 = sbr.rel (%p275_p2) target bundleno = 935 (0x3a7), region = 52  ;;  %p325_p5 = scmp.lt.s32.totalorder (!%p275_p2), %s3085_s28, 1 }
   0x7   : > { %p314_p3 = scmp.lt.s32.totalorder (!%p275_p2), %s313_s9, 35  ;;  %s319_s16 = smul.u32 (!%p275_p2), 19, %s3085_s28 }
   0x9   : > { %p320_p4 = scmp.lt.s32.totalorder (!%p275_p2), %s319_s16, 37 }
   0xb   : > { %v2676_v0 = vld [vmem:[%s3988_s2 + $0x8] sm:$0xff]  ;;  %v2675_v1 = vld [vmem:[%s3988_s2] sm:$0xff]  ;;  %s3996_s9 = smov (!%p314_p3, %s313_s9), 35  ;;  %vm420_vm0 = vcmask 261120   ;;  %s3998_s16 = smov (!%p320_p4, %s319_s16), 37  ;;  %vm331_vm1 = vcmask 519168  }
   0xc   : > { %454 = vmatpush.bf16.msra.mxu0 %v2676_v0  ;;  %2991 = vmatpush.bf16.msra.mxu3 %v2676_v0  ;;  %s2404_s12 = sshll.u32 %s3996_s9, 2  ;;  %s2405_s17 = sshll.u32 %s3998_s16, 2  ;;  %v3112_v11 = vld [vmem:[%s3989_s3] ss:$0 sm:$0xff]  ;;  %v3032_v15 = vmov 0   ;;  %vm733_vm3 = vcmask 1045504  }
   0xd   : > { %s317_s15 = scalar_lea.vmem %s3986_s0, %s2404_s12  ;;  %s3118_s22 = scalar_lea.vmem %s3987_s1, %s2405_s17  ;;  %332 = vst.msk [vmem:[#allocation2 + $0x48] sm:$0xf] %vm331_vm1, %v3032_v15  ;;  %vm628_vm2 = vsmask.f32 7424  ;;  %vm754_vm4 = vsmask.f32 5376 }
   0xe   : > { %v2666_v2 = vld [vmem:[%s317_s15] sm:$0xff]  ;;  %v2673_v3 = vld [vmem:[%s317_s15 + $0x38] sm:$0xff]  ;;  %v2667_v4 = vld [vmem:[%s317_s15 + $0x8] sm:$0xff]  ;;  %vm1121_vm5 = vcmask 523264   ;;  %vm335_vm6 = vcmask 517120   ;;  %vm333_vm7 = vcmask 519170  }
   0xf   : > { %v2674_v5 = vld [vmem:[%s317_s15 + $0x40] sm:$0xff]  ;;  %v2668_v6 = vld [vmem:[%s317_s15 + $0x10] sm:$0xff]  ;;  %v2669_v7 = vld [vmem:[%s317_s15 + $0x18] sm:$0xff]  ;;  %334 = vst.msk [vmem:[#allocation3 + $0x40] sm:$0xc] %vm333_vm7, %v3032_v15  ;;  %s4000_s28 = smov (!%p325_p5, %s3085_s28), 1 }
  0x10   : > { %455 = vmatpush.bf16.msra.mxu0 %v2675_v1  ;;  %2992 = vmatpush.bf16.msra.mxu3 %v2675_v1  ;;  %v2670_v8 = vld [vmem:[%s317_s15 + $0x20] sm:$0xff]  ;;  %v2671_v9 = vld [vmem:[%s317_s15 + $0x28] sm:$0xff]  ;;  %v2672_v10 = vld [vmem:[%s317_s15 + $0x30] sm:$0xff]  ;;  %s3009_s11 = smul.u32 120, %s4000_s28 }
  0x11   : > { %v3123_v16 = vld [vmem:[%s3118_s22] sm:$0xff]  ;;  %v3129_v20 = vld [vmem:[%s3118_s22 + $0x8] sm:$0xff]  }
  0x12   : > { %v902_v18 = vshll.u32 %v3123_v16, 16  ;;  %v900_v22 = vshrl.u32 %v3123_v16, 16  ;;  %v907_v24 = vshll.u32 %v3129_v20, 16  ;;  %v2966_v48 = vld [vmem:[%s3118_s22 + $0x4] sm:$0xf0]   ;;  %v3158_v57 = vld [vmem:[%s3118_s22 + $0xc] sm:$0xff]   ;;  %s3937_s14 = scalar_lea.vmem %s3994_s8, %s3009_s11 }
  0x13   : > { %2451 = vmatmul.msk.bf16.vlgmr.msra.gmra.mxu0 %vm420_vm0, %v2666_v2  ;;  %2458 = vmatmul.msk.bf16.vlgmr.msra.gmra.mxu3 %vm420_vm0, %v2673_v3  ;;  %v2877_v53 = vld [vmem:[%s3118_s22 + $0x4] sm:$0xc]  ;;  %v1032_v3 = vshrl.u32 %v3158_v57, 16 }
  0x14   : > { %v904_v23 = vrot.slane %v902_v18, 1  ;;  %v3134_v28 = vrot.slane %v907_v24, 1  ;;  %v559_v58 = vld [vmem:[#allocation2 + $0x48] sm:$0x1]  ;;  %v3160_v60 = vor.u32 %v2966_v48, %v2877_v53  ;;  %v911_v53 = vshrl.u32 %v3129_v20, 16 }
  0x15   : > { %v752_v2 = vunpack.c.l.b16 %v559_v58 }
  0x16   : > { %v905_v27 = vor.u32 %v904_v23, %v900_v22 }
  0x18   : > { %v910_v30 = vsel %vm628_vm2, %v905_v27, %v3134_v28 }
  0x19   : > { %970 = vrot.lane.b32.xlu2 %v910_v30, %s3033_s23 }
  0x23   : > { %2452 = vmatmul.msk.bf16.gmra.mxu0 %vm420_vm0, %v2667_v4  ;;  %2459 = vmatmul.msk.bf16.gmra.mxu3 %vm420_vm0, %v2674_v5 }
  0x33   : > { %2453 = vmatmul.msk.bf16.gmra.mxu0 %vm420_vm0, %v2668_v6 }
  0x43   : > { %2454 = vmatmul.msk.bf16.gmra.mxu0 %vm420_vm0, %v2669_v7  ;;  %v1024_v7 = vshrl.u32 %v3160_v60, 16 }
  0x53   : > { %2455 = vmatmul.msk.bf16.gmra.mxu0 %vm420_vm0, %v2670_v8  ;;  %v1035_v8 = vshll.u32 %v3158_v57, 16 }
  0x63   : > { %2456 = vmatmul.msk.bf16.gmra.mxu0 %vm420_vm0, %v2671_v9 }
  0x73   : > { %2457 = vmatmul.msk.bf16.gmra.mxu0 %vm420_vm0, %v2672_v10 }
  0x90   : > { %v457_v12 = vpop.f32.mrf.mxu0 }
  0x91   : > { %v458_v13 = vadd.f32 %v3112_v11, %v457_v12 }
  0x93   : > { %v502_v14 = vpack.c.bf16 %v458_v13, %v458_v13  ;;  %v1027_v13 = vshll.u32 %v3160_v60, 16 }
  0x95   : > { %520 = vst.msk [vmem:[#allocation2] sm:$0xf] %vm331_vm1, %v502_v14  ;;  %v1029_v30 = vrot.slane %v1027_v13, 3 }
  0x96   : > { %v492_v17 = vpop.f32.mrf.mxu3 }
  0x97   : > { %v493_v19 = vadd.f32 %v3112_v11, %v492_v17 }
  0x98   : > { %v459_v21 = vpop.f32.mrf.mxu0 }
  0x99   : > { %v516_v25 = vpack.c.bf16 %v493_v19, %v493_v19  ;;  %v460_v26 = vadd.f32 %v3112_v11, %v459_v21 }
  0x9b   : > { %534 = vst.msk [vmem:[#allocation2 + $0x38] sm:$0xf] %vm331_vm1, %v516_v25  ;;  %v503_v29 = vpack.c.bf16 %v460_v26, %v460_v26  ;;  %v1034_v26 = vrot.slane %v1032_v3, 2 }
  0x9d   : > { %521 = vst.msk [vmem:[#allocation2 + $0x4] sm:$0xf] %vm331_vm1, %v503_v29  ;;  %v1026_v29 = vrot.slane %v1024_v7, 2 }
  0x9e   : > { %v494_v31 = vpop.f32.mrf.mxu3 }
  0x9f   : > { %v495_v32 = vadd.f32 %v3112_v11, %v494_v31  ;;  %v1037_v31 = vrot.slane %v1035_v8, 3 }
  0xa0   : > { %v462_v33 = vpop.f32.mrf.mxu0 }
  0xa1   : > { %v517_v34 = vpack.c.bf16 %v495_v32, %v495_v32  ;;  %v463_v35 = vadd.f32 %v3112_v11, %v462_v33 }
  0xa3   : > { %535 = vst.msk [vmem:[#allocation2 + $0x3c] sm:$0xf] %vm331_vm1, %v517_v34  ;;  %v504_v36 = vpack.c.bf16 %v463_v35, %v463_v35 }
  0xa4   : > { %v2838_v47 = vld [vmem:[#allocation2 + $0x4] sm:$0xc] }
  0xa5   : > { %522 = vst.msk [vmem:[#allocation2 + $0x8] sm:$0xf] %vm331_vm1, %v504_v36 }
  0xa6   : > { %v497_v37 = vpop.f32.mrf.mxu3 }
  0xa7   : > { %v498_v38 = vadd.f32 %v3112_v11, %v497_v37 }
  0xa8   : > { %v464_v39 = vpop.f32.mrf.mxu0 }
  0xa9   : > { %v518_v40 = vpack.c.bf16 %v498_v38, %v498_v38  ;;  %v465_v41 = vadd.f32 %v3112_v11, %v464_v39  ;;  %v3187_v38 = vld [vmem:[%s3118_s22 + $0x10] sm:$0xff]  }
  0xaa   : > { %v3149_v44 = vld [vmem:[#allocation2 + $0x38] sm:$0xff]  }
  0xab   : > { %536 = vst.msk [vmem:[#allocation2 + $0x40] sm:$0xf] %vm331_vm1, %v518_v40  ;;  %v505_v42 = vpack.c.bf16 %v465_v41, %v465_v41  ;;  %v685_v51 = vshll.u32 %v3149_v44, 16  ;;  %v689_v0 = vshrl.u32 %v3149_v44, 16 }
  0xac   : > { %v2951_v52 = vld [vmem:[#allocation2 + $0x4] sm:$0xf0]  }
  0xad   : > { %523 = vst.msk [vmem:[#allocation2 + $0xc] sm:$0xf] %vm331_vm1, %v505_v42  ;;  %v2839_v59 = vor.u32 %v2951_v52, %v2838_v47  ;;  %v3163_v62 = vrot.slane %v685_v51, 1 }
  0xae   : > { %v499_v43 = vpop.f32.mrf.mxu3 }
  0xaf   : > { %v500_v45 = vadd.f32 %v3112_v11, %v499_v43  ;;  %v756_v5 = vshrl.u32 %v2839_v59, 16  ;;  %v759_v6 = vshll.u32 %v2839_v59, 16  ;;  %v691_v10 = vor.u32 %v689_v0, %v3163_v62 }
  0xb0   : > { %v467_v46 = vpop.f32.mrf.mxu0  ;;  %v734_v39 = vrot.slane %v2839_v59, 2 }
  0xb1   : > { %v519_v49 = vpack.c.bf16 %v500_v45, %v500_v45  ;;  %v468_v50 = vadd.f32 %v3112_v11, %v467_v46  ;;  %v758_v24 = vrot.slane %v756_v5, 2  ;;  %v761_v25 = vrot.slane %v759_v6, 3 }
  0xb2   : > { %v555_v54 = vld [vmem:[#allocation2 + $0x40] sm:$0x7] }
  0xb3   : > { %537 = vst.msk [vmem:[#allocation2 + $0x44] sm:$0xf] %vm331_vm1, %v519_v49  ;;  %v506_v55 = vpack.c.bf16 %v468_v50, %v468_v50  ;;  %v626_v56 = vunpack.c.l.b16 %v555_v54  ;;  %v3165_v63 = vld [vmem:[#allocation2 + $0x3c] sm:$0xff]   ;;  %v762_v43 = vor.u32 %v761_v25, %v758_v24  ;;  %v915_v54 = vshll.u32 %v3187_v38, 16  ;;  %v3232_v24 = vld [vmem:[%s3118_s22 + $0x14] sm:$0xff]  }
  0xb4   : > { %v818_v17 = vshrl.u32 %v3165_v63, 16  ;;  %v821_v18 = vshll.u32 %v3165_v63, 16 }
  0xb5   : > { %524 = vst.msk [vmem:[#allocation2 + $0x10] sm:$0xf] %vm331_vm1, %v506_v55  ;;  %v627_v61 = vpack.c.b16 %v626_v56, %v626_v56  ;;  %v3200_v55 = vld [vmem:[#allocation2 + $0x8] sm:$0xff]   ;;  %v917_v5 = vrot.slane %v915_v54, 1 }
  0xb6   : > { %v820_v32 = vrot.slane %v818_v17, 2  ;;  %v823_v33 = vrot.slane %v821_v18, 3  ;;  %v637_v3 = vshll.u32 %v3200_v55, 16  ;;  %v641_v13 = vshrl.u32 %v3200_v55, 16 }
  0xb7   : > { %v693_v1 = vshll.u32 %v627_v61, 16  ;;  %v697_v42 = vshrl.u32 %v627_v61, 16  ;;  %v3204_v61 = vld [vmem:[#allocation2] sm:$0xff] }
  0xb8   : > { %v469_v4 = vpop.f32.mrf.mxu0  ;;  %v3202_v58 = vor.u32 %v823_v33, %v820_v32  ;;  %v632_v7 = vshll.u32 %v3204_v61, 16  ;;  %v3244_v32 = vld [vmem:[%s3118_s22 + $0x18] sm:$0xff]  }
  0xb9   : > { %v470_v9 = vadd.f32 %v3112_v11, %v469_v4  ;;  %v695_v12 = vrot.slane %v693_v1, 1  ;;  %v1030_v1 = vor.u32 %v1029_v30, %v1026_v29  ;;  %v913_v4 = vor.u32 %v911_v53, %v3134_v28 }
  0xba   : > { %v2827_v14 = vld [vmem:[#allocation2 + $0x40] sm:$0xff]  }
  0xbb   : > { %v507_v19 = vpack.c.bf16 %v470_v9, %v470_v9  ;;  %v696_v21 = vsel %vm628_vm2, %v691_v10, %v695_v12  ;;  %v3177_v22 = vunpack.c.h.b16 %v2827_v14  ;;  %v699_v51 = vor.u32 %v697_v42, %v695_v12  ;;  %v3226_v14 = vld [vmem:[%s3118_s22 + $0x1c] sm:$0xff]  }
  0xbc   : > { %714 = vrot.lane.b32.xlu0 %v696_v21, %s3033_s23  ;;  %v3180_v23 = vld [vmem:[#allocation2 + $0xc] sm:$0xff]   ;;  %v639_v12 = vrot.slane %v637_v3, 1  ;;  %v918_v17 = vsel %vm628_vm2, %v913_v4, %v917_v5  ;;  %v634_v21 = vrot.slane %v632_v7, 1  ;;  %v1053_v33 = vshll.u32 %v3226_v14, 16 }
  0xbd   : > { %525 = vst.msk [vmem:[#allocation2 + $0x14] sm:$0xf] %vm331_vm1, %v507_v19  ;;  %v753_v27 = vpack.c.b16 %v752_v2, %v3177_v22  ;;  %v764_v34 = vshrl.u32 %v3180_v23, 16  ;;  %v767_v35 = vshll.u32 %v3180_v23, 16  ;;  %v735_v40 = vrot.slane %v3180_v23, 2 }
  0xbe   : > { %v3213_v2 = vor.u32 %v1037_v31, %v1034_v26  ;;  %v630_v19 = vshrl.u32 %v3204_v61, 16  ;;  %v643_v26 = vor.u32 %v641_v13, %v639_v12 }
  0xbf   : > { %v827_v36 = vshrl.u32 %v753_v27, 16  ;;  %v830_v37 = vshll.u32 %v753_v27, 16  ;;  %v766_v45 = vrot.slane %v764_v34, 2  ;;  %v769_v46 = vrot.slane %v767_v35, 3 }
  0xc0   : > { %v472_v41 = vpop.f32.mrf.mxu0  ;;  %v3194_v50 = vsel %vm733_vm3, %v734_v39, %v735_v40  ;;  %v1039_v10 = vsel %vm754_vm4, %v1030_v1, %v3213_v2  ;;  %v1050_v27 = vshrl.u32 %v3226_v14, 16  ;;  %v635_v34 = vor.u32 %v634_v21, %v630_v19  ;;  %v3287_v21 = vld [vmem:[%s3990_s4 + $0x78] sm:$0xff] }
  0xc1   : > { %v473_v47 = vadd.f32 %v3112_v11, %v472_v41  ;;  %v829_v48 = vrot.slane %v827_v36, 2  ;;  %v832_v49 = vrot.slane %v830_v37, 3  ;;  %v3196_v52 = vor.u32 %v769_v46, %v766_v45  ;;  %1563 = vmatpush.bf16.msra.mxu2 %v3287_v21 }
  0xc2   : > { %v1041_v35 = vshrl.u32 %v3232_v24, 16  ;;  %v1044_v36 = vshll.u32 %v3232_v24, 16  ;;  %v923_v45 = vshll.u32 %v3244_v32, 16  ;;  %v640_v53 = vsel %vm628_vm2, %v635_v34, %v639_v12  ;;  %v3271_v12 = vld [vmem:[%s3118_s22 + $0x24] sm:$0xff]  }
  0xc3   : > { %v508_v56 = vpack.c.bf16 %v473_v47, %v473_v47  ;;  %v833_v59 = vor.u32 %v832_v49, %v829_v48  ;;  %v771_v0 = vsel %vm754_vm4, %v762_v43, %v3196_v52  ;;  %v919_v43 = vshrl.u32 %v3187_v38, 16 }
  0xc4   : > { %716 = vrot.lane.b32.xlu0 %v699_v51, %s3033_s23  ;;  %835 = vrot.lane.b32.xlu2 %v771_v0, %s3033_s23  ;;  %v3218_v6 = vld [vmem:[#allocation2 + $0x10] sm:$0xff]   ;;  %v1052_v48 = vrot.slane %v1050_v27, 2  ;;  %v1055_v49 = vrot.slane %v1053_v33, 3  ;;  %v1043_v54 = vrot.slane %v1041_v35, 2  ;;  %v925_v1 = vrot.slane %v923_v45, 1  ;;  %v3295_v33 = vld [vmem:[%s3118_s22 + $0x20] sm:$0xff]  }
  0xc5   : > { %526 = vst.msk [vmem:[#allocation2 + $0x18] sm:$0xf] %vm331_vm1, %v508_v56  ;;  %v834_v20 = vsel %vm754_vm4, %v3202_v58, %v833_v59  ;;  %v645_v28 = vshll.u32 %v3218_v6, 16  ;;  %v1046_v56 = vrot.slane %v1044_v36, 3  ;;  %v1059_v19 = vshrl.u32 %v3271_v12, 16 }
  0xc6   : > { %849 = vrot.lane.b32.xlu1 %v834_v20, %s3033_s23  ;;  %v921_v20 = vor.u32 %v919_v43, %v917_v5  ;;  %v1056_v3 = vor.u32 %v1055_v49, %v1052_v48  ;;  %v1062_v27 = vshll.u32 %v3271_v12, 16  ;;  %v931_v43 = vshll.u32 %v3295_v33, 16  ;;  %v2710_v49 = vld [vmem:[%s3990_s4 + $0xf8] sm:$0xff] }
  0xc7   : > { %v647_v31 = vrot.slane %v645_v28, 1  ;;  %v1047_v7 = vor.u32 %v1046_v56, %v1043_v54  ;;  %1669 = vmatpush.bf16.msrb.mxu0 %v2710_v49 }
  0xc8   : > { %v474_v8 = vpop.f32.mrf.mxu0  ;;  %v926_v13 = vsel %vm628_vm2, %v921_v20, %v925_v1  ;;  %v933_v56 = vrot.slane %v931_v43, 1 }
  0xc9   : > { %v475_v9 = vadd.f32 %v3112_v11, %v474_v8  ;;  %v648_v47 = vsel %vm628_vm2, %v643_v26, %v647_v31 }
  0xcb   : > { %v509_v18 = vpack.c.bf16 %v475_v9, %v475_v9 }
  0xcc   : > { %1103 = vrot.lane.b32.xlu0 %v1039_v10, %s3033_s23  ;;  %v3235_v25 = vld [vmem:[#allocation2 + $0x14] sm:$0xff]   ;;  %972 = vrot.lane.b32.xlu2 %v918_v17, %s3033_s23  ;;  %v649_v10 = vshrl.u32 %v3218_v6, 16  ;;  %v1057_v17 = vsel %vm754_vm4, %v1047_v7, %v1056_v3 }
  0xcd   : > { %527 = vst.msk [vmem:[#allocation2 + $0x1c] sm:$0xf] %vm331_vm1, %v509_v18  ;;  %v773_v29 = vshrl.u32 %v3235_v25, 16  ;;  %v776_v30 = vshll.u32 %v3235_v25, 16  ;;  %v737_v0 = vrot.slane %v3235_v25, 2 }
  0xce   : > { %851 = vrot.lane.b32.xlu1 %v833_v59, %s3033_s23  ;;  %v651_v18 = vor.u32 %v649_v10, %v647_v31 }
  0xcf   : > { %v775_v39 = vrot.slane %v773_v29, 2  ;;  %v778_v41 = vrot.slane %v776_v30, 3  ;;  %v3264_v4 = vsel %vm733_vm3, %v735_v40, %v737_v0  ;;  %v1048_v40 = vsel %vm754_vm4, %v3213_v2, %v1047_v7 }
  0xd0   : > { %v477_v37 = vpop.f32.mrf.mxu0 }
  0xd1   : > { %v478_v42 = vadd.f32 %v3112_v11, %v477_v37  ;;  %v779_v46 = vor.u32 %v778_v41, %v775_v39  ;;  %v1061_v37 = vrot.slane %v1059_v19, 2  ;;  %v1064_v39 = vrot.slane %v1062_v27, 3 }
  0xd3   : > { %v510_v51 = vpack.c.bf16 %v478_v42, %v478_v42  ;;  %v780_v59 = vsel %vm754_vm4, %v3196_v52, %v779_v46  ;;  %v927_v42 = vshrl.u32 %v3244_v32, 16 }
  0xd4   : > { %837 = vrot.lane.b32.xlu0 %v780_v59, %s3033_s23  ;;  %702 = vrot.lane.b32.xlu2 %v648_v47, %s3033_s23  ;;  %v3266_v52 = vld [vmem:[#allocation2 + $0x18] sm:$0xff]   ;;  %v3308_v47 = vld [vmem:[%s3990_s4 + $0x70] sm:$0xff] }
  0xd5   : > { %528 = vst.msk [vmem:[#allocation2 + $0x20] sm:$0xf] %vm331_vm1, %v510_v51  ;;  %v653_v5 = vshll.u32 %v3266_v52, 16  ;;  %v3317_v51 = vor.u32 %v1064_v39, %v1061_v37  ;;  %1564 = vmatpush.bf16.msra.mxu2 %v3308_v47  ;;  %v929_v54 = vor.u32 %v927_v42, %v925_v1 }
  0xd6   : > { %700 = vrot.lane.b32.xlu1 %v640_v53, %s3033_s23 }
  0xd7   : > { %v655_v2 = vrot.slane %v653_v5, 1  ;;  %v934_v10 = vsel %vm628_vm2, %v929_v54, %v933_v56 }
  0xd8   : > { %v479_v8 = vpop.f32.mrf.mxu0 }
  0xd9   : > { %v480_v9 = vadd.f32 %v3112_v11, %v479_v8  ;;  %v656_v35 = vsel %vm628_vm2, %v651_v18, %v655_v2  ;;  %v1066_v8 = vsel %vm754_vm4, %v1056_v3, %v3317_v51  ;;  %v3349_v3 = vld [vmem:[%s3990_s4 + $0x60] sm:$0xff] }
  0xdb   : > { %v511_v23 = vpack.c.bf16 %v480_v9, %v480_v9 }
  0xdc   : > { %v3278_v28 = vld [vmem:[#allocation2 + $0x1c] sm:$0xff]   ;;  %974 = vrot.lane.b32.xlu0 %v926_v13, %s3033_s23  ;;  %1107 = vrot.lane.b32.xlu2 %v1057_v17, %s3033_s23  ;;  %v3340_v13 = vld [vmem:[%s3118_s22 + $0x2c] sm:$0xff]  }
  0xdd   : > { %529 = vst.msk [vmem:[#allocation2 + $0x24] sm:$0xf] %vm331_vm1, %v511_v23  ;;  %v782_v25 = vshrl.u32 %v3278_v28, 16  ;;  %v785_v26 = vshll.u32 %v3278_v28, 16  ;;  %v739_v48 = vrot.slane %v3278_v28, 2  ;;  %v1071_v27 = vshll.u32 %v3340_v13, 16 }
  0xde   : > { %1105 = vrot.lane.b32.xlu1 %v1048_v40, %s3033_s23  ;;  %v2686_v40 = vld [vmem:[%s3990_s4 + $0x38] sm:$0xff]  ;;  %v2683_v28 = vld [vmem:[%s3990_s4 + $0x20] sm:$0xff] }
  0xdf   : > { %v784_v30 = vrot.slane %v782_v25, 2  ;;  %v787_v31 = vrot.slane %v785_v26, 3  ;;  %v3328_v53 = vsel %vm733_vm3, %v737_v0, %v739_v48  ;;  %v657_v0 = vshrl.u32 %v3266_v52, 16  ;;  %v3358_v25 = vld [vmem:[%s3118_s22 + $0x28] sm:$0xff]   ;;  %2993 = vmatpush.bf16.msrb.mxu3 %v2686_v40  ;;  %1510 = vmatpush.bf16.msra.mxu1 %v2686_v40  ;;  %v3418_v40 = vld [vmem:[%s3118_s22 + $0x34] sm:$0xff]  }
  0xe0   : > { %v482_v29 = vpop.f32.mrf.mxu0  ;;  %v1068_v26 = vshrl.u32 %v3340_v13, 16  ;;  %v939_v42 = vshll.u32 %v3358_v25, 16  ;;  %v1073_v54 = vrot.slane %v1071_v27, 3 }
  0xe1   : > { %v483_v34 = vadd.f32 %v3112_v11, %v482_v29  ;;  %v3299_v36 = vor.u32 %v787_v31, %v784_v30  ;;  %v659_v18 = vor.u32 %v657_v0, %v655_v2  ;;  %v3366_v29 = vld [vmem:[%s3990_s4 + $0x58] sm:$0xff]  ;;  %v2709_v30 = vld [vmem:[%s3990_s4 + $0xf0] sm:$0xff] }
  0xe2   : > { %1670 = vmatpush.bf16.msrb.mxu0 %v2709_v30  ;;  %v1070_v49 = vrot.slane %v1068_v26, 2 }
  0xe3   : > { %v512_v41 = vpack.c.bf16 %v483_v34, %v483_v34  ;;  %v789_v45 = vsel %vm754_vm4, %v779_v46, %v3299_v36  ;;  %v3323_v46 = vld [vmem:[%s3990_s4 + $0x68] sm:$0xff] }
  0xe4   : > { %704 = vrot.lane.b32.xlu0 %v656_v35, %s3033_s23  ;;  %v3330_v20 = vld [vmem:[#allocation2 + $0x20] sm:$0xff]   ;;  %1565 = vmatpush.bf16.msra.mxu2 %v3323_v46  ;;  %v2685_v35 = vld [vmem:[%s3990_s4 + $0x30] sm:$0xff] }
  0xe5   : > { %530 = vst.msk [vmem:[#allocation2 + $0x28] sm:$0xf] %vm331_vm1, %v512_v41  ;;  %v661_v1 = vshll.u32 %v3330_v20, 16  ;;  %v935_v41 = vshrl.u32 %v3295_v33, 16  ;;  %2994 = vmatpush.bf16.msrb.mxu3 %v2685_v35  ;;  %1511 = vmatpush.bf16.msra.mxu1 %v2685_v35  ;;  %v665_v26 = vshrl.u32 %v3330_v20, 16  ;;  %v3434_v35 = vld [vmem:[%s3990_s4 + $0x40] sm:$0xff] }
  0xe6   : > { %839 = vrot.lane.b32.xlu1 %v789_v45, %s3033_s23 }
  0xe7   : > { %v663_v19 = vrot.slane %v661_v1, 1 }
  0xe8   : > { %v484_v59 = vpop.f32.mrf.mxu0  ;;  %1566 = vmatpush.bf16.msra.mxu2 %v3349_v3 }
  0xe9   : > { %v485_v7 = vadd.f32 %v3112_v11, %v484_v59  ;;  %v664_v45 = vsel %vm628_vm2, %v659_v18, %v663_v19 }
  0xeb   : > { %v513_v9 = vpack.c.bf16 %v485_v7, %v485_v7 }
  0xec   : > { %v3342_v5 = vld [vmem:[#allocation2 + $0x24] sm:$0xff]   ;;  %1109 = vrot.lane.b32.xlu0 %v1066_v8, %s3033_s23  ;;  %1567 = vmatpush.bf16.msra.mxu2 %v3366_v29  ;;  %v3390_v8 = vld [vmem:[%s3990_s4 + $0x50] sm:$0xff] }
  0xed   : > { %531 = vst.msk [vmem:[#allocation2 + $0x2c] sm:$0xf] %vm331_vm1, %v513_v9  ;;  %v791_v17 = vshrl.u32 %v3342_v5, 16  ;;  %v794_v23 = vshll.u32 %v3342_v5, 16  ;;  %v741_v7 = vrot.slane %v3342_v5, 2  ;;  %v937_v9 = vor.u32 %v935_v41, %v933_v56  ;;  %v3411_v56 = vld [vmem:[%s3990_s4 + $0x48] sm:$0xff] }
  0xee   : > { %976 = vrot.lane.b32.xlu1 %v934_v10, %s3033_s23  ;;  %v941_v10 = vrot.slane %v939_v42, 1  ;;  %v667_v41 = vor.u32 %v665_v26, %v663_v19 }
  0xef   : > { %v793_v2 = vrot.slane %v791_v17, 2  ;;  %v796_v34 = vrot.slane %v794_v23, 3  ;;  %v3401_v0 = vsel %vm733_vm3, %v739_v48, %v741_v7  ;;  %v3405_v17 = vor.u32 %v1073_v54, %v1070_v49 }
  0xf0   : > { %v487_v31 = vpop.f32.mrf.mxu0  ;;  %1568 = vmatpush.bf16.msra.mxu2 %v3390_v8  ;;  %v942_v18 = vsel %vm628_vm2, %v937_v9, %v941_v10 }
  0xf1   : > { %v488_v37 = vadd.f32 %v3112_v11, %v487_v31  ;;  %v3375_v39 = vor.u32 %v796_v34, %v793_v2  ;;  %v1075_v31 = vsel %vm754_vm4, %v3317_v51, %v3405_v17  ;;  %v1080_v34 = vshll.u32 %v3418_v40, 16 }
  0xf3   : > { %v514_v43 = vpack.c.bf16 %v488_v37, %v488_v37  ;;  %v798_v59 = vsel %vm754_vm4, %v3299_v36, %v3375_v39  ;;  %v2684_v36 = vld [vmem:[%s3990_s4 + $0x28] sm:$0xff] }
  0xf4   : > { %841 = vrot.lane.b32.xlu2 %v798_v59, %s3033_s23  ;;  %v3403_v1 = vld [vmem:[#allocation2 + $0x28] sm:$0xff]   ;;  %2995 = vmatpush.bf16.msrb.mxu3 %v2684_v36  ;;  %v943_v59 = vshrl.u32 %v3358_v25, 16 }
  0xf5   : > { %532 = vst.msk [vmem:[#allocation2 + $0x30] sm:$0xf] %vm331_vm1, %v514_v43  ;;  %1512 = vmatpush.bf16.msra.mxu1 %v2684_v36  ;;  %v669_v27 = vshll.u32 %v3403_v1, 16  ;;  %1569 = vmatpush.bf16.msra.mxu2 %v3411_v56  ;;  %v3438_v43 = vld [vmem:[%s3118_s22 + $0x30] sm:$0xff]   ;;  %v1082_v36 = vrot.slane %v1080_v34, 3 }
  0xf6   : > { %706 = vrot.lane.b32.xlu1 %v664_v45, %s3033_s23  ;;  %v2682_v45 = vld [vmem:[%s3990_s4 + $0x18] sm:$0xff]  ;;  %v947_v9 = vshll.u32 %v3438_v43, 16 }
  0xf7   : > { %v671_v42 = vrot.slane %v669_v27, 1 }
  0xf8   : > { %v489_v23 = vpop.f32.mrf.mxu0  ;;  %2996 = vmatpush.bf16.msrb.mxu3 %v2683_v28  ;;  %v949_v34 = vrot.slane %v947_v9, 1 }
  0xf9   : > { %v490_v48 = vadd.f32 %v3112_v11, %v489_v23  ;;  %1513 = vmatpush.bf16.msra.mxu1 %v2683_v28  ;;  %v1077_v11 = vshrl.u32 %v3418_v40, 16  ;;  %1570 = vmatpush.bf16.msra.mxu2 %v3434_v35  ;;  %v2681_v23 = vld [vmem:[%s3990_s4 + $0x10] sm:$0xff]  ;;  %v2708_v28 = vld [vmem:[%s3990_s4 + $0xe8] sm:$0xff] }
  0xfa   : > { %1671 = vmatpush.bf16.msrb.mxu0 %v2708_v28 }
  0xfb   : > { %v515_v30 = vpack.c.bf16 %v490_v48, %v490_v48  ;;  %v1079_v19 = vrot.slane %v1077_v11, 2  ;;  %v945_v11 = vor.u32 %v943_v59, %v941_v10  ;;  %v2679_v10 = vld [vmem:[%s3990_s4] sm:$0xff] }
  0xfc   : > { %v2961_v2 = vld [vmem:[#allocation2 + $0x2c] sm:$0xff]   ;;  %978 = vrot.lane.b32.xlu2 %v942_v18, %s3033_s23  ;;  %2997 = vmatpush.bf16.msrb.mxu3 %v2682_v45  ;;  %v672_v18 = vsel %vm628_vm2, %v667_v41, %v671_v42 }
  0xfd   : > { %533 = vst.msk [vmem:[#allocation2 + $0x34] sm:$0xf] %vm331_vm1, %v515_v30  ;;  %v800_v37 = vshrl.u32 %v2961_v2, 16  ;;  %v803_v51 = vshll.u32 %v2961_v2, 16  ;;  %1514 = vmatpush.bf16.msra.mxu1 %v2682_v45  ;;  %v2680_v30 = vld [vmem:[%s3990_s4 + $0x8] sm:$0xff] }
  0xfe   : > { %1111 = vrot.lane.b32.xlu1 %v1075_v31, %s3033_s23  ;;  %v743_v31 = vrot.slane %v2961_v2, 2 }
  0xff   : > { %v802_v49 = vrot.slane %v800_v37, 2  ;;  %v805_v54 = vrot.slane %v803_v51, 3  ;;  %v3462_v37 = vor.u32 %v1082_v36, %v1079_v19  ;;  %v673_v36 = vshrl.u32 %v3403_v1, 16 }
 0x100   : > { %2998 = vmatpush.bf16.msrb.mxu3 %v2681_v23  ;;  %v3469_v41 = vsel %vm733_vm3, %v741_v7, %v743_v31  ;;  %v950_v7 = vsel %vm628_vm2, %v945_v11, %v949_v34 }
 0x101   : > { %v806_v48 = vor.u32 %v805_v54, %v802_v49  ;;  %1515 = vmatpush.bf16.msra.mxu1 %v2681_v23  ;;  %v3473_v54 = vld [vmem:[%s3118_s22 + $0x38] sm:$0xff]   ;;  %v1084_v9 = vsel %vm754_vm4, %v3405_v17, %v3462_v37  ;;  %v951_v23 = vshrl.u32 %v3438_v43, 16  ;;  %v675_v17 = vor.u32 %v673_v36, %v671_v42 }
 0x102   : > { %v955_v28 = vshll.u32 %v3473_v54, 16  ;;  %v3550_v36 = vld [vmem:[%s3118_s22 + $0x3c] sm:$0xff]  }
 0x103   : > { %v807_v26 = vsel %vm754_vm4, %v3375_v39, %v806_v48 }
 0x104   : > { %v3455_v27 = vld [vmem:[#allocation2 + $0x34] sm:$0xff]   ;;  %843 = vrot.lane.b32.xlu0 %v807_v26, %s3033_s23  ;;  %708 = vrot.lane.b32.xlu2 %v672_v18, %s3033_s23 }
 0x105   : > { %v809_v39 = vshrl.u32 %v3455_v27, 16  ;;  %v812_v51 = vshll.u32 %v3455_v27, 16  ;;  %v745_v45 = vrot.slane %v3455_v27, 2  ;;  %2999 = vmatpush.bf16.msrb.mxu3 %v2680_v30  ;;  %1516 = vmatpush.bf16.msra.mxu1 %v2680_v30  ;;  %v3483_v5 = vld [vmem:[#allocation2 + $0x30] sm:$0xff]   ;;  %v953_v30 = vor.u32 %v951_v23, %v949_v34 }
 0x106   : > { %v677_v26 = vshll.u32 %v3483_v5, 16  ;;  %v681_v34 = vshrl.u32 %v3483_v5, 16  ;;  %v1086_v23 = vshrl.u32 %v3550_v36, 16 }
 0x107   : > { %v811_v2 = vrot.slane %v809_v39, 2  ;;  %v814_v49 = vrot.slane %v812_v51, 3  ;;  %v3481_v59 = vsel %vm733_vm3, %v743_v31, %v745_v45  ;;  %v3498_v31 = vrot.slane %v955_v28, 1 }
 0x108   : > { %v679_v11 = vrot.slane %v677_v26, 1  ;;  %v1089_v28 = vshll.u32 %v3550_v36, 16 }
 0x109   : > { %v815_v19 = vor.u32 %v814_v49, %v811_v2  ;;  %3000 = vmatpush.bf16.msrb.mxu3 %v2679_v10  ;;  %1517 = vmatpush.bf16.msra.mxu1 %v2679_v10  ;;  %v958_v51 = vsel %vm628_vm2, %v953_v30, %v3498_v31  ;;  %v2700_v10 = vld [vmem:[%s3990_s4 + $0xa8] sm:$0xff] }
 0x10a   : > { %v680_v39 = vsel %vm628_vm2, %v675_v17, %v679_v11  ;;  %v683_v2 = vor.u32 %v681_v34, %v679_v11  ;;  %v1088_v17 = vrot.slane %v1086_v23, 2  ;;  %v1091_v30 = vrot.slane %v1089_v28, 3  ;;  %v2697_v34 = vld [vmem:[%s3990_s4 + $0x90] sm:$0xff] }
 0x10b   : > { %v816_v18 = vsel %vm754_vm4, %v806_v48, %v815_v19  ;;  %v2707_v48 = vld [vmem:[%s3990_s4 + $0xe0] sm:$0xff]  ;;  %v825_v42 = vsel %vm754_vm4, %v815_v19, %v3202_v58  ;;  %v2704_v19 = vld [vmem:[%s3990_s4 + $0xc8] sm:$0xff] }
 0x10c   : > { %980 = vrot.lane.b32.xlu0 %v950_v7, %s3033_s23  ;;  %1113 = vrot.lane.b32.xlu2 %v1084_v9, %s3033_s23  ;;  %v688_v58 = vsel %vm628_vm2, %v683_v2, %v3163_v62  ;;  %v732_v2 = vpack.c.b16 %v3177_v22, %v3177_v22 }
 0x10d   : > { %845 = vrot.lane.b32.xlu1 %v816_v18, %s3033_s23  ;;  %3001 = vmatpush.bf16.msra.mxu3 %v3287_v21  ;;  %v3511_v21 = vpop.permute.xlu2 %970 }
 0x10e   : > { %1672 = vmatpush.bf16.msrb.mxu0 %v2707_v48 }
 0x111   : > { %3002 = vmatpush.bf16.msra.mxu3 %v3308_v47  ;;  %v2706_v47 = vld [vmem:[%s3990_s4 + $0xd8] sm:$0xff] }
 0x112   : > { %1673 = vmatpush.bf16.msrb.mxu0 %v2706_v47  ;;  %v2696_v47 = vld [vmem:[%s3990_s4 + $0x88] sm:$0xff] }
 0x114   : > { %710 = vrot.lane.b32.xlu0 %v680_v39, %s3033_s23  ;;  %847 = vrot.lane.b32.xlu2 %v825_v42, %s3033_s23  ;;  %v1092_v39 = vor.u32 %v1091_v30, %v1088_v17  ;;  %v1003_v30 = vrot.slane %v3160_v60, 2 }
 0x115   : > { %982 = vrot.lane.b32.xlu1 %v958_v51, %s3033_s23  ;;  %3003 = vmatpush.bf16.msra.mxu3 %v3323_v46  ;;  %v2698_v51 = vld [vmem:[%s3990_s4 + $0x98] sm:$0xff] }
 0x116   : > { %v1093_v42 = vsel %vm754_vm4, %v3462_v37, %v1092_v39 }
 0x119   : > { %3004 = vmatpush.bf16.msra.mxu3 %v3349_v3  ;;  %v2705_v3 = vld [vmem:[%s3990_s4 + $0xd0] sm:$0xff] }
 0x11a   : > { %1674 = vmatpush.bf16.msrb.mxu0 %v2705_v3 }
 0x11c   : > { %1115 = vrot.lane.b32.xlu0 %v1093_v42, %s3033_s23 }
 0x11d   : > { %712 = vrot.lane.b32.xlu1 %v688_v58, %s3033_s23  ;;  %3005 = vmatpush.bf16.msra.mxu3 %v3366_v29 }
 0x11e   : > { %v836_v49 = vpop.permute.xlu2 %835  ;;  %1675 = vmatpush.bf16.msrb.mxu0 %v2704_v19 }
 0x11f   : > { %v1152_v46 = vsel %vm1121_vm5, %v3194_v50, %v836_v49  ;;  %v2702_v50 = vld [vmem:[%s3990_s4 + $0xb8] sm:$0xff]  ;;  %v2835_v49 = vld [vmem:[%s3118_s22 + $0x40] sm:$0xff]  }
 0x120   : > { %1571 = vmatmul.bf16.vlgmr.msra.gmra.mxu2 %v1152_v46  ;;  %v581_v46 = vld [vmem:[%s3118_s22 + $0x48] sm:$0x1] }
 0x121   : > { %3006 = vmatpush.bf16.msra.mxu3 %v3390_v8  ;;  %v2701_v8 = vld [vmem:[%s3990_s4 + $0xb0] sm:$0xff] }
 0x125   : > { %3007 = vmatpush.bf16.msra.mxu3 %v3411_v56 }
 0x126   : > { %v3577_v22 = vpop.permute.xlu2 %972 }
 0x129   : > { %3008 = vmatpush.bf16.msra.mxu3 %v3434_v35  ;;  %v554_v35 = vld [vmem:[#allocation2 + $0x40] sm:$0x3] }
 0x12a   : > { %v615_v9 = vunpack.c.l.b16 %v554_v35 }
 0x12c   : > { %v624_v18 = vpack.c.b16 %v615_v9, %v615_v9 }
 0x12e   : > { %v715_v62 = vpop.permute.xlu0 %714 }
 0x12f   : > { %v1144_v29 = vsel %vm1121_vm5, %v3149_v44, %v715_v62  ;;  %v2699_v44 = vld [vmem:[%s3990_s4 + $0xa0] sm:$0xff]  ;;  %v3573_v62 = vunpack.c.h.b16 %v2835_v49 }
 0x130   : > { %1553 = vmatmul.bf16.vlgmr.msrb.gmra.mxu3 %v1144_v29  ;;  %v1021_v29 = vunpack.c.l.b16 %v581_v46 }
 0x131   : > { %1616 = vmatpush.bf16.msrb.mxu3 %v2702_v50 }
 0x132   : > { %v1022_v35 = vpack.c.b16 %v1021_v29, %v3573_v62 }
 0x134   : > { %v1098_v9 = vshll.u32 %v1022_v35, 16 }
 0x135   : > { %1617 = vmatpush.bf16.msrb.mxu3 %v2701_v8  ;;  %v749_v8 = vrot.slane %v732_v2, 2  ;;  %v703_v2 = vpop.permute.xlu2 %702 }
 0x136   : > { %v717_v56 = vpop.permute.xlu0 %716  ;;  %v1100_v23 = vrot.slane %v1098_v9, 3 }
 0x137   : > { %v1148_v11 = vsel %vm1121_vm5, %v624_v18, %v717_v56  ;;  %v2703_v56 = vld [vmem:[%s3990_s4 + $0xc0] sm:$0xff] }
 0x138   : > { %v850_v7 = vpop.permute.xlu1 %849  ;;  %1676 = vmatpush.bf16.msrb.mxu0 %v2703_v56  ;;  %v959_v56 = vshrl.u32 %v3473_v54, 16 }
 0x139   : > { %1618 = vmatpush.bf16.msrb.mxu3 %v2700_v10  ;;  %v747_v10 = vrot.slane %v3165_v63, 2 }
 0x13d   : > { %1619 = vmatpush.bf16.msrb.mxu3 %v2699_v44  ;;  %v750_v44 = vsel %vm733_vm3, %v747_v10, %v749_v8  ;;  %v1108_v46 = vpop.permute.xlu2 %1107 }
 0x13e   : > { %v1104_v26 = vpop.permute.xlu0 %1103  ;;  %v1180_v28 = vsel %vm1121_vm5, %v750_v44, %v850_v7  ;;  %v1126_v7 = vsel %vm1121_vm5, %v3200_v55, %v703_v2 }
 0x140   : > { %v852_v48 = vpop.permute.xlu1 %851  ;;  %1558 = vmatmul.bf16.gmra.mxu3 %v1148_v11  ;;  %v1004_v11 = vrot.slane %v3158_v57, 2 }
 0x141   : > { %1620 = vmatpush.bf16.msrb.mxu3 %v2698_v51 }
 0x142   : > { %v1005_v42 = vsel %vm733_vm3, %v1003_v30, %v1004_v11 }
 0x145   : > { %1621 = vmatpush.bf16.msrb.mxu3 %v2697_v34  ;;  %v1216_v34 = vsel %vm1121_vm5, %v1005_v42, %v1104_v26  ;;  %v1184_v26 = vsel %vm1121_vm5, %v749_v8, %v852_v48 }
 0x146   : > { %v838_v58 = vpop.permute.xlu0 %837  ;;  %1677 = vmatmul.bf16.vlgmr.msrb.gmra.mxu0 %v1216_v34 }
 0x147   : > { %v1156_v37 = vsel %vm1121_vm5, %v3264_v4, %v838_v58  ;;  %v2695_v4 = vld [vmem:[%s3990_s4 + $0x80] sm:$0xff] }
 0x148   : > { %v701_v3 = vpop.permute.xlu1 %700  ;;  %1576 = vmatmul.bf16.gmra.mxu2 %v1156_v37  ;;  %v577_v58 = vld [vmem:[%s3118_s22 + $0x40] sm:$0x7] }
 0x149   : > { %v1123_v50 = vsel %vm1121_vm5, %v3204_v61, %v701_v3  ;;  %1622 = vmatpush.bf16.msrb.mxu3 %v2696_v47  ;;  %v1095_v61 = vshrl.u32 %v1022_v35, 16  ;;  %v897_v49 = vunpack.c.l.b16 %v577_v58 }
 0x14a   : > { %1518 = vmatmul.bf16.vlgmr.msra.gmra.mxu1 %v1123_v50  ;;  %v1006_v50 = vrot.slane %v3232_v24, 2 }
 0x14b   : > { %v1097_v19 = vrot.slane %v1095_v61, 2 }
 0x14d   : > { %1623 = vmatpush.bf16.msrb.mxu3 %v2695_v4  ;;  %v1101_v17 = vor.u32 %v1100_v23, %v1097_v19  ;;  %v1007_v4 = vsel %vm733_vm3, %v1004_v11, %v1006_v50  ;;  %v1008_v23 = vrot.slane %v3226_v14, 2 }
 0x14e   : > { %v975_v57 = vpop.permute.xlu0 %974  ;;  %v842_v48 = vpop.permute.xlu2 %841 }
 0x14f   : > { %v1102_v51 = vsel %vm754_vm4, %v1092_v39, %v1101_v17  ;;  %v898_v39 = vpack.c.b16 %v897_v49, %v897_v49  ;;  %v1164_v8 = vsel %vm1121_vm5, %v3401_v0, %v842_v48 }
 0x150   : > { %1606 = vmatmul.bf16.vlgmr.msra.gmra.mxu3 %v1180_v28  ;;  %v1106_v18 = vpop.permute.xlu1 %1105  ;;  %1117 = vrot.lane.b32.xlu0 %v1102_v51, %s3033_s23  ;;  %v1009_v28 = vsel %vm733_vm3, %v1006_v50, %v1008_v23  ;;  %v1010_v51 = vrot.slane %v3271_v12, 2  ;;  %v1193_v12 = vsel %vm1121_vm5, %v3187_v38, %v975_v57 }
 0x151   : > { %v963_v3 = vshll.u32 %v898_v39, 16  ;;  %v967_v37 = vshrl.u32 %v898_v39, 16  ;;  %v1220_v35 = vsel %vm1121_vm5, %v1007_v4, %v1106_v18 }
 0x152   : > { %v1011_v34 = vsel %vm733_vm3, %v1008_v23, %v1010_v51 }
 0x153   : > { %v965_v29 = vrot.slane %v963_v3, 1  ;;  %v1014_v3 = vrot.slane %v3418_v40, 2 }
 0x155   : > { %v969_v55 = vor.u32 %v967_v37, %v965_v29  ;;  %v1016_v37 = vrot.slane %v3550_v36, 2 }
 0x156   : > { %1682 = vmatmul.bf16.gmra.mxu0 %v1220_v35  ;;  %v705_v9 = vpop.permute.xlu0 %704  ;;  %v979_v30 = vpop.permute.xlu2 %978 }
 0x157   : > { %986 = vrot.lane.b32.xlu1 %v969_v55, %s3033_s23  ;;  %v1129_v24 = vsel %vm1121_vm5, %v3218_v6, %v705_v9  ;;  %v1224_v6 = vsel %vm1121_vm5, %v1009_v28, %v1108_v46 }
 0x158   : > { %v840_v47 = vpop.permute.xlu1 %839 }
 0x159   : > { %v1160_v60 = vsel %vm1121_vm5, %v3328_v53, %v840_v47  ;;  %v961_v53 = vor.u32 %v959_v56, %v3498_v31  ;;  %v1187_v31 = vsel %vm1121_vm5, %v3123_v16, %v3511_v21 }
 0x15a   : > { %1523 = vmatmul.bf16.gmra.mxu1 %v1126_v7  ;;  %1581 = vmatmul.bf16.gmra.mxu2 %v1160_v60  ;;  %v1012_v7 = vrot.slane %v3340_v13, 2 }
 0x15b   : > { %v966_v61 = vsel %vm628_vm2, %v961_v53, %v965_v29 }
 0x15c   : > { %984 = vrot.lane.b32.xlu2 %v966_v61, %s3033_s23  ;;  %v1013_v60 = vsel %vm733_vm3, %v1010_v51, %v1012_v7  ;;  %v1015_v63 = vsel %vm733_vm3, %v1012_v7, %v1014_v3 }
 0x15e   : > { %v1110_v19 = vpop.permute.xlu0 %1109  ;;  %v709_v42 = vpop.permute.xlu2 %708 }
 0x15f   : > { %v1228_v2 = vsel %vm1121_vm5, %v1011_v34, %v1110_v19 }
 0x160   : > { %1611 = vmatmul.bf16.gmra.mxu3 %v1184_v26  ;;  %v977_v44 = vpop.permute.xlu1 %976  ;;  %v1017_v26 = vsel %vm733_vm3, %v1014_v3, %v1016_v37 }
 0x161   : > { %v1196_v57 = vsel %vm1121_vm5, %v3244_v32, %v977_v44 }
 0x164   : > { %1119 = vrot.lane.b32.xlu2 %v1101_v17, %s3033_s23  ;;  %v3023_v17 = vld [vmem:[%s3118_s22 + $0x8] sm:$0xff]  }
 0x165   : > { %v1190_v14 = vsel %vm1121_vm5, %v3023_v17, %v3577_v22 }
 0x166   : > { %1687 = vmatmul.bf16.gmra.mxu0 %v1224_v6  ;;  %v1114_v58 = vpop.permute.xlu2 %1113 }
 0x167   : > { %v1236_v27 = vsel %vm1121_vm5, %v1015_v63, %v1114_v58 }
 0x168   : > { %v707_v18 = vpop.permute.xlu1 %706 }
 0x169   : > { %v1132_v16 = vsel %vm1121_vm5, %v3266_v52, %v707_v18  ;;  %v1135_v52 = vsel %vm1121_vm5, %v3330_v20, %v709_v42 }
 0x16a   : > { %1528 = vmatmul.bf16.gmra.mxu1 %v1129_v24  ;;  %1586 = vmatmul.bf16.gmra.mxu2 %v1164_v8 }
 0x16e   : > { %v848_v39 = vpop.permute.xlu2 %847 }
 0x170   : > { %1624 = vmatmul.bf16.vlgmr.msrb.gmra.mxu3 %v1187_v31  ;;  %v1112_v21 = vpop.permute.xlu1 %1111 }
 0x171   : > { %v1232_v49 = vsel %vm1121_vm5, %v1013_v60, %v1112_v21 }
 0x176   : > { %v844_v0 = vpop.permute.xlu0 %843  ;;  %1692 = vmatmul.bf16.gmra.mxu0 %v1228_v2 }
 0x177   : > { %v1168_v11 = vsel %vm1121_vm5, %v3469_v41, %v844_v0 }
 0x17a   : > { %1533 = vmatmul.bf16.gmra.mxu1 %v1132_v16  ;;  %1591 = vmatmul.bf16.gmra.mxu2 %v1168_v11  ;;  %v576_v16 = vld [vmem:[%s3118_s22 + $0x40] sm:$0x3] }
 0x17b   : > { %v886_v34 = vunpack.c.l.b16 %v576_v16 }
 0x17d   : > { %v895_v2 = vpack.c.b16 %v886_v34, %v886_v34 }
 0x17e   : > { %v981_v22 = vpop.permute.xlu0 %980 }
 0x17f   : > { %v846_v41 = vpop.permute.xlu1 %845  ;;  %v1202_v56 = vsel %vm1121_vm5, %v3358_v25, %v981_v22  ;;  %v3672_v25 = vld [vmem:[%s3991_s5] ss:$0 sm:$0xff] }
 0x180   : > { %1629 = vmatmul.bf16.gmra.mxu3 %v1190_v14  ;;  %v1172_v47 = vsel %vm1121_vm5, %v3481_v59, %v846_v41  ;;  %v748_v59 = vsel %vm733_vm3, %v745_v45, %v747_v10  ;;  %v1199_v10 = vsel %vm1121_vm5, %v3295_v33, %v979_v30 }
 0x181   : > { %v1176_v38 = vsel %vm1121_vm5, %v748_v59, %v848_v39 }
 0x186   : > { %1697 = vmatmul.bf16.gmra.mxu0 %v1232_v49  ;;  %v711_v20 = vpop.permute.xlu0 %710 }
 0x187   : > { %v1138_v46 = vsel %vm1121_vm5, %v3403_v1, %v711_v20  ;;  %v983_v13 = vpop.permute.xlu1 %982 }
 0x188   : > { %v1205_v61 = vsel %vm1121_vm5, %v3438_v43, %v983_v13 }
 0x18a   : > { %1538 = vmatmul.bf16.gmra.mxu1 %v1135_v52  ;;  %1596 = vmatmul.bf16.gmra.mxu2 %v1172_v47 }
 0x18e   : > { %v1116_v40 = vpop.permute.xlu0 %1115 }
 0x18f   : > { %v713_v45 = vpop.permute.xlu1 %712  ;;  %v1240_v29 = vsel %vm1121_vm5, %v1017_v26, %v1116_v40 }
 0x190   : > { %1634 = vmatmul.bf16.gmra.mxu3 %v1193_v12  ;;  %v1141_v1 = vsel %vm1121_vm5, %v3483_v5, %v713_v45  ;;  %v1002_v5 = vpack.c.b16 %v3573_v62, %v3573_v62 }
 0x192   : > { %v1018_v55 = vrot.slane %v1002_v5, 2 }
 0x194   : > { %v1019_v4 = vsel %vm733_vm3, %v1016_v37, %v1018_v55 }
 0x196   : > { %1702 = vmatmul.bf16.gmra.mxu0 %v1236_v27 }
 0x19a   : > { %1543 = vmatmul.bf16.gmra.mxu1 %v1138_v46  ;;  %1601 = vmatmul.bf16.gmra.mxu2 %v1176_v38 }
 0x1a0   : > { %1639 = vmatmul.bf16.gmra.mxu3 %v1196_v57 }
 0x1a3   : > { %v1572_v31 = vpop.f32.mrf.mxu2 }
 0x1a6   : > { %1707 = vmatmul.bf16.gmra.mxu0 %v1240_v29 }
 0x1aa   : > { %1548 = vmatmul.bf16.gmra.mxu1 %v1141_v1 }
 0x1ab   : > { %v1574_v21 = vpop.f32.mrf.mxu2 }
 0x1b0   : > { %1644 = vmatmul.bf16.gmra.mxu3 %v1199_v10 }
 0x1b3   : > { %v1554_v32 = vpop.f32.mrf.mxu3 }
 0x1b4   : > { %v1555_v62 = vadd.f32 %v3672_v25, %v1554_v32 }
 0x1b6   : > { %v985_v44 = vpop.permute.xlu2 %984 }
 0x1b7   : > { %v1208_v0 = vsel %vm1121_vm5, %v3473_v54, %v985_v44 }
 0x1bb   : > { %v1556_v50 = vpop.f32.mrf.mxu3 }
 0x1bc   : > { %v1557_v19 = vadd.f32 %v3672_v25, %v1556_v50 }
 0x1be   : > { %v1120_v18 = vpop.permute.xlu2 %1119 }
 0x1bf   : > { %v1248_v30 = vsel %vm1121_vm5, %v1018_v55, %v1120_v18 }
 0x1c0   : > { %1649 = vmatmul.bf16.gmra.mxu3 %v1202_v56 }
 0x1c2   : > { %v1118_v36 = vpop.permute.xlu0 %1117 }
 0x1c3   : > { %v1559_v33 = vpop.f32.mrf.mxu3  ;;  %v1244_v53 = vsel %vm1121_vm5, %v1019_v4, %v1118_v36  ;;  %v1678_v48 = vpop.f32.mrf.mxu0 }
 0x1c4   : > { %1712 = vmatmul.bf16.gmra.mxu0 %v1244_v53  ;;  %v1560_v11 = vadd.f32 %v3672_v25, %v1559_v33 }
 0x1c7   : > { %v1519_v9 = vpop.f32.mrf.mxu1 }
 0x1c8   : > { %v1520_v22 = vadd.f32 %v3672_v25, %v1519_v9 }
 0x1c9   : > { %v987_v41 = vpop.permute.xlu1 %986 }
 0x1ca   : > { %v1212_v54 = vsel %vm1121_vm5, %v895_v2, %v987_v41  ;;  %v1573_v7 = vadd.f32 %v1572_v31, %v1520_v22 }
 0x1cb   : > { %v1561_v35 = vpop.f32.mrf.mxu3  ;;  %v1680_v6 = vpop.f32.mrf.mxu0 }
 0x1cc   : > { %v1577_v52 = vpop.f32.mrf.mxu2 }
 0x1cf   : > { %v1521_v23 = vpop.f32.mrf.mxu1 }
 0x1d0   : > { %1654 = vmatmul.bf16.gmra.mxu3 %v1205_v61  ;;  %v1522_v59 = vadd.f32 %v3672_v25, %v1521_v23 }
 0x1d2   : > { %v1575_v3 = vadd.f32 %v1574_v21, %v1522_v59 }
 0x1d3   : > { %v1607_v24 = vpop.f32.mrf.mxu3  ;;  %v1683_v42 = vpop.f32.mrf.mxu0 }
 0x1d4   : > { %v3675_v8 = vadd.f32 %v1607_v24, %v1555_v62  ;;  %1717 = vmatmul.bf16.gmra.mxu0 %v1248_v30  ;;  %v1579_v20 = vpop.f32.mrf.mxu2 }
 0x1d7   : > { %v1524_v14 = vpop.f32.mrf.mxu1 }
 0x1d8   : > { %v1525_v1 = vadd.f32 %v3672_v25, %v1524_v14 }
 0x1da   : > { %v1578_v29 = vadd.f32 %v1577_v52, %v1525_v1 }
 0x1db   : > { %v1609_v43 = vpop.f32.mrf.mxu3  ;;  %v1685_v58 = vpop.f32.mrf.mxu0 }
 0x1dc   : > { %v3678_v28 = vadd.f32 %v1609_v43, %v1557_v19 }
 0x1dd   : > { %v1582_v37 = vpop.f32.mrf.mxu2 }
 0x1df   : > { %v1526_v12 = vpop.f32.mrf.mxu1 }
 0x1e0   : > { %1659 = vmatmul.bf16.gmra.mxu3 %v1208_v0  ;;  %v1527_v55 = vadd.f32 %v3672_v25, %v1526_v12 }
 0x1e2   : > { %v1580_v35 = vadd.f32 %v1579_v20, %v1527_v55 }
 0x1e3   : > { %v1612_v17 = vpop.f32.mrf.mxu3  ;;  %v1688_v39 = vpop.f32.mrf.mxu0 }
 0x1e4   : > { %v3685_v51 = vadd.f32 %v1612_v17, %v1560_v11 }
 0x1e5   : > { %v1584_v36 = vpop.f32.mrf.mxu2 }
 0x1e7   : > { %v1529_v38 = vpop.f32.mrf.mxu1 }
 0x1e8   : > { %v1530_v24 = vadd.f32 %v3672_v25, %v1529_v38 }
 0x1ea   : > { %v1583_v23 = vadd.f32 %v1582_v37, %v1530_v24 }
 0x1eb   : > { %v1614_v47 = vpop.f32.mrf.mxu3  ;;  %v1690_v45 = vpop.f32.mrf.mxu0 }
 0x1ef   : > { %v1531_v26 = vpop.f32.mrf.mxu1 }
 0x1f0   : > { %1664 = vmatmul.bf16.gmra.mxu3 %v1212_v54  ;;  %v1532_v11 = vadd.f32 %v3672_v25, %v1531_v26 }
 0x1f2   : > { %v1585_v2 = vadd.f32 %v1584_v36, %v1532_v11 }
 0x1f3   : > { %v1625_v60 = vpop.f32.mrf.mxu3  ;;  %v3693_v5 = vpop.f32.mrf.mxu0 }
 0x1f4   : > { %v1626_v49 = vadd.f32 %v1625_v60, %v1573_v7 }
 0x1f6   : > { %v1679_v46 = vadd.f32 %v1678_v48, %v1626_v49 }
 0x1f7   : > { %v1534_v9 = vpop.f32.mrf.mxu1 }
 0x1f8   : > { %v1722_v13 = vmax.f32 %v1679_v46, 0.0 }
 0x1fa   : > { %v1739_v57 = vpack.c.bf16 %v1722_v13, %v1722_v13 }
 0x1fb   : > { %v1627_v63 = vpop.f32.mrf.mxu3  ;;  %v3697_v48 = vpop.f32.mrf.mxu0 }
 0x1fc   : > { %1756 = vst.msk [vmem:[#allocation3] sm:$0xf] %vm331_vm1, %v1739_v57  ;;  %v1628_v27 = vadd.f32 %v1627_v63, %v1575_v3 }
 0x1fe   : > { %v1681_v10 = vadd.f32 %v1680_v6, %v1628_v27  ;;  %v1587_v6 = vpop.f32.mrf.mxu2 }
 0x1ff   : > { %v1536_v16 = vpop.f32.mrf.mxu1 }
 0x200   : > { %v1723_v32 = vmax.f32 %v1681_v10, 0.0  ;;  %v1537_v36 = vadd.f32 %v3672_v25, %v1536_v16 }
 0x202   : > { %v1740_v40 = vpack.c.bf16 %v1723_v32, %v1723_v32 }
 0x203   : > { %v1630_v50 = vpop.f32.mrf.mxu3  ;;  %v3703_v30 = vpop.f32.mrf.mxu0 }
 0x204   : > { %1757 = vst.msk [vmem:[#allocation3 + $0x4] sm:$0xf] %vm331_vm1, %v1740_v40  ;;  %v1631_v56 = vadd.f32 %v1630_v50, %v1578_v29  ;;  %v2719_v29 = vld [vmem:[%s3992_s6 + $0x38] sm:$0xff] }
 0x205   : > { %2221 = vmatpush.bf16.msrb.mxu1 %v2719_v29 }
 0x206   : > { %v1684_v33 = vadd.f32 %v1683_v42, %v1631_v56  ;;  %v1589_v49 = vpop.f32.mrf.mxu2 }
 0x207   : > { %v1539_v38 = vpop.f32.mrf.mxu1 }
 0x208   : > { %v1724_v4 = vmax.f32 %v1684_v33, 0.0 }
 0x20a   : > { %v1741_v53 = vpack.c.bf16 %v1724_v4, %v1724_v4 }
 0x20b   : > { %v1632_v61 = vpop.f32.mrf.mxu3  ;;  %v3700_v43 = vld [vmem:[#allocation3] sm:$0xff]  ;;  %v3712_v60 = vpop.f32.mrf.mxu0 }
 0x20c   : > { %1758 = vst.msk [vmem:[#allocation3 + $0x8] sm:$0xf] %vm331_vm1, %v1741_v53  ;;  %v1633_v62 = vadd.f32 %v1632_v61, %v1580_v35  ;;  %v1837_v17 = vshll.u32 %v3700_v43, 16  ;;  %v1835_v22 = vshrl.u32 %v3700_v43, 16 }
 0x20e   : > { %v1686_v44 = vadd.f32 %v1685_v58, %v1633_v62  ;;  %v1839_v41 = vrot.slane %v1837_v17, 1  ;;  %v2923_v58 = vld [vmem:[#allocation3 + $0x4] sm:$0xc]  ;;  %v1592_v35 = vpop.f32.mrf.mxu2 }
 0x20f   : > { %v2726_v17 = vld [vmem:[%s3992_s6 + $0x70] sm:$0xff] }
 0x210   : > { %v1725_v31 = vmax.f32 %v1686_v44, 0.0  ;;  %v1840_v59 = vor.u32 %v1839_v41, %v1835_v22 }
 0x212   : > { %v1742_v19 = vpack.c.bf16 %v1725_v31, %v1725_v31 }
 0x213   : > { %v1635_v18 = vpop.f32.mrf.mxu3  ;;  %v2981_v42 = vld [vmem:[#allocation3 + $0x4] sm:$0xf0]   ;;  %v3723_v40 = vpop.f32.mrf.mxu0 }
 0x214   : > { %1759 = vst.msk [vmem:[#allocation3 + $0xc] sm:$0xf] %vm331_vm1, %v1742_v19  ;;  %v1636_v0 = vadd.f32 %v1635_v18, %v1583_v23  ;;  %v2924_v7 = vor.u32 %v2981_v42, %v2923_v58  ;;  %v1541_v19 = vpop.f32.mrf.mxu1 }
 0x216   : > { %v1689_v21 = vadd.f32 %v1688_v39, %v1636_v0  ;;  %v1535_v39 = vadd.f32 %v3672_v25, %v1534_v9  ;;  %v1946_v3 = vshrl.u32 %v2924_v7, 16  ;;  %v1949_v63 = vshll.u32 %v2924_v7, 16 }
 0x217   : > { %v1927_v50 = vrot.slane %v2924_v7, 2 }
 0x218   : > { %v1726_v14 = vmax.f32 %v1689_v21, 0.0  ;;  %v1588_v1 = vadd.f32 %v1587_v6, %v1535_v39  ;;  %v1948_v26 = vrot.slane %v1946_v3, 2  ;;  %v1951_v56 = vrot.slane %v1949_v63, 3 }
 0x219   : > { %v1590_v6 = vadd.f32 %v1589_v49, %v1537_v36 }
 0x21a   : > { %v1743_v34 = vpack.c.bf16 %v1726_v14, %v1726_v14  ;;  %v1952_v44 = vor.u32 %v1951_v56, %v1948_v26  ;;  %v1540_v14 = vadd.f32 %v3672_v25, %v1539_v38 }
 0x21b   : > { %v1637_v52 = vpop.f32.mrf.mxu3  ;;  %v3707_v47 = vld [vmem:[#allocation3 + $0x8] sm:$0xff]   ;;  %v3742_v21 = vpop.f32.mrf.mxu0 }
 0x21c   : > { %1760 = vst.msk [vmem:[#allocation3 + $0x10] sm:$0xf] %vm331_vm1, %v1743_v34  ;;  %v1638_v54 = vadd.f32 %v1637_v52, %v1585_v2  ;;  %v1842_v12 = vshll.u32 %v3707_v47, 16  ;;  %v1846_v34 = vshrl.u32 %v3707_v47, 16  ;;  %v1594_v52 = vpop.f32.mrf.mxu2  ;;  %v1593_v22 = vadd.f32 %v1592_v35, %v1540_v14  ;;  %v1544_v39 = vpop.f32.mrf.mxu1 }
 0x21e   : > { %v1691_v20 = vadd.f32 %v1690_v45, %v1638_v54  ;;  %v1844_v46 = vrot.slane %v1842_v12, 1  ;;  %v2727_v45 = vld [vmem:[%s3992_s6 + $0x78] sm:$0xff] }
 0x21f   : > { %2269 = vmatpush.bf16.msrb.mxu2 %v2727_v45 }
 0x220   : > { %v1727_v13 = vmax.f32 %v1691_v20, 0.0  ;;  %v1845_v57 = vsel %vm628_vm2, %v1840_v59, %v1844_v46  ;;  %v1848_v58 = vor.u32 %v1846_v34, %v1844_v46 }
 0x221   : > { %1897 = vrot.lane.b32.xlu1 %v1845_v57, %s3033_s23  ;;  %v1542_v57 = vadd.f32 %v3672_v25, %v1541_v19 }
 0x222   : > { %v1744_v27 = vpack.c.bf16 %v1727_v13, %v1727_v13 }
 0x223   : > { %v1640_v10 = vpop.f32.mrf.mxu3  ;;  %v3717_v37 = vld [vmem:[#allocation3 + $0xc] sm:$0xff]   ;;  %2270 = vmatpush.bf16.msrb.mxu2 %v2726_v17  ;;  %v3756_v13 = vpop.f32.mrf.mxu0  ;;  %v1595_v26 = vadd.f32 %v1594_v52, %v1542_v57 }
 0x224   : > { %1761 = vst.msk [vmem:[#allocation3 + $0x14] sm:$0xf] %vm331_vm1, %v1744_v27  ;;  %v1641_v32 = vadd.f32 %v1640_v10, %v1588_v1  ;;  %v1954_v55 = vshrl.u32 %v3717_v37, 16  ;;  %v1957_v33 = vshll.u32 %v3717_v37, 16  ;;  %v1928_v4 = vrot.slane %v3717_v37, 2  ;;  %v1597_v45 = vpop.f32.mrf.mxu2  ;;  %v1546_v36 = vpop.f32.mrf.mxu1 }
 0x226   : > { %v1694_v53 = vadd.f32 %v3693_v5, %v1641_v32  ;;  %v1956_v61 = vrot.slane %v1954_v55, 2  ;;  %v1959_v9 = vrot.slane %v1957_v33, 3  ;;  %v3734_v62 = vsel %vm733_vm3, %v1927_v50, %v1928_v4  ;;  %v2725_v33 = vld [vmem:[%s3992_s6 + $0x68] sm:$0xff] }
 0x227   : > { %2271 = vmatpush.bf16.msrb.mxu2 %v2725_v33 }
 0x228   : > { %v1728_v24 = vmax.f32 %v1694_v53, 0.0  ;;  %v1960_v31 = vor.u32 %v1959_v9, %v1956_v61 }
 0x22a   : > { %v1745_v23 = vpack.c.bf16 %v1728_v24, %v1728_v24  ;;  %v1961_v0 = vsel %vm754_vm4, %v1952_v44, %v1960_v31 }
 0x22b   : > { %v1642_v18 = vpop.f32.mrf.mxu3  ;;  %v3737_v11 = vld [vmem:[#allocation3 + $0x10] sm:$0xff]   ;;  %2016 = vrot.lane.b32.xlu0 %v1961_v0, %s3033_s23  ;;  %v3775_v9 = vpop.f32.mrf.mxu0 }
 0x22c   : > { %1762 = vst.msk [vmem:[#allocation3 + $0x18] sm:$0xf] %vm331_vm1, %v1745_v23  ;;  %v1643_v5 = vadd.f32 %v1642_v18, %v1590_v6  ;;  %v1850_v16 = vshll.u32 %v3737_v11, 16  ;;  %v1854_v35 = vshrl.u32 %v3737_v11, 16 }
 0x22e   : > { %v1696_v42 = vadd.f32 %v3697_v48, %v1643_v5  ;;  %v1852_v2 = vrot.slane %v1850_v16, 1  ;;  %v2718_v48 = vld [vmem:[%s3992_s6 + $0x30] sm:$0xff]  ;;  %v1599_v5 = vpop.f32.mrf.mxu2 }
 0x22f   : > { %2222 = vmatpush.bf16.msrb.mxu1 %v2718_v48 }
 0x230   : > { %v1729_v41 = vmax.f32 %v1696_v42, 0.0  ;;  %v1853_v7 = vsel %vm628_vm2, %v1848_v58, %v1852_v2  ;;  %v1856_v44 = vor.u32 %v1854_v35, %v1852_v2  ;;  %v1547_v42 = vadd.f32 %v3672_v25, %v1546_v36  ;;  %v1549_v58 = vpop.f32.mrf.mxu1 }
 0x232   : > { %v1746_v54 = vpack.c.bf16 %v1729_v41, %v1729_v41 }
 0x233   : > { %v1645_v12 = vpop.f32.mrf.mxu3  ;;  %v2985_v49 = vld [vmem:[#allocation3 + $0x14] sm:$0xff]   ;;  %1899 = vrot.lane.b32.xlu0 %v1853_v7, %s3033_s23 }
 0x234   : > { %1763 = vst.msk [vmem:[#allocation3 + $0x1c] sm:$0xf] %vm331_vm1, %v1746_v54  ;;  %v1646_v20 = vadd.f32 %v1645_v12, %v1593_v22  ;;  %v1963_v59 = vshrl.u32 %v2985_v49, 16  ;;  %v1966_v38 = vshll.u32 %v2985_v49, 16  ;;  %v1930_v46 = vrot.slane %v2985_v49, 2 }
 0x235   : > { %v1600_v49 = vadd.f32 %v1599_v5, %v1547_v42 }
 0x236   : > { %v1699_v3 = vadd.f32 %v3703_v30, %v1646_v20  ;;  %v1965_v63 = vrot.slane %v1963_v59, 2  ;;  %v1968_v27 = vrot.slane %v1966_v38, 3  ;;  %v3761_v1 = vsel %vm733_vm3, %v1928_v4, %v1930_v46  ;;  %v2724_v38 = vld [vmem:[%s3992_s6 + $0x60] sm:$0xff] }
 0x237   : > { %v1545_v4 = vadd.f32 %v3672_v25, %v1544_v39  ;;  %2272 = vmatpush.bf16.msrb.mxu2 %v2724_v38 }
 0x238   : > { %v1730_v10 = vmax.f32 %v1699_v3, 0.0  ;;  %v1969_v37 = vor.u32 %v1968_v27, %v1965_v63  ;;  %v1602_v3 = vpop.f32.mrf.mxu2 }
 0x239   : > { %v1598_v19 = vadd.f32 %v1597_v45, %v1545_v4  ;;  %v2723_v4 = vld [vmem:[%s3992_s6 + $0x58] sm:$0xff] }
 0x23a   : > { %v1747_v32 = vpack.c.bf16 %v1730_v10, %v1730_v10  ;;  %v1970_v50 = vsel %vm754_vm4, %v1960_v31, %v1969_v37 }
 0x23b   : > { %v1647_v29 = vpop.f32.mrf.mxu3  ;;  %v3764_v56 = vld [vmem:[#allocation3 + $0x18] sm:$0xff]   ;;  %2018 = vrot.lane.b32.xlu2 %v1970_v50, %s3033_s23  ;;  %2273 = vmatpush.bf16.msrb.mxu2 %v2723_v4 }
 0x23c   : > { %1764 = vst.msk [vmem:[#allocation3 + $0x20] sm:$0xf] %vm331_vm1, %v1747_v32  ;;  %v1648_v55 = vadd.f32 %v1647_v29, %v1595_v26  ;;  %v1858_v30 = vshll.u32 %v3764_v56, 16  ;;  %v1862_v63 = vshrl.u32 %v3764_v56, 16  ;;  %v1551_v32 = vpop.f32.mrf.mxu1 }
 0x23e   : > { %v1701_v53 = vadd.f32 %v3712_v60, %v1648_v55  ;;  %v1860_v61 = vrot.slane %v1858_v30, 1  ;;  %v2717_v60 = vld [vmem:[%s3992_s6 + $0x28] sm:$0xff] }
 0x23f   : > { %2223 = vmatpush.bf16.msrb.mxu1 %v2717_v60 }
 0x240   : > { %v1731_v24 = vmax.f32 %v1701_v53, 0.0  ;;  %v1861_v6 = vsel %vm628_vm2, %v1856_v44, %v1860_v61 }
 0x241   : > { %v3788_v12 = vpop.f32.mrf.mxu0 }
 0x242   : > { %v1748_v31 = vpack.c.bf16 %v1731_v24, %v1731_v24 }
 0x243   : > { %v1650_v23 = vpop.f32.mrf.mxu3  ;;  %v2987_v18 = vld [vmem:[#allocation3 + $0x1c] sm:$0xff]   ;;  %1901 = vrot.lane.b32.xlu2 %v1861_v6, %s3033_s23  ;;  %v1604_v6 = vpop.f32.mrf.mxu2 }
 0x244   : > { %1765 = vst.msk [vmem:[#allocation3 + $0x24] sm:$0xf] %vm331_vm1, %v1748_v31  ;;  %v1651_v0 = vadd.f32 %v1650_v23, %v1598_v19  ;;  %v1972_v16 = vshrl.u32 %v2987_v18, 16  ;;  %v1975_v17 = vshll.u32 %v2987_v18, 16  ;;  %v1932_v14 = vrot.slane %v2987_v18, 2 }
 0x246   : > { %v1704_v34 = vadd.f32 %v3723_v40, %v1651_v0  ;;  %v1974_v2 = vrot.slane %v1972_v16, 2  ;;  %v1977_v41 = vrot.slane %v1975_v17, 3  ;;  %v3786_v52 = vsel %vm733_vm3, %v1930_v46, %v1932_v14 }
 0x247   : > { %v1550_v46 = vadd.f32 %v3672_v25, %v1549_v58 }
 0x248   : > { %v1732_v54 = vmax.f32 %v1704_v34, 0.0  ;;  %v1978_v22 = vor.u32 %v1977_v41, %v1974_v2  ;;  %v2722_v34 = vld [vmem:[%s3992_s6 + $0x50] sm:$0xff] }
 0x249   : > { %v1603_v45 = vadd.f32 %v1602_v3, %v1550_v46  ;;  %v3803_v30 = vpop.f32.mrf.mxu0  ;;  %2274 = vmatpush.bf16.msrb.mxu2 %v2722_v34  ;;  %v2714_v41 = vld [vmem:[%s3992_s6 + $0x10] sm:$0xff] }
 0x24a   : > { %v1749_v7 = vpack.c.bf16 %v1732_v54, %v1732_v54  ;;  %v1979_v20 = vsel %vm754_vm4, %v1969_v37, %v1978_v22  ;;  %v1864_v37 = vor.u32 %v1862_v63, %v1860_v61  ;;  %v1552_v61 = vadd.f32 %v3672_v25, %v1551_v32 }
 0x24b   : > { %v1652_v39 = vpop.f32.mrf.mxu3  ;;  %v3791_v48 = vld [vmem:[#allocation3 + $0x20] sm:$0xff]   ;;  %2020 = vrot.lane.b32.xlu1 %v1979_v20, %s3033_s23 }
 0x24c   : > { %1766 = vst.msk [vmem:[#allocation3 + $0x28] sm:$0xf] %vm331_vm1, %v1749_v7  ;;  %v1653_v40 = vadd.f32 %v1652_v39, %v1600_v49  ;;  %v1866_v59 = vshll.u32 %v3791_v48, 16  ;;  %v1605_v60 = vadd.f32 %v1604_v6, %v1552_v61  ;;  %v1870_v58 = vshrl.u32 %v3791_v48, 16 }
 0x24e   : > { %v1706_v57 = vadd.f32 %v3742_v21, %v1653_v40  ;;  %v1868_v27 = vrot.slane %v1866_v59, 1  ;;  %v2716_v21 = vld [vmem:[%s3992_s6 + $0x20] sm:$0xff] }
 0x24f   : > { %2224 = vmatpush.bf16.msrb.mxu1 %v2716_v21 }
 0x250   : > { %v1733_v10 = vmax.f32 %v1706_v57, 0.0  ;;  %v1869_v50 = vsel %vm628_vm2, %v1864_v37, %v1868_v27  ;;  %v1872_v7 = vor.u32 %v1870_v58, %v1868_v27 }
 0x251   : > { %v1718_v25 = vpop.f32.mrf.mxu0 }
 0x252   : > { %v1750_v26 = vpack.c.bf16 %v1733_v10, %v1733_v10  ;;  %v2713_v10 = vld [vmem:[%s3992_s6 + $0x8] sm:$0xff] }
 0x253   : > { %v1655_v29 = vpop.f32.mrf.mxu3  ;;  %v2989_v55 = vld [vmem:[#allocation3 + $0x24] sm:$0xff]   ;;  %1903 = vrot.lane.b32.xlu1 %v1869_v50, %s3033_s23 }
 0x254   : > { %1767 = vst.msk [vmem:[#allocation3 + $0x2c] sm:$0xf] %vm331_vm1, %v1750_v26  ;;  %v1656_v33 = vadd.f32 %v1655_v29, %v1603_v45  ;;  %v1981_v36 = vshrl.u32 %v2989_v55, 16  ;;  %v1984_v53 = vshll.u32 %v2989_v55, 16  ;;  %v1934_v35 = vrot.slane %v2989_v55, 2 }
 0x256   : > { %v1709_v24 = vadd.f32 %v3756_v13, %v1656_v33  ;;  %v1983_v44 = vrot.slane %v1981_v36, 2  ;;  %v1986_v31 = vrot.slane %v1984_v53, 3  ;;  %v3816_v19 = vsel %vm733_vm3, %v1932_v14, %v1934_v35  ;;  %v2715_v14 = vld [vmem:[%s3992_s6 + $0x18] sm:$0xff]  ;;  %v2721_v33 = vld [vmem:[%s3992_s6 + $0x48] sm:$0xff]  ;;  %v2712_v36 = vld [vmem:[%s3992_s6] sm:$0xff] }
 0x257   : > { %2225 = vmatpush.bf16.msrb.mxu1 %v2715_v14  ;;  %2275 = vmatpush.bf16.msrb.mxu2 %v2721_v33 }
 0x258   : > { %v1734_v23 = vmax.f32 %v1709_v24, 0.0  ;;  %v1987_v18 = vor.u32 %v1986_v31, %v1983_v44  ;;  %v2720_v31 = vld [vmem:[%s3992_s6 + $0x40] sm:$0xff] }
 0x259   : > { %v1720_v59 = vpop.f32.mrf.mxu0 }
 0x25a   : > { %v1751_v0 = vpack.c.bf16 %v1734_v23, %v1734_v23  ;;  %v1988_v16 = vsel %vm754_vm4, %v1978_v22, %v1987_v18 }
 0x25b   : > { %v1657_v5 = vpop.f32.mrf.mxu3  ;;  %v3819_v17 = vld [vmem:[#allocation3 + $0x28] sm:$0xff]   ;;  %2022 = vrot.lane.b32.xlu0 %v1988_v16, %s3033_s23  ;;  %2226 = vmatpush.bf16.msrb.mxu1 %v2714_v41 }
 0x25c   : > { %1768 = vst.msk [vmem:[#allocation3 + $0x30] sm:$0xf] %vm331_vm1, %v1751_v0  ;;  %v1658_v13 = vadd.f32 %v1657_v5, %v1605_v60  ;;  %v1874_v42 = vshll.u32 %v3819_v17, 16  ;;  %v1878_v21 = vshrl.u32 %v3819_v17, 16  ;;  %2276 = vmatpush.bf16.msrb.mxu2 %v2720_v31 }
 0x25e   : > { %v1711_v2 = vadd.f32 %v3775_v9, %v1658_v13  ;;  %v1876_v54 = vrot.slane %v1874_v42, 1 }
 0x25f   : > { %2227 = vmatpush.bf16.msrb.mxu1 %v2713_v10 }
 0x260   : > { %v1735_v22 = vmax.f32 %v1711_v2, 0.0  ;;  %v1877_v20 = vsel %vm628_vm2, %v1872_v7, %v1876_v54 }
 0x262   : > { %v1752_v49 = vpack.c.bf16 %v1735_v22, %v1735_v22 }
 0x263   : > { %v1660_v39 = vpop.f32.mrf.mxu3  ;;  %v2990_v40 = vld [vmem:[#allocation3 + $0x2c] sm:$0xff]   ;;  %1905 = vrot.lane.b32.xlu0 %v1877_v20, %s3033_s23  ;;  %2228 = vmatpush.bf16.msrb.mxu1 %v2712_v36 }
 0x264   : > { %1769 = vst.msk [vmem:[#allocation3 + $0x34] sm:$0xf] %vm331_vm1, %v1752_v49  ;;  %v1661_v9 = vadd.f32 %v1660_v39, %v3675_v8  ;;  %v1990_v38 = vshrl.u32 %v2990_v40, 16  ;;  %v1993_v46 = vshll.u32 %v2990_v40, 16  ;;  %v1936_v57 = vrot.slane %v2990_v40, 2 }
 0x266   : > { %v1714_v3 = vadd.f32 %v3788_v12, %v1661_v9  ;;  %v1992_v63 = vrot.slane %v1990_v38, 2  ;;  %v1995_v27 = vrot.slane %v1993_v46, 3  ;;  %v3845_v37 = vsel %vm733_vm3, %v1934_v35, %v1936_v57 }
 0x268   : > { %v1736_v15 = vmax.f32 %v1714_v3, 0.0  ;;  %v1996_v32 = vor.u32 %v1995_v27, %v1992_v63 }
 0x26a   : > { %v1753_v8 = vpack.c.bf16 %v1736_v15, %v1736_v15  ;;  %v1997_v45 = vsel %vm754_vm4, %v1987_v18, %v1996_v32 }
 0x26b   : > { %v1662_v26 = vpop.f32.mrf.mxu3  ;;  %v3848_v29 = vld [vmem:[#allocation3 + $0x30] sm:$0xff]   ;;  %2024 = vrot.lane.b32.xlu2 %v1997_v45, %s3033_s23 }
 0x26c   : > { %1770 = vst.msk [vmem:[#allocation3 + $0x38] sm:$0xf] %vm331_vm1, %v1753_v8  ;;  %v1663_v12 = vadd.f32 %v1662_v26, %v3678_v28  ;;  %v1882_v50 = vshll.u32 %v3848_v29, 16  ;;  %v1880_v28 = vor.u32 %v1878_v21, %v1876_v54  ;;  %v2815_v5 = vunpack.c.h.b16 %v3848_v29 }
 0x26d   : > { %v1886_v10 = vshrl.u32 %v3848_v29, 16 }
 0x26e   : > { %v1716_v55 = vadd.f32 %v3803_v30, %v1663_v12  ;;  %v1884_v4 = vrot.slane %v1882_v50, 1 }
 0x270   : > { %v1737_v53 = vmax.f32 %v1716_v55, 0.0  ;;  %v1885_v24 = vsel %vm628_vm2, %v1880_v28, %v1884_v4  ;;  %v1888_v26 = vor.u32 %v1886_v10, %v1884_v4 }
 0x272   : > { %v1754_v35 = vpack.c.bf16 %v1737_v53, %v1737_v53 }
 0x273   : > { %v1665_v61 = vpop.f32.mrf.mxu3  ;;  %1907 = vrot.lane.b32.xlu2 %v1885_v24, %s3033_s23 }
 0x274   : > { %1771 = vst.msk [vmem:[#allocation3 + $0x3c] sm:$0xf] %vm331_vm1, %v1754_v35  ;;  %v1666_v30 = vadd.f32 %v1665_v61, %v3685_v51 }
 0x276   : > { %v1719_v44 = vadd.f32 %v1718_v25, %v1666_v30 }
 0x278   : > { %v1738_v23 = vmax.f32 %v1719_v44, 0.0 }
 0x27a   : > { %v1755_v6 = vpack.c.bf16 %v1738_v23, %v1738_v23 }
 0x27b   : > { %v1667_v18 = vpop.f32.mrf.mxu3  ;;  %v2920_v0 = vld [vmem:[#allocation3 + $0x38] sm:$0xff]  }
 0x27c   : > { %v1788_v60 = vld [vmem:[#allocation3 + $0x3c] sm:$0x1]  ;;  %1772 = vst.msk [vmem:[#allocation3 + $0x40] sm:$0x3] %vm335_vm6, %v1755_v6  ;;  %v3871_v16 = vunpack.c.l.b16 %v2920_v0  ;;  %v2819_v49 = vunpack.c.h.b16 %v2920_v0 }
 0x27d   : > { %v1832_v13 = vunpack.c.l.b16 %v1788_v60 }
 0x27e   : > { %v1925_v51 = vpack.c.b16 %v3871_v16, %v2815_v5 }
 0x27f   : > { %v1833_v41 = vpack.c.b16 %v1832_v13, %v3871_v16 }
 0x280   : > { %v1999_v25 = vshrl.u32 %v1925_v51, 16  ;;  %v2002_v42 = vshll.u32 %v1925_v51, 16  ;;  %v1938_v14 = vrot.slane %v1925_v51, 2 }
 0x281   : > { %v1890_v9 = vshll.u32 %v1833_v41, 16  ;;  %v1894_v55 = vshrl.u32 %v1833_v41, 16 }
 0x282   : > { %v2001_v34 = vrot.slane %v1999_v25, 2  ;;  %v2004_v2 = vrot.slane %v2002_v42, 3  ;;  %v3876_v54 = vsel %vm733_vm3, %v1936_v57, %v1938_v14 }
 0x283   : > { %v1792_v58 = vld [vmem:[#allocation3 + $0x40] sm:$0x7]  ;;  %v1892_v15 = vrot.slane %v1890_v9, 1 }
 0x284   : > { %v1791_v22 = vld [vmem:[#allocation3 + $0x40] sm:$0x3]  ;;  %v2005_v7 = vor.u32 %v2004_v2, %v2001_v34  ;;  %v1943_v39 = vunpack.c.l.b16 %v1792_v58  ;;  %v3931_v34 = vld [vmem:[%s3993_s7] ss:$0 sm:$0xff] }
 0x285   : > { %v1918_v20 = vunpack.c.l.b16 %v1791_v22  ;;  %v1893_v45 = vsel %vm628_vm2, %v1888_v26, %v1892_v15  ;;  %v1896_v21 = vor.u32 %v1894_v55, %v1892_v15 }
 0x286   : > { %v2006_v40 = vsel %vm754_vm4, %v1996_v32, %v2005_v7  ;;  %v1944_v59 = vpack.c.b16 %v1943_v39, %v2819_v49 }
 0x287   : > { %2026 = vrot.lane.b32.xlu1 %v2006_v40, %s3033_s23  ;;  %v3880_v38 = vpack.c.b16 %v1918_v20, %v2819_v49 }
 0x288   : > { %v2008_v46 = vshrl.u32 %v1944_v59, 16  ;;  %v2011_v3 = vshll.u32 %v1944_v59, 16 }
 0x289   : > { %v1940_v63 = vrot.slane %v3880_v38, 2 }
 0x28a   : > { %v2010_v27 = vrot.slane %v2008_v46, 2  ;;  %v2013_v57 = vrot.slane %v2011_v3, 3 }
 0x28b   : > { %v1941_v8 = vsel %vm733_vm3, %v1938_v14, %v1940_v63 }
 0x28c   : > { %v2014_v32 = vor.u32 %v2013_v57, %v2010_v27 }
 0x28e   : > { %2030 = vrot.lane.b32.xlu2 %v2014_v32, %s3033_s23  ;;  %v2015_v12 = vsel %vm754_vm4, %v2005_v7, %v2014_v32 }
 0x28f   : > { %1909 = vrot.lane.b32.xlu1 %v1893_v45, %s3033_s23  ;;  %2028 = vrot.lane.b32.xlu0 %v2015_v12, %s3033_s23 }
 0x293   : > { %v1898_v50 = vpop.permute.xlu1 %1897 }
 0x294   : > { %v2033_v33 = vsel %vm1121_vm5, %v3700_v43, %v1898_v50 }
 0x295   : > { %2229 = vmatmul.bf16.vlgmr.msrb.gmra.mxu1 %v2033_v33  ;;  %v2019_v35 = vpop.permute.xlu2 %2018 }
 0x296   : > { %v2063_v61 = vsel %vm1121_vm5, %v3761_v1, %v2019_v35 }
 0x297   : > { %1911 = vrot.lane.b32.xlu0 %v1896_v21, %s3033_s23 }
 0x29d   : > { %v2017_v4 = vpop.permute.xlu0 %2016  ;;  %v1902_v43 = vpop.permute.xlu2 %1901 }
 0x29e   : > { %v2059_v36 = vsel %vm1121_vm5, %v3734_v62, %v2017_v4  ;;  %v2039_v24 = vsel %vm1121_vm5, %v3737_v11, %v1902_v43 }
 0x29f   : > { %2277 = vmatmul.bf16.vlgmr.msrb.gmra.mxu2 %v2059_v36 }
 0x2a5   : > { %v1900_v53 = vpop.permute.xlu0 %1899 }
 0x2a6   : > { %v2036_v28 = vsel %vm1121_vm5, %v3707_v47, %v1900_v53 }
 0x2a7   : > { %2234 = vmatmul.bf16.gmra.mxu1 %v2036_v28 }
 0x2af   : > { %2282 = vmatmul.bf16.gmra.mxu2 %v2063_v61 }
 0x2b7   : > { %2239 = vmatmul.bf16.gmra.mxu1 %v2039_v24 }
 0x2bd   : > { %v2021_v30 = vpop.permute.xlu1 %2020 }
 0x2be   : > { %v2067_v62 = vsel %vm1121_vm5, %v3786_v52, %v2021_v30 }
 0x2bf   : > { %2287 = vmatmul.bf16.gmra.mxu2 %v2067_v62 }
 0x2c5   : > { %v1904_v44 = vpop.permute.xlu1 %1903  ;;  %v2025_v6 = vpop.permute.xlu2 %2024 }
 0x2c6   : > { %v2042_v47 = vsel %vm1121_vm5, %v3764_v56, %v1904_v44  ;;  %v2075_v52 = vsel %vm1121_vm5, %v3845_v37, %v2025_v6 }
 0x2c7   : > { %2244 = vmatmul.bf16.gmra.mxu1 %v2042_v47 }
 0x2cd   : > { %v2023_v31 = vpop.permute.xlu0 %2022  ;;  %v1908_v18 = vpop.permute.xlu2 %1907 }
 0x2ce   : > { %v2071_v1 = vsel %vm1121_vm5, %v3816_v19, %v2023_v31  ;;  %v2048_v56 = vsel %vm1121_vm5, %v3819_v17, %v1908_v18  ;;  %v1830_v17 = vpack.c.b16 %v3871_v16, %v3871_v16 }
 0x2cf   : > { %2292 = vmatmul.bf16.gmra.mxu2 %v2071_v1 }
 0x2d5   : > { %v1906_v23 = vpop.permute.xlu0 %1905 }
 0x2d6   : > { %v2045_v11 = vsel %vm1121_vm5, %v3791_v48, %v1906_v23 }
 0x2d7   : > { %2249 = vmatmul.bf16.gmra.mxu1 %v2045_v11 }
 0x2df   : > { %2297 = vmatmul.bf16.gmra.mxu2 %v2075_v52 }
 0x2e7   : > { %2254 = vmatmul.bf16.gmra.mxu1 %v2048_v56 }
 0x2e8   : > { %v2031_v42 = vpop.permute.xlu2 %2030 }
 0x2e9   : > { %v2087_v14 = vsel %vm1121_vm5, %v1940_v63, %v2031_v42 }
 0x2f9   : > { %v2027_v0 = vpop.permute.xlu1 %2026 }
 0x2fa   : > { %v2079_v19 = vsel %vm1121_vm5, %v3876_v54, %v2027_v0 }
 0x2fb   : > { %2302 = vmatmul.bf16.gmra.mxu2 %v2079_v19 }
 0x301   : > { %v1910_v60 = vpop.permute.xlu1 %1909  ;;  %v2029_v5 = vpop.permute.xlu0 %2028 }
 0x302   : > { %v2051_v48 = vsel %vm1121_vm5, %v3848_v29, %v1910_v60  ;;  %v2083_v37 = vsel %vm1121_vm5, %v1941_v8, %v2029_v5 }
 0x303   : > { %2259 = vmatmul.bf16.gmra.mxu1 %v2051_v48 }
 0x309   : > { %v1912_v51 = vpop.permute.xlu0 %1911 }
 0x30a   : > { %v2055_v13 = vsel %vm1121_vm5, %v1830_v17, %v1912_v51 }
 0x30b   : > { %2307 = vmatmul.bf16.gmra.mxu2 %v2083_v37 }
 0x312   : > { %v2230_v25 = vpop.f32.mrf.mxu1 }
 0x313   : > { %2264 = vmatmul.bf16.gmra.mxu1 %v2055_v13  ;;  %v2231_v16 = vadd.f32 %v3931_v34, %v2230_v25 }
 0x31a   : > { %v2232_v29 = vpop.f32.mrf.mxu1 }
 0x31b   : > { %2312 = vmatmul.bf16.gmra.mxu2 %v2087_v14  ;;  %v2233_v54 = vadd.f32 %v3931_v34, %v2232_v29 }
 0x322   : > { %v2278_v2 = vpop.f32.mrf.mxu2 }
 0x323   : > { %v2279_v41 = vadd.f32 %v2278_v2, %v2231_v16 }
 0x324   : > { %v2235_v58 = vpop.f32.mrf.mxu1 }
 0x325   : > { %2317 = vst.msk [vmem:[%s3937_s14] sm:$0xff] %vm1121_vm5, %v2279_v41  ;;  %v2236_v39 = vadd.f32 %v3931_v34, %v2235_v58 }
 0x32a   : > { %v2280_v22 = vpop.f32.mrf.mxu2 }
 0x32b   : > { %v2281_v7 = vadd.f32 %v2280_v22, %v2233_v54 }
 0x32c   : > { %v2237_v49 = vpop.f32.mrf.mxu1 }
 0x32d   : > { %2318 = vst.msk [vmem:[%s3937_s14 + $0x8] sm:$0xff] %vm1121_vm5, %v2281_v7  ;;  %v2238_v9 = vadd.f32 %v3931_v34, %v2237_v49 }
 0x332   : > { %v2283_v20 = vpop.f32.mrf.mxu2 }
 0x333   : > { %v2284_v40 = vadd.f32 %v2283_v20, %v2236_v39 }
 0x334   : > { %v2240_v59 = vpop.f32.mrf.mxu1 }
 0x335   : > { %2319 = vst.msk [vmem:[%s3937_s14 + $0x10] sm:$0xff] %vm1121_vm5, %v2284_v40  ;;  %v2241_v63 = vadd.f32 %v3931_v34, %v2240_v59 }
 0x33a   : > { %v2285_v38 = vpop.f32.mrf.mxu2 }
 0x33b   : > { %v2286_v46 = vadd.f32 %v2285_v38, %v2238_v9 }
 0x33c   : > { %v2242_v3 = vpop.f32.mrf.mxu1 }
 0x33d   : > { %2320 = vst.msk [vmem:[%s3937_s14 + $0x18] sm:$0xff] %vm1121_vm5, %v2286_v46  ;;  %v2243_v15 = vadd.f32 %v3931_v34, %v2242_v3 }
 0x342   : > { %v2288_v27 = vpop.f32.mrf.mxu2 }
 0x343   : > { %v2289_v57 = vadd.f32 %v2288_v27, %v2241_v63 }
 0x344   : > { %v2245_v10 = vpop.f32.mrf.mxu1 }
 0x345   : > { %2321 = vst.msk [vmem:[%s3937_s14 + $0x20] sm:$0xff] %vm1121_vm5, %v2289_v57  ;;  %v2246_v45 = vadd.f32 %v3931_v34, %v2245_v10 }
 0x34a   : > { %v2290_v8 = vpop.f32.mrf.mxu2 }
 0x34b   : > { %v2291_v32 = vadd.f32 %v2290_v8, %v2243_v15 }
 0x34c   : > { %v2247_v26 = vpop.f32.mrf.mxu1 }
 0x34d   : > { %2322 = vst.msk [vmem:[%s3937_s14 + $0x28] sm:$0xff] %vm1121_vm5, %v2291_v32  ;;  %v2248_v55 = vadd.f32 %v3931_v34, %v2247_v26 }
 0x352   : > { %v2293_v12 = vpop.f32.mrf.mxu2 }
 0x353   : > { %v2294_v50 = vadd.f32 %v2293_v12, %v2246_v45 }
 0x354   : > { %v2250_v33 = vpop.f32.mrf.mxu1 }
 0x355   : > { %2323 = vst.msk [vmem:[%s3937_s14 + $0x30] sm:$0xff] %vm1121_vm5, %v2294_v50  ;;  %v2251_v36 = vadd.f32 %v3931_v34, %v2250_v33 }
 0x35a   : > { %v2295_v21 = vpop.f32.mrf.mxu2 }
 0x35b   : > { %v2296_v4 = vadd.f32 %v2295_v21, %v2248_v55 }
 0x35c   : > { %v2252_v28 = vpop.f32.mrf.mxu1 }
 0x35d   : > { %2324 = vst.msk [vmem:[%s3937_s14 + $0x38] sm:$0xff] %vm1121_vm5, %v2296_v4  ;;  %v2253_v61 = vadd.f32 %v3931_v34, %v2252_v28 }
 0x362   : > { %v2298_v53 = vpop.f32.mrf.mxu2 }
 0x363   : > { %v2299_v35 = vadd.f32 %v2298_v53, %v2251_v36 }
 0x364   : > { %v2255_v30 = vpop.f32.mrf.mxu1 }
 0x365   : > { %2325 = vst.msk [vmem:[%s3937_s14 + $0x40] sm:$0xff] %vm1121_vm5, %v2299_v35  ;;  %v2256_v44 = vadd.f32 %v3931_v34, %v2255_v30 }
 0x36a   : > { %v2300_v43 = vpop.f32.mrf.mxu2 }
 0x36b   : > { %v2301_v24 = vadd.f32 %v2300_v43, %v2253_v61 }
 0x36c   : > { %v2257_v62 = vpop.f32.mrf.mxu1 }
 0x36d   : > { %2326 = vst.msk [vmem:[%s3937_s14 + $0x48] sm:$0xff] %vm1121_vm5, %v2301_v24  ;;  %v2258_v23 = vadd.f32 %v3931_v34, %v2257_v62 }
 0x37e   : > { %v2303_v47 = vpop.f32.mrf.mxu2 }
 0x37f   : > { %v2304_v31 = vadd.f32 %v2303_v47, %v2256_v44 }
 0x380   : > { %v2260_v1 = vpop.f32.mrf.mxu1 }
 0x381   : > { %2327 = vst.msk [vmem:[%s3937_s14 + $0x50] sm:$0xff] %vm1121_vm5, %v2304_v31  ;;  %v2261_v18 = vadd.f32 %v3931_v34, %v2260_v1 }
 0x386   : > { %v2305_v11 = vpop.f32.mrf.mxu2 }
 0x387   : > { %v2306_v6 = vadd.f32 %v2305_v11, %v2258_v23 }
 0x388   : > { %v2262_v52 = vpop.f32.mrf.mxu1 }
 0x389   : > { %2328 = vst.msk [vmem:[%s3937_s14 + $0x58] sm:$0xff] %vm1121_vm5, %v2306_v6  ;;  %v2263_v60 = vadd.f32 %v3931_v34, %v2262_v52 }
 0x38e   : > { %v2308_v56 = vpop.f32.mrf.mxu2 }
 0x38f   : > { %v2309_v0 = vadd.f32 %v2308_v56, %v2261_v18 }
 0x390   : > { %v2265_v19 = vpop.f32.mrf.mxu1 }
 0x391   : > { %2329 = vst.msk [vmem:[%s3937_s14 + $0x60] sm:$0xff] %vm1121_vm5, %v2309_v0  ;;  %v2266_v51 = vadd.f32 %v3931_v34, %v2265_v19 }
 0x396   : > { %v2310_v48 = vpop.f32.mrf.mxu2 }
 0x397   : > { %v2311_v5 = vadd.f32 %v2310_v48, %v2263_v60 }
 0x398   : > { %v2267_v37 = vpop.f32.mrf.mxu1 }
 0x399   : > { %2330 = vst.msk [vmem:[%s3937_s14 + $0x68] sm:$0xff] %vm1121_vm5, %v2311_v5 }
 0x39e   : > { %v2313_v17 = vpop.f32.mrf.mxu2 }
 0x39f   : > { %v2314_v13 = vadd.f32 %v2313_v17, %v2266_v51 }
 0x3a1   : > { %2331 = vst.msk [vmem:[%s3937_s14 + $0x70] sm:$0xff] %vm1121_vm5, %v2314_v13 }
 0x3a6   : > { %v2315_v25 = vpop.f32.mrf.mxu2 }
 0x3a7 PF: > { %s18_s27 = sadd.s32 1, %s3030_s27  }
 0x3a8   : > { %p15_p6 = scmp.ge.s32.totalorder %s18_s27, 4  }
 0x3aa   :  { %17 = sbr.rel (!%p15_p6) target bundleno = 1 (0x1), region = 85 }

</bundles_post_ra>
